<compile_context>
chip_gen: v6e
topology: v6e:2x2x1
jax: 0.10.0
libtpu: 0.0.40
codegen_flags: <defaults>
</compile_context>

<pallas_src>
import functools
import math

import jax
import jax.numpy as jnp
from jax.experimental import pallas as pl
from jax.experimental.pallas import tpu as pltpu


# ----------------------------------------------------------------------------
# Fused per-batch kernel
# ----------------------------------------------------------------------------

def _gcgc_fused_kernel(xstk_ref, xc_ref, a_ref, kband_ref,        # VMEM blocks
                       w3_ref, b3_ref, db_ref,                    # SMEM params
                       z_ref, sse_ref, ridge_ref,                 # outputs
                       *, C, T, V, ts, pad, stride, T_out, Trow, Cout, alpha):
    xstk = xstk_ref[0]     # (C*Tp, Vp)  SAME-padded input, (channel, padded-time) stacked in rows
    xcb = xc_ref[0]        # (C, Tc, V)  causally (left) time-padded input
    amat = a_ref[...]      # (V, V)      adjacency (zeros if A is None)

    # ---- conv1.mean(1) and conv2.mean(1): ONE band-matrix MXU dot ----
    # y rows: [0:T] -> conv1 time-conv, [(1+tw)*Trow : (1+tw)*Trow+T] -> conv2 at V-offset tw.
    y = jnp.dot(kband_ref[...], xstk, preferred_element_type=jnp.float32)  # ((ts+1)*Trow, Vp)

    x1f = y[0:T, pad:pad + V] + db_ref[0, 0]        # (T, V), folded (BN-scaled) bias means
    x2f = y[Trow:Trow + T, 0:V]
    for tw in range(1, ts):
        r0 = (1 + tw) * Trow
        x2f = x2f + y[r0:r0 + T, tw:tw + V]

    # ---- pairwise tanh difference + ridge (tanh BEFORE alpha/A, as in module) ----
    diff = jnp.tanh(x1f[:, :, None] - x2f[:, None, :])   # (ts, V, V) : [tau, k, i]
    sq = diff * diff
    ridge_ref[0] = jnp.sum(jnp.sum(jnp.sum(sq, axis=-1), axis=-1, keepdims=True),
                           axis=0, keepdims=True)         # (1, 1)

    # per-tau graph weights w_tau[k, i] = alpha * tanh(x1f[tau,k] - x2f[tau,i]) + A[k,i]
    wts = [alpha * diff[tau] + amat for tau in range(ts)]

    # ---- grouped causal conv1d (tau-accumulated matmuls) + MSE partial sum ----
    span = stride * (T_out - 1) + 1
    sse_acc = jnp.zeros((1, 1), jnp.float32)
    zr = []                                                # per input channel: (T_out, V)
    for c in range(C):
        acc = jnp.zeros((T_out, V), jnp.float32)
        tgt = None
        for tau in range(ts):
            lhs = xcb[c, tau:tau + span:stride, :]         # (T_out, V)
            acc = acc + jnp.dot(lhs, wts[tau], preferred_element_type=jnp.float32)
            if tau == ts - 1:                              # MSE target == tau=ts-1 window
                tgt = lhs
        zr.append(acc)
        d = acc - tgt
        sse_acc = sse_acc + jnp.sum(jnp.sum(d * d, axis=-1, keepdims=True),
                                    axis=0, keepdims=True)
    sse_ref[0] = sse_acc                                   # (1, 1) per-batch squared error

    # ---- conv3 (1x1): z[b, o, t, i] = b3[o] + sum_c w3[o, c] * Zr[b, c, t, i] ----
    for o in range(Cout):
        z3 = w3_ref[o, 0] * zr[0]
        for c in range(1, C):
            z3 = z3 + w3_ref[o, c] * zr[c]
        z_ref[0, o, :, :] = z3 + b3_ref[0, o]


# ----------------------------------------------------------------------------
# Forward wrapper (only cheap weight folding / band assembly / zero-pad in XLA)
# ----------------------------------------------------------------------------

def gcgc_t_forward(x, params, *, time_step, stride=1, A=None, alpha=1.0):
    B, C, T, V = x.shape
    ts = time_step
    assert T == ts, "GCGC_T's reshape/grouped-conv chain requires T == time_step"
    pad = (ts - 1) // 2
    Tp, Vp = T + 2 * pad, V + 2 * pad
    Tc = T + ts - 1
    T_out = (Tc - ts) // stride + 1
    Trow = ((T + 7) // 8) * 8                       # sublane-aligned row block size
    Cout = params["w3"].shape[0]

    x = x.astype(jnp.float32)
    bn_scale = jnp.float32(1.0 / math.sqrt(1.0 + 1e-5))   # BN2d eval, gamma=1 beta=0 rm=0 rv=1

    # Fold the .mean(1) over output channels (and BN scale / bias means) into weights.
    w1r = jnp.mean(params["w1"][:, :, :, 0].astype(jnp.float32), axis=0) * bn_scale  # (C, ts)
    w2r = jnp.mean(params["w2"].astype(jnp.float32), axis=0)                          # (C, ts, ts)
    db = (jnp.mean(params["b1"].astype(jnp.float32)) * bn_scale
          - jnp.mean(params["b2"].astype(jnp.float32))).reshape(1, 1)
    w3f = params["w3"][:, :, 0, 0].astype(jnp.float32)                                # (Cout, C)
    b3r = params["b3"].astype(jnp.float32).reshape(1, Cout)
    amat = (A.astype(jnp.float32) if A is not None
            else jnp.zeros((V, V), jnp.float32))

    # Toeplitz/band matrix so both conv means become one MXU dot per batch.
    rel = jnp.arange(Tp)[None, :] - jnp.arange(T)[:, None]        # (T, Tp), rel = th
    valid = (rel >= 0) & (rel < ts)
    relc = jnp.clip(rel, 0, ts - 1)
    k1 = jnp.where(valid[None], w1r[:, relc], 0.0)                # (C, T, Tp)
    k1 = jnp.transpose(k1, (1, 0, 2)).reshape(T, C * Tp)
    k2 = jnp.where(valid[None, :, :, None], w2r[:, relc, :], 0.0)  # (C, T, Tp, ts)
    k2 = jnp.transpose(k2, (3, 1, 0, 2)).reshape(ts, T, C * Tp)    # (tw, t, c*Tp)
    kband = jnp.zeros((ts + 1, Trow, C * Tp), jnp.float32)
    kband = kband.at[0, :T].set(k1)
    kband = kband.at[1:, :T].set(k2)
    kband = kband.reshape((ts + 1) * Trow, C * Tp)

    # Two cheap zero-pads of x (no data duplication).
    xpad = jnp.pad(x, ((0, 0), (0, 0), (pad, pad), (pad, pad)))    # SAME pad (T and V)
    xstk = xpad.reshape(B, C * Tp, Vp)                             # rows = (c, padded t)
    xc = jnp.pad(x, ((0, 0), (0, 0), (ts - 1, 0), (0, 0)))         # causal time pad

    kernel = functools.partial(
        _gcgc_fused_kernel, C=C, T=T, V=V, ts=ts, pad=pad, stride=stride,
        T_out=T_out, Trow=Trow, Cout=Cout, alpha=float(alpha))

    z, sse, ridge3 = pl.pallas_call(
        kernel,
        grid=(B,),
        in_specs=[
            pl.BlockSpec((1, C * Tp, Vp), lambda b: (b, 0, 0)),           # xstk
            pl.BlockSpec((1, C, Tc, V), lambda b: (b, 0, 0, 0)),          # xc
            pl.BlockSpec((V, V), lambda b: (0, 0)),                       # A (constant)
            pl.BlockSpec(((ts + 1) * Trow, C * Tp), lambda b: (0, 0)),    # band matrix
            pl.BlockSpec(memory_space=pltpu.MemorySpace.SMEM),            # w3f (Cout, C)
            pl.BlockSpec(memory_space=pltpu.MemorySpace.SMEM),            # b3  (1, Cout)
            pl.BlockSpec(memory_space=pltpu.MemorySpace.SMEM),            # db  (1, 1)
        ],
        out_shape=(
            jax.ShapeDtypeStruct((B, Cout, T_out, V), jnp.float32),       # z
            jax.ShapeDtypeStruct((B, 1, 1), jnp.float32),                 # per-batch SSE
            jax.ShapeDtypeStruct((B, 1, 1), jnp.float32),                 # per-batch ridge
        ),
        out_specs=(
            pl.BlockSpec((1, Cout, T_out, V), lambda b: (b, 0, 0, 0)),
            pl.BlockSpec((1, 1, 1), lambda b: (b, 0, 0)),
            pl.BlockSpec((1, 1, 1), lambda b: (b, 0, 0)),
        ),
        compiler_params=pltpu.CompilerParams(
            dimension_semantics=("parallel",)),
    )(xstk, xc, amat, kband, w3f, b3r, db)

    loss = jnp.sum(sse) / jnp.float32(B * V * C * T_out)   # MSELoss(reduction='mean')
    ridge = ridge3[:, 0, 0]
    return z, loss, ridge


# ----------------------------------------------------------------------------
# Pure-JAX reference (same interpretation) for correctness checking
# ----------------------------------------------------------------------------

def _reference(x, params, *, time_step, stride=1, A=None, alpha=1.0):
    B, C, T, V = x.shape
    ts = time_step
    pad = (ts - 1) // 2
    bn_scale = 1.0 / math.sqrt(1.0 + 1e-5)
    w1m = params["w1"][:, :, :, 0].astype(jnp.float32).mean(0) * bn_scale   # (C, ts)
    w2m = params["w2"].astype(jnp.float32).mean(0)                          # (C, ts, ts)
    b1m = params["b1"].astype(jnp.float32).mean() * bn_scale
    b2m = params["b2"].astype(jnp.float32).mean()
    w3 = params["w3"][:, :, 0, 0].astype(jnp.float32)
    b3 = params["b3"].astype(jnp.float32)
    amat = A.astype(jnp.float32) if A is not None else jnp.zeros((V, V), jnp.float32)

    xf = x.astype(jnp.float32)
    xtp = jnp.pad(xf, ((0, 0), (0, 0), (pad, pad), (0, 0)))
    xfp = jnp.pad(xf, ((0, 0), (0, 0), (pad, pad), (pad, pad)))
    x1c = jnp.stack([xtp[:, :, th:th + T, :] for th in range(ts)], axis=2)   # (B,C,ts,T,V)
    x1 = jnp.einsum('bchtv,ch->btv', x1c, w1m) + b1m
    cols = [xfp[:, :, th:th + T, tw:tw + V] for th in range(ts) for tw in range(ts)]
    xw = jnp.stack(cols, axis=2).reshape(B, C, ts, ts, T, V)
    x2 = jnp.einsum('bchwtv,chw->btv', xw, w2m) + b2m

    diff = jnp.tanh(x1[..., :, None] - x2[..., None, :])                     # (B,T,V,V)
    ridge = jnp.sum(diff.reshape(B, -1) ** 2, axis=-1)
    wts = alpha * diff + amat[None, None]

    xc = jnp.pad(xf, ((0, 0), (0, 0), (ts - 1, 0), (0, 0)))
    Tc = T + ts - 1
    T_out = (Tc - ts) // stride + 1
    span = stride * (T_out - 1) + 1
    lhs = jnp.stack([xc[:, :, tau:tau + span:stride, :] for tau in range(ts)], axis=2)
    zpre = jnp.einsum('bcmtk,bmki->bcti', lhs, wts)                          # (B,C,T_out,V)
    tgt = xc[:, :, ts - 1:ts - 1 + span:stride, :]
    loss = jnp.mean((zpre - tgt) ** 2)
    z = jnp.einsum('oc,bcti->boti', w3, zpre) + b3[None, :, None, None]
    return z, loss, ridge


# ----------------------------------------------------------------------------
# Demo
# ----------------------------------------------------------------------------

if __name__ == "__main__":
    B, C, V = 2, 3, 25          # in_channels=3 (<=16 -> rel_channels=8, unused), 25 joints
    TS = 9                      # time_step (default); forward requires T == time_step
    T = TS
    COUT = 8                    # out_channels
    STRIDE = 1

    key = jax.random.PRNGKey(0)
    kw1, kw2, kw3, kx = jax.random.split(key, 4)
    params = {
        "w1": 0.1 * jax.random.normal(kw1, (TS, C, TS, 1), jnp.float32),   # unit_tcn conv (ts,1)
        "b1": jnp.zeros((TS,), jnp.float32),
        "w2": 0.1 * jax.random.normal(kw2, (TS, C, TS, TS), jnp.float32),  # conv2 (ts,ts)
        "b2": jnp.zeros((TS,), jnp.float32),
        "w3": 0.1 * jax.random.normal(kw3, (COUT, C, 1, 1), jnp.float32),  # conv3 (1x1)
        "b3": jnp.zeros((COUT,), jnp.float32),
    }
    x = jax.random.normal(kx, (B, C, T, V), jnp.float32)

    fwd = jax.jit(functools.partial(gcgc_t_forward, time_step=TS, stride=STRIDE))
    z, loss, ridge = fwd(x, params)
    jax.block_until_ready((z, loss, ridge))

    assert z.shape == (B, COUT, T, V), z.shape
    assert loss.shape == (), loss.shape
    assert ridge.shape == (B,), ridge.shape
    assert jnp.all(jnp.isfinite(z)) and jnp.isfinite(loss) and jnp.all(jnp.isfinite(ridge))

    z_ref, loss_ref, ridge_ref = _reference(x, params, time_step=TS, stride=STRIDE)
    assert jnp.allclose(z, z_ref, rtol=1e-3, atol=1e-3)
    assert jnp.allclose(loss, loss_ref, rtol=1e-3, atol=1e-3)
    assert jnp.allclose(ridge, ridge_ref, rtol=1e-3, atol=1e-3)

    print("KERNEL_OK")
</pallas_src>

<mosaic_0001>
module attributes {stable_mosaic.version = 11 : i64} {
  func.func @_gcgc_fused_kernel(%arg0: i32, %arg1: memref<1x51x33xf32, #tpu.memory_space<vmem>>, %arg2: memref<1x3x17x25xf32, #tpu.memory_space<vmem>>, %arg3: memref<25x25xf32, #tpu.memory_space<vmem>>, %arg4: memref<160x51xf32, #tpu.memory_space<vmem>>, %arg5: memref<8x3xf32, #tpu.memory_space<smem>>, %arg6: memref<1x8xf32, #tpu.memory_space<smem>>, %arg7: memref<1x1xf32, #tpu.memory_space<smem>>, %arg8: memref<1x8x9x25xf32, #tpu.memory_space<vmem>>, %arg9: memref<1x1x1xf32, #tpu.memory_space<vmem>>, %arg10: memref<1x1x1xf32, #tpu.memory_space<vmem>>) attributes {dimension_semantics = [#tpu.dimension_semantics<parallel>], iteration_bounds = array<i64: 2>, scalar_prefetch = 0 : i64, scratch_operands = 0 : i64, tpu.core_type = #tpu.core_type<tc>, window_params = [{transform_indices = @transform_0, window_bounds = array<i64: 1, 51, 33>}, {transform_indices = @transform_1, window_bounds = array<i64: 1, 3, 17, 25>}, {pipeline_mode = #tpu.pipeline_mode<synchronous>, transform_indices = @transform_2, window_bounds = array<i64: 25, 25>}, {pipeline_mode = #tpu.pipeline_mode<synchronous>, transform_indices = @transform_3, window_bounds = array<i64: 160, 51>}, {transform_indices = @transform_4, window_bounds = array<i64: 8, 3>}, {transform_indices = @transform_5, window_bounds = array<i64: 1, 8>}, {transform_indices = @transform_6, window_bounds = array<i64: 1, 1>}, {transform_indices = @transform_7, window_bounds = array<i64: 1, 8, 9, 25>}, {transform_indices = @transform_8, window_bounds = array<i64: 1, 1, 1>}, {transform_indices = @transform_9, window_bounds = array<i64: 1, 1, 1>}]} {
    %c0 = arith.constant 0 : index
    %c0_0 = arith.constant 0 : index
    %c0_1 = arith.constant 0 : index
    %0 = vector.load %arg1[%c0, %c0_0, %c0_1] : memref<1x51x33xf32, #tpu.memory_space<vmem>>, vector<1x51x33xf32>
    %1 = vector.shape_cast %0 : vector<1x51x33xf32> to vector<51x33xf32>
    %c0_2 = arith.constant 0 : index
    %c0_3 = arith.constant 0 : index
    %c0_4 = arith.constant 0 : index
    %c0_5 = arith.constant 0 : index
    %2 = vector.load %arg2[%c0_2, %c0_3, %c0_4, %c0_5] : memref<1x3x17x25xf32, #tpu.memory_space<vmem>>, vector<1x3x17x25xf32>
    %3 = vector.shape_cast %2 : vector<1x3x17x25xf32> to vector<3x17x25xf32>
    %c0_6 = arith.constant 0 : index
    %c0_7 = arith.constant 0 : index
    %4 = vector.load %arg3[%c0_6, %c0_7] : memref<25x25xf32, #tpu.memory_space<vmem>>, vector<25x25xf32>
    %c0_8 = arith.constant 0 : index
    %c0_9 = arith.constant 0 : index
    %5 = vector.load %arg4[%c0_8, %c0_9] : memref<160x51xf32, #tpu.memory_space<vmem>>, vector<160x51xf32>
    %cst = arith.constant dense<0.000000e+00> : vector<160x33xf32>
    %6 = tpu.matmul %5, %1, %cst {dimension_numbers = #tpu.dot_dimension_numbers<[1], [0], [0], [1], [0, 0, 1, 1], [], []>} : vector<160x51xf32>, vector<51x33xf32>, vector<160x33xf32> -> vector<160x33xf32>
    %7 = vector.extract_strided_slice %6 {offsets = [0, 4], sizes = [9, 25], strides = [1, 1]} : vector<160x33xf32> to vector<9x25xf32>
    %c0_10 = arith.constant 0 : index
    %c0_11 = arith.constant 0 : index
    %8 = memref.load %arg7[%c0_10, %c0_11] : memref<1x1xf32, #tpu.memory_space<smem>>
    %9 = vector.broadcast %8 : f32 to vector<9x25xf32>
    %10 = arith.addf %7, %9 : vector<9x25xf32>
    %11 = vector.extract_strided_slice %6 {offsets = [16, 0], sizes = [9, 25], strides = [1, 1]} : vector<160x33xf32> to vector<9x25xf32>
    %12 = vector.extract_strided_slice %6 {offsets = [32, 1], sizes = [9, 25], strides = [1, 1]} : vector<160x33xf32> to vector<9x25xf32>
    %13 = arith.addf %11, %12 : vector<9x25xf32>
    %14 = vector.extract_strided_slice %6 {offsets = [48, 2], sizes = [9, 25], strides = [1, 1]} : vector<160x33xf32> to vector<9x25xf32>
    %15 = arith.addf %13, %14 : vector<9x25xf32>
    %16 = vector.extract_strided_slice %6 {offsets = [64, 3], sizes = [9, 25], strides = [1, 1]} : vector<160x33xf32> to vector<9x25xf32>
    %17 = arith.addf %15, %16 : vector<9x25xf32>
    %18 = vector.extract_strided_slice %6 {offsets = [80, 4], sizes = [9, 25], strides = [1, 1]} : vector<160x33xf32> to vector<9x25xf32>
    %19 = arith.addf %17, %18 : vector<9x25xf32>
    %20 = vector.extract_strided_slice %6 {offsets = [96, 5], sizes = [9, 25], strides = [1, 1]} : vector<160x33xf32> to vector<9x25xf32>
    %21 = arith.addf %19, %20 : vector<9x25xf32>
    %22 = vector.extract_strided_slice %6 {offsets = [112, 6], sizes = [9, 25], strides = [1, 1]} : vector<160x33xf32> to vector<9x25xf32>
    %23 = arith.addf %21, %22 : vector<9x25xf32>
    %24 = vector.extract_strided_slice %6 {offsets = [128, 7], sizes = [9, 25], strides = [1, 1]} : vector<160x33xf32> to vector<9x25xf32>
    %25 = arith.addf %23, %24 : vector<9x25xf32>
    %26 = vector.extract_strided_slice %6 {offsets = [144, 8], sizes = [9, 25], strides = [1, 1]} : vector<160x33xf32> to vector<9x25xf32>
    %27 = arith.addf %25, %26 : vector<9x25xf32>
    %28 = vector.shape_cast %10 : vector<9x25xf32> to vector<9x25x1xf32>
    %29 = vector.shape_cast %27 : vector<9x25xf32> to vector<9x1x25xf32>
    %30 = vector.broadcast %28 : vector<9x25x1xf32> to vector<9x25x25xf32>
    %31 = vector.broadcast %29 : vector<9x1x25xf32> to vector<9x25x25xf32>
    %32 = arith.subf %30, %31 : vector<9x25x25xf32>
    %33 = math.tanh %32 : vector<9x25x25xf32>
    %34 = arith.mulf %33, %33 : vector<9x25x25xf32>
    %cst_12 = arith.constant dense<0.000000e+00> : vector<9x25xf32>
    %35 = vector.multi_reduction <add>, %34, %cst_12 [2] : vector<9x25x25xf32> to vector<9x25xf32>
    %cst_13 = arith.constant dense<0.000000e+00> : vector<9xf32>
    %36 = vector.multi_reduction <add>, %35, %cst_13 [1] : vector<9x25xf32> to vector<9xf32>
    %37 = vector.shape_cast %36 : vector<9xf32> to vector<9x1xf32>
    %cst_14 = arith.constant dense<0.000000e+00> : vector<1xf32>
    %38 = vector.multi_reduction <add>, %37, %cst_14 [0] : vector<9x1xf32> to vector<1xf32>
    %39 = vector.shape_cast %38 : vector<1xf32> to vector<1x1xf32>
    %c0_15 = arith.constant 0 : index
    %c0_16 = arith.constant 0 : index
    %c0_17 = arith.constant 0 : index
    %40 = vector.load %arg10[%c0_15, %c0_16, %c0_17] : memref<1x1x1xf32, #tpu.memory_space<vmem>>, vector<1x1x1xf32>
    %41 = vector.shape_cast %40 : vector<1x1x1xf32> to vector<1x1xf32>
    %42 = vector.shape_cast %39 : vector<1x1xf32> to vector<1x1x1xf32>
    tpu.vector_store %arg10[%c0_15, %c0_16, %c0_17], %42 {strides = array<i32>} : memref<1x1x1xf32, #tpu.memory_space<vmem>>, vector<1x1x1xf32>,
    %43 = vector.extract_strided_slice %33 {offsets = [0, 0, 0], sizes = [1, 25, 25], strides = [1, 1, 1]} : vector<9x25x25xf32> to vector<1x25x25xf32>
    %44 = vector.shape_cast %43 : vector<1x25x25xf32> to vector<25x25xf32>
    %cst_18 = arith.constant 1.000000e+00 : f32
    %45 = vector.broadcast %cst_18 : f32 to vector<25x25xf32>
    %46 = arith.mulf %45, %44 : vector<25x25xf32>
    %47 = arith.addf %46, %4 : vector<25x25xf32>
    %48 = vector.extract_strided_slice %33 {offsets = [1, 0, 0], sizes = [1, 25, 25], strides = [1, 1, 1]} : vector<9x25x25xf32> to vector<1x25x25xf32>
    %49 = vector.shape_cast %48 : vector<1x25x25xf32> to vector<25x25xf32>
    %cst_19 = arith.constant 1.000000e+00 : f32
    %50 = vector.broadcast %cst_19 : f32 to vector<25x25xf32>
    %51 = arith.mulf %50, %49 : vector<25x25xf32>
    %52 = arith.addf %51, %4 : vector<25x25xf32>
    %53 = vector.extract_strided_slice %33 {offsets = [2, 0, 0], sizes = [1, 25, 25], strides = [1, 1, 1]} : vector<9x25x25xf32> to vector<1x25x25xf32>
    %54 = vector.shape_cast %53 : vector<1x25x25xf32> to vector<25x25xf32>
    %cst_20 = arith.constant 1.000000e+00 : f32
    %55 = vector.broadcast %cst_20 : f32 to vector<25x25xf32>
    %56 = arith.mulf %55, %54 : vector<25x25xf32>
    %57 = arith.addf %56, %4 : vector<25x25xf32>
    %58 = vector.extract_strided_slice %33 {offsets = [3, 0, 0], sizes = [1, 25, 25], strides = [1, 1, 1]} : vector<9x25x25xf32> to vector<1x25x25xf32>
    %59 = vector.shape_cast %58 : vector<1x25x25xf32> to vector<25x25xf32>
    %cst_21 = arith.constant 1.000000e+00 : f32
    %60 = vector.broadcast %cst_21 : f32 to vector<25x25xf32>
    %61 = arith.mulf %60, %59 : vector<25x25xf32>
    %62 = arith.addf %61, %4 : vector<25x25xf32>
    %63 = vector.extract_strided_slice %33 {offsets = [4, 0, 0], sizes = [1, 25, 25], strides = [1, 1, 1]} : vector<9x25x25xf32> to vector<1x25x25xf32>
    %64 = vector.shape_cast %63 : vector<1x25x25xf32> to vector<25x25xf32>
    %cst_22 = arith.constant 1.000000e+00 : f32
    %65 = vector.broadcast %cst_22 : f32 to vector<25x25xf32>
    %66 = arith.mulf %65, %64 : vector<25x25xf32>
    %67 = arith.addf %66, %4 : vector<25x25xf32>
    %68 = vector.extract_strided_slice %33 {offsets = [5, 0, 0], sizes = [1, 25, 25], strides = [1, 1, 1]} : vector<9x25x25xf32> to vector<1x25x25xf32>
    %69 = vector.shape_cast %68 : vector<1x25x25xf32> to vector<25x25xf32>
    %cst_23 = arith.constant 1.000000e+00 : f32
    %70 = vector.broadcast %cst_23 : f32 to vector<25x25xf32>
    %71 = arith.mulf %70, %69 : vector<25x25xf32>
    %72 = arith.addf %71, %4 : vector<25x25xf32>
    %73 = vector.extract_strided_slice %33 {offsets = [6, 0, 0], sizes = [1, 25, 25], strides = [1, 1, 1]} : vector<9x25x25xf32> to vector<1x25x25xf32>
    %74 = vector.shape_cast %73 : vector<1x25x25xf32> to vector<25x25xf32>
    %cst_24 = arith.constant 1.000000e+00 : f32
    %75 = vector.broadcast %cst_24 : f32 to vector<25x25xf32>
    %76 = arith.mulf %75, %74 : vector<25x25xf32>
    %77 = arith.addf %76, %4 : vector<25x25xf32>
    %78 = vector.extract_strided_slice %33 {offsets = [7, 0, 0], sizes = [1, 25, 25], strides = [1, 1, 1]} : vector<9x25x25xf32> to vector<1x25x25xf32>
    %79 = vector.shape_cast %78 : vector<1x25x25xf32> to vector<25x25xf32>
    %cst_25 = arith.constant 1.000000e+00 : f32
    %80 = vector.broadcast %cst_25 : f32 to vector<25x25xf32>
    %81 = arith.mulf %80, %79 : vector<25x25xf32>
    %82 = arith.addf %81, %4 : vector<25x25xf32>
    %83 = vector.extract_strided_slice %33 {offsets = [8, 0, 0], sizes = [1, 25, 25], strides = [1, 1, 1]} : vector<9x25x25xf32> to vector<1x25x25xf32>
    %84 = vector.shape_cast %83 : vector<1x25x25xf32> to vector<25x25xf32>
    %cst_26 = arith.constant 1.000000e+00 : f32
    %85 = vector.broadcast %cst_26 : f32 to vector<25x25xf32>
    %86 = arith.mulf %85, %84 : vector<25x25xf32>
    %87 = arith.addf %86, %4 : vector<25x25xf32>
    %cst_27 = arith.constant 0.000000e+00 : f32
    %88 = vector.broadcast %cst_27 : f32 to vector<1x1xf32>
    %cst_28 = arith.constant 0.000000e+00 : f32
    %89 = vector.broadcast %cst_28 : f32 to vector<9x25xf32>
    %90 = vector.extract_strided_slice %3 {offsets = [0, 0, 0], sizes = [1, 9, 25], strides = [1, 1, 1]} : vector<3x17x25xf32> to vector<1x9x25xf32>
    %91 = vector.shape_cast %90 : vector<1x9x25xf32> to vector<9x25xf32>
    %cst_29 = arith.constant dense<0.000000e+00> : vector<9x25xf32>
    %92 = tpu.matmul %91, %47, %cst_29 {dimension_numbers = #tpu.dot_dimension_numbers<[1], [0], [0], [1], [0, 0, 1, 1], [], []>} : vector<9x25xf32>, vector<25x25xf32>, vector<9x25xf32> -> vector<9x25xf32>
    %93 = arith.addf %89, %92 : vector<9x25xf32>
    %94 = vector.extract_strided_slice %3 {offsets = [0, 1, 0], sizes = [1, 9, 25], strides = [1, 1, 1]} : vector<3x17x25xf32> to vector<1x9x25xf32>
    %95 = vector.shape_cast %94 : vector<1x9x25xf32> to vector<9x25xf32>
    %cst_30 = arith.constant dense<0.000000e+00> : vector<9x25xf32>
    %96 = tpu.matmul %95, %52, %cst_30 {dimension_numbers = #tpu.dot_dimension_numbers<[1], [0], [0], [1], [0, 0, 1, 1], [], []>} : vector<9x25xf32>, vector<25x25xf32>, vector<9x25xf32> -> vector<9x25xf32>
    %97 = arith.addf %93, %96 : vector<9x25xf32>
    %98 = vector.extract_strided_slice %3 {offsets = [0, 2, 0], sizes = [1, 9, 25], strides = [1, 1, 1]} : vector<3x17x25xf32> to vector<1x9x25xf32>
    %99 = vector.shape_cast %98 : vector<1x9x25xf32> to vector<9x25xf32>
    %cst_31 = arith.constant dense<0.000000e+00> : vector<9x25xf32>
    %100 = tpu.matmul %99, %57, %cst_31 {dimension_numbers = #tpu.dot_dimension_numbers<[1], [0], [0], [1], [0, 0, 1, 1], [], []>} : vector<9x25xf32>, vector<25x25xf32>, vector<9x25xf32> -> vector<9x25xf32>
    %101 = arith.addf %97, %100 : vector<9x25xf32>
    %102 = vector.extract_strided_slice %3 {offsets = [0, 3, 0], sizes = [1, 9, 25], strides = [1, 1, 1]} : vector<3x17x25xf32> to vector<1x9x25xf32>
    %103 = vector.shape_cast %102 : vector<1x9x25xf32> to vector<9x25xf32>
    %cst_32 = arith.constant dense<0.000000e+00> : vector<9x25xf32>
    %104 = tpu.matmul %103, %62, %cst_32 {dimension_numbers = #tpu.dot_dimension_numbers<[1], [0], [0], [1], [0, 0, 1, 1], [], []>} : vector<9x25xf32>, vector<25x25xf32>, vector<9x25xf32> -> vector<9x25xf32>
    %105 = arith.addf %101, %104 : vector<9x25xf32>
    %106 = vector.extract_strided_slice %3 {offsets = [0, 4, 0], sizes = [1, 9, 25], strides = [1, 1, 1]} : vector<3x17x25xf32> to vector<1x9x25xf32>
    %107 = vector.shape_cast %106 : vector<1x9x25xf32> to vector<9x25xf32>
    %cst_33 = arith.constant dense<0.000000e+00> : vector<9x25xf32>
    %108 = tpu.matmul %107, %67, %cst_33 {dimension_numbers = #tpu.dot_dimension_numbers<[1], [0], [0], [1], [0, 0, 1, 1], [], []>} : vector<9x25xf32>, vector<25x25xf32>, vector<9x25xf32> -> vector<9x25xf32>
    %109 = arith.addf %105, %108 : vector<9x25xf32>
    %110 = vector.extract_strided_slice %3 {offsets = [0, 5, 0], sizes = [1, 9, 25], strides = [1, 1, 1]} : vector<3x17x25xf32> to vector<1x9x25xf32>
    %111 = vector.shape_cast %110 : vector<1x9x25xf32> to vector<9x25xf32>
    %cst_34 = arith.constant dense<0.000000e+00> : vector<9x25xf32>
    %112 = tpu.matmul %111, %72, %cst_34 {dimension_numbers = #tpu.dot_dimension_numbers<[1], [0], [0], [1], [0, 0, 1, 1], [], []>} : vector<9x25xf32>, vector<25x25xf32>, vector<9x25xf32> -> vector<9x25xf32>
    %113 = arith.addf %109, %112 : vector<9x25xf32>
    %114 = vector.extract_strided_slice %3 {offsets = [0, 6, 0], sizes = [1, 9, 25], strides = [1, 1, 1]} : vector<3x17x25xf32> to vector<1x9x25xf32>
    %115 = vector.shape_cast %114 : vector<1x9x25xf32> to vector<9x25xf32>
    %cst_35 = arith.constant dense<0.000000e+00> : vector<9x25xf32>
    %116 = tpu.matmul %115, %77, %cst_35 {dimension_numbers = #tpu.dot_dimension_numbers<[1], [0], [0], [1], [0, 0, 1, 1], [], []>} : vector<9x25xf32>, vector<25x25xf32>, vector<9x25xf32> -> vector<9x25xf32>
    %117 = arith.addf %113, %116 : vector<9x25xf32>
    %118 = vector.extract_strided_slice %3 {offsets = [0, 7, 0], sizes = [1, 9, 25], strides = [1, 1, 1]} : vector<3x17x25xf32> to vector<1x9x25xf32>
    %119 = vector.shape_cast %118 : vector<1x9x25xf32> to vector<9x25xf32>
    %cst_36 = arith.constant dense<0.000000e+00> : vector<9x25xf32>
    %120 = tpu.matmul %119, %82, %cst_36 {dimension_numbers = #tpu.dot_dimension_numbers<[1], [0], [0], [1], [0, 0, 1, 1], [], []>} : vector<9x25xf32>, vector<25x25xf32>, vector<9x25xf32> -> vector<9x25xf32>
    %121 = arith.addf %117, %120 : vector<9x25xf32>
    %122 = vector.extract_strided_slice %3 {offsets = [0, 8, 0], sizes = [1, 9, 25], strides = [1, 1, 1]} : vector<3x17x25xf32> to vector<1x9x25xf32>
    %123 = vector.shape_cast %122 : vector<1x9x25xf32> to vector<9x25xf32>
    %cst_37 = arith.constant dense<0.000000e+00> : vector<9x25xf32>
    %124 = tpu.matmul %123, %87, %cst_37 {dimension_numbers = #tpu.dot_dimension_numbers<[1], [0], [0], [1], [0, 0, 1, 1], [], []>} : vector<9x25xf32>, vector<25x25xf32>, vector<9x25xf32> -> vector<9x25xf32>
    %125 = arith.addf %121, %124 : vector<9x25xf32>
    %126 = arith.subf %125, %123 : vector<9x25xf32>
    %127 = arith.mulf %126, %126 : vector<9x25xf32>
    %cst_38 = arith.constant dense<0.000000e+00> : vector<9xf32>
    %128 = vector.multi_reduction <add>, %127, %cst_38 [1] : vector<9x25xf32> to vector<9xf32>
    %129 = vector.shape_cast %128 : vector<9xf32> to vector<9x1xf32>
    %cst_39 = arith.constant dense<0.000000e+00> : vector<1xf32>
    %130 = vector.multi_reduction <add>, %129, %cst_39 [0] : vector<9x1xf32> to vector<1xf32>
    %131 = vector.shape_cast %130 : vector<1xf32> to vector<1x1xf32>
    %132 = arith.addf %88, %131 : vector<1x1xf32>
    %cst_40 = arith.constant 0.000000e+00 : f32
    %133 = vector.broadcast %cst_40 : f32 to vector<9x25xf32>
    %134 = vector.extract_strided_slice %3 {offsets = [1, 0, 0], sizes = [1, 9, 25], strides = [1, 1, 1]} : vector<3x17x25xf32> to vector<1x9x25xf32>
    %135 = vector.shape_cast %134 : vector<1x9x25xf32> to vector<9x25xf32>
    %cst_41 = arith.constant dense<0.000000e+00> : vector<9x25xf32>
    %136 = tpu.matmul %135, %47, %cst_41 {dimension_numbers = #tpu.dot_dimension_numbers<[1], [0], [0], [1], [0, 0, 1, 1], [], []>} : vector<9x25xf32>, vector<25x25xf32>, vector<9x25xf32> -> vector<9x25xf32>
    %137 = arith.addf %133, %136 : vector<9x25xf32>
    %138 = vector.extract_strided_slice %3 {offsets = [1, 1, 0], sizes = [1, 9, 25], strides = [1, 1, 1]} : vector<3x17x25xf32> to vector<1x9x25xf32>
    %139 = vector.shape_cast %138 : vector<1x9x25xf32> to vector<9x25xf32>
    %cst_42 = arith.constant dense<0.000000e+00> : vector<9x25xf32>
    %140 = tpu.matmul %139, %52, %cst_42 {dimension_numbers = #tpu.dot_dimension_numbers<[1], [0], [0], [1], [0, 0, 1, 1], [], []>} : vector<9x25xf32>, vector<25x25xf32>, vector<9x25xf32> -> vector<9x25xf32>
    %141 = arith.addf %137, %140 : vector<9x25xf32>
    %142 = vector.extract_strided_slice %3 {offsets = [1, 2, 0], sizes = [1, 9, 25], strides = [1, 1, 1]} : vector<3x17x25xf32> to vector<1x9x25xf32>
    %143 = vector.shape_cast %142 : vector<1x9x25xf32> to vector<9x25xf32>
    %cst_43 = arith.constant dense<0.000000e+00> : vector<9x25xf32>
    %144 = tpu.matmul %143, %57, %cst_43 {dimension_numbers = #tpu.dot_dimension_numbers<[1], [0], [0], [1], [0, 0, 1, 1], [], []>} : vector<9x25xf32>, vector<25x25xf32>, vector<9x25xf32> -> vector<9x25xf32>
    %145 = arith.addf %141, %144 : vector<9x25xf32>
    %146 = vector.extract_strided_slice %3 {offsets = [1, 3, 0], sizes = [1, 9, 25], strides = [1, 1, 1]} : vector<3x17x25xf32> to vector<1x9x25xf32>
    %147 = vector.shape_cast %146 : vector<1x9x25xf32> to vector<9x25xf32>
    %cst_44 = arith.constant dense<0.000000e+00> : vector<9x25xf32>
    %148 = tpu.matmul %147, %62, %cst_44 {dimension_numbers = #tpu.dot_dimension_numbers<[1], [0], [0], [1], [0, 0, 1, 1], [], []>} : vector<9x25xf32>, vector<25x25xf32>, vector<9x25xf32> -> vector<9x25xf32>
    %149 = arith.addf %145, %148 : vector<9x25xf32>
    %150 = vector.extract_strided_slice %3 {offsets = [1, 4, 0], sizes = [1, 9, 25], strides = [1, 1, 1]} : vector<3x17x25xf32> to vector<1x9x25xf32>
    %151 = vector.shape_cast %150 : vector<1x9x25xf32> to vector<9x25xf32>
    %cst_45 = arith.constant dense<0.000000e+00> : vector<9x25xf32>
    %152 = tpu.matmul %151, %67, %cst_45 {dimension_numbers = #tpu.dot_dimension_numbers<[1], [0], [0], [1], [0, 0, 1, 1], [], []>} : vector<9x25xf32>, vector<25x25xf32>, vector<9x25xf32> -> vector<9x25xf32>
    %153 = arith.addf %149, %152 : vector<9x25xf32>
    %154 = vector.extract_strided_slice %3 {offsets = [1, 5, 0], sizes = [1, 9, 25], strides = [1, 1, 1]} : vector<3x17x25xf32> to vector<1x9x25xf32>
    %155 = vector.shape_cast %154 : vector<1x9x25xf32> to vector<9x25xf32>
    %cst_46 = arith.constant dense<0.000000e+00> : vector<9x25xf32>
    %156 = tpu.matmul %155, %72, %cst_46 {dimension_numbers = #tpu.dot_dimension_numbers<[1], [0], [0], [1], [0, 0, 1, 1], [], []>} : vector<9x25xf32>, vector<25x25xf32>, vector<9x25xf32> -> vector<9x25xf32>
    %157 = arith.addf %153, %156 : vector<9x25xf32>
    %158 = vector.extract_strided_slice %3 {offsets = [1, 6, 0], sizes = [1, 9, 25], strides = [1, 1, 1]} : vector<3x17x25xf32> to vector<1x9x25xf32>
    %159 = vector.shape_cast %158 : vector<1x9x25xf32> to vector<9x25xf32>
    %cst_47 = arith.constant dense<0.000000e+00> : vector<9x25xf32>
    %160 = tpu.matmul %159, %77, %cst_47 {dimension_numbers = #tpu.dot_dimension_numbers<[1], [0], [0], [1], [0, 0, 1, 1], [], []>} : vector<9x25xf32>, vector<25x25xf32>, vector<9x25xf32> -> vector<9x25xf32>
    %161 = arith.addf %157, %160 : vector<9x25xf32>
    %162 = vector.extract_strided_slice %3 {offsets = [1, 7, 0], sizes = [1, 9, 25], strides = [1, 1, 1]} : vector<3x17x25xf32> to vector<1x9x25xf32>
    %163 = vector.shape_cast %162 : vector<1x9x25xf32> to vector<9x25xf32>
    %cst_48 = arith.constant dense<0.000000e+00> : vector<9x25xf32>
    %164 = tpu.matmul %163, %82, %cst_48 {dimension_numbers = #tpu.dot_dimension_numbers<[1], [0], [0], [1], [0, 0, 1, 1], [], []>} : vector<9x25xf32>, vector<25x25xf32>, vector<9x25xf32> -> vector<9x25xf32>
    %165 = arith.addf %161, %164 : vector<9x25xf32>
    %166 = vector.extract_strided_slice %3 {offsets = [1, 8, 0], sizes = [1, 9, 25], strides = [1, 1, 1]} : vector<3x17x25xf32> to vector<1x9x25xf32>
    %167 = vector.shape_cast %166 : vector<1x9x25xf32> to vector<9x25xf32>
    %cst_49 = arith.constant dense<0.000000e+00> : vector<9x25xf32>
    %168 = tpu.matmul %167, %87, %cst_49 {dimension_numbers = #tpu.dot_dimension_numbers<[1], [0], [0], [1], [0, 0, 1, 1], [], []>} : vector<9x25xf32>, vector<25x25xf32>, vector<9x25xf32> -> vector<9x25xf32>
    %169 = arith.addf %165, %168 : vector<9x25xf32>
    %170 = arith.subf %169, %167 : vector<9x25xf32>
    %171 = arith.mulf %170, %170 : vector<9x25xf32>
    %cst_50 = arith.constant dense<0.000000e+00> : vector<9xf32>
    %172 = vector.multi_reduction <add>, %171, %cst_50 [1] : vector<9x25xf32> to vector<9xf32>
    %173 = vector.shape_cast %172 : vector<9xf32> to vector<9x1xf32>
    %cst_51 = arith.constant dense<0.000000e+00> : vector<1xf32>
    %174 = vector.multi_reduction <add>, %173, %cst_51 [0] : vector<9x1xf32> to vector<1xf32>
    %175 = vector.shape_cast %174 : vector<1xf32> to vector<1x1xf32>
    %176 = arith.addf %132, %175 : vector<1x1xf32>
    %cst_52 = arith.constant 0.000000e+00 : f32
    %177 = vector.broadcast %cst_52 : f32 to vector<9x25xf32>
    %178 = vector.extract_strided_slice %3 {offsets = [2, 0, 0], sizes = [1, 9, 25], strides = [1, 1, 1]} : vector<3x17x25xf32> to vector<1x9x25xf32>
    %179 = vector.shape_cast %178 : vector<1x9x25xf32> to vector<9x25xf32>
    %cst_53 = arith.constant dense<0.000000e+00> : vector<9x25xf32>
    %180 = tpu.matmul %179, %47, %cst_53 {dimension_numbers = #tpu.dot_dimension_numbers<[1], [0], [0], [1], [0, 0, 1, 1], [], []>} : vector<9x25xf32>, vector<25x25xf32>, vector<9x25xf32> -> vector<9x25xf32>
    %181 = arith.addf %177, %180 : vector<9x25xf32>
    %182 = vector.extract_strided_slice %3 {offsets = [2, 1, 0], sizes = [1, 9, 25], strides = [1, 1, 1]} : vector<3x17x25xf32> to vector<1x9x25xf32>
    %183 = vector.shape_cast %182 : vector<1x9x25xf32> to vector<9x25xf32>
    %cst_54 = arith.constant dense<0.000000e+00> : vector<9x25xf32>
    %184 = tpu.matmul %183, %52, %cst_54 {dimension_numbers = #tpu.dot_dimension_numbers<[1], [0], [0], [1], [0, 0, 1, 1], [], []>} : vector<9x25xf32>, vector<25x25xf32>, vector<9x25xf32> -> vector<9x25xf32>
    %185 = arith.addf %181, %184 : vector<9x25xf32>
    %186 = vector.extract_strided_slice %3 {offsets = [2, 2, 0], sizes = [1, 9, 25], strides = [1, 1, 1]} : vector<3x17x25xf32> to vector<1x9x25xf32>
    %187 = vector.shape_cast %186 : vector<1x9x25xf32> to vector<9x25xf32>
    %cst_55 = arith.constant dense<0.000000e+00> : vector<9x25xf32>
    %188 = tpu.matmul %187, %57, %cst_55 {dimension_numbers = #tpu.dot_dimension_numbers<[1], [0], [0], [1], [0, 0, 1, 1], [], []>} : vector<9x25xf32>, vector<25x25xf32>, vector<9x25xf32> -> vector<9x25xf32>
    %189 = arith.addf %185, %188 : vector<9x25xf32>
    %190 = vector.extract_strided_slice %3 {offsets = [2, 3, 0], sizes = [1, 9, 25], strides = [1, 1, 1]} : vector<3x17x25xf32> to vector<1x9x25xf32>
    %191 = vector.shape_cast %190 : vector<1x9x25xf32> to vector<9x25xf32>
    %cst_56 = arith.constant dense<0.000000e+00> : vector<9x25xf32>
    %192 = tpu.matmul %191, %62, %cst_56 {dimension_numbers = #tpu.dot_dimension_numbers<[1], [0], [0], [1], [0, 0, 1, 1], [], []>} : vector<9x25xf32>, vector<25x25xf32>, vector<9x25xf32> -> vector<9x25xf32>
    %193 = arith.addf %189, %192 : vector<9x25xf32>
    %194 = vector.extract_strided_slice %3 {offsets = [2, 4, 0], sizes = [1, 9, 25], strides = [1, 1, 1]} : vector<3x17x25xf32> to vector<1x9x25xf32>
    %195 = vector.shape_cast %194 : vector<1x9x25xf32> to vector<9x25xf32>
    %cst_57 = arith.constant dense<0.000000e+00> : vector<9x25xf32>
    %196 = tpu.matmul %195, %67, %cst_57 {dimension_numbers = #tpu.dot_dimension_numbers<[1], [0], [0], [1], [0, 0, 1, 1], [], []>} : vector<9x25xf32>, vector<25x25xf32>, vector<9x25xf32> -> vector<9x25xf32>
    %197 = arith.addf %193, %196 : vector<9x25xf32>
    %198 = vector.extract_strided_slice %3 {offsets = [2, 5, 0], sizes = [1, 9, 25], strides = [1, 1, 1]} : vector<3x17x25xf32> to vector<1x9x25xf32>
    %199 = vector.shape_cast %198 : vector<1x9x25xf32> to vector<9x25xf32>
    %cst_58 = arith.constant dense<0.000000e+00> : vector<9x25xf32>
    %200 = tpu.matmul %199, %72, %cst_58 {dimension_numbers = #tpu.dot_dimension_numbers<[1], [0], [0], [1], [0, 0, 1, 1], [], []>} : vector<9x25xf32>, vector<25x25xf32>, vector<9x25xf32> -> vector<9x25xf32>
    %201 = arith.addf %197, %200 : vector<9x25xf32>
    %202 = vector.extract_strided_slice %3 {offsets = [2, 6, 0], sizes = [1, 9, 25], strides = [1, 1, 1]} : vector<3x17x25xf32> to vector<1x9x25xf32>
    %203 = vector.shape_cast %202 : vector<1x9x25xf32> to vector<9x25xf32>
    %cst_59 = arith.constant dense<0.000000e+00> : vector<9x25xf32>
    %204 = tpu.matmul %203, %77, %cst_59 {dimension_numbers = #tpu.dot_dimension_numbers<[1], [0], [0], [1], [0, 0, 1, 1], [], []>} : vector<9x25xf32>, vector<25x25xf32>, vector<9x25xf32> -> vector<9x25xf32>
    %205 = arith.addf %201, %204 : vector<9x25xf32>
    %206 = vector.extract_strided_slice %3 {offsets = [2, 7, 0], sizes = [1, 9, 25], strides = [1, 1, 1]} : vector<3x17x25xf32> to vector<1x9x25xf32>
    %207 = vector.shape_cast %206 : vector<1x9x25xf32> to vector<9x25xf32>
    %cst_60 = arith.constant dense<0.000000e+00> : vector<9x25xf32>
    %208 = tpu.matmul %207, %82, %cst_60 {dimension_numbers = #tpu.dot_dimension_numbers<[1], [0], [0], [1], [0, 0, 1, 1], [], []>} : vector<9x25xf32>, vector<25x25xf32>, vector<9x25xf32> -> vector<9x25xf32>
    %209 = arith.addf %205, %208 : vector<9x25xf32>
    %210 = vector.extract_strided_slice %3 {offsets = [2, 8, 0], sizes = [1, 9, 25], strides = [1, 1, 1]} : vector<3x17x25xf32> to vector<1x9x25xf32>
    %211 = vector.shape_cast %210 : vector<1x9x25xf32> to vector<9x25xf32>
    %cst_61 = arith.constant dense<0.000000e+00> : vector<9x25xf32>
    %212 = tpu.matmul %211, %87, %cst_61 {dimension_numbers = #tpu.dot_dimension_numbers<[1], [0], [0], [1], [0, 0, 1, 1], [], []>} : vector<9x25xf32>, vector<25x25xf32>, vector<9x25xf32> -> vector<9x25xf32>
    %213 = arith.addf %209, %212 : vector<9x25xf32>
    %214 = arith.subf %213, %211 : vector<9x25xf32>
    %215 = arith.mulf %214, %214 : vector<9x25xf32>
    %cst_62 = arith.constant dense<0.000000e+00> : vector<9xf32>
    %216 = vector.multi_reduction <add>, %215, %cst_62 [1] : vector<9x25xf32> to vector<9xf32>
    %217 = vector.shape_cast %216 : vector<9xf32> to vector<9x1xf32>
    %cst_63 = arith.constant dense<0.000000e+00> : vector<1xf32>
    %218 = vector.multi_reduction <add>, %217, %cst_63 [0] : vector<9x1xf32> to vector<1xf32>
    %219 = vector.shape_cast %218 : vector<1xf32> to vector<1x1xf32>
    %220 = arith.addf %176, %219 : vector<1x1xf32>
    %c0_64 = arith.constant 0 : index
    %c0_65 = arith.constant 0 : index
    %c0_66 = arith.constant 0 : index
    %221 = vector.load %arg9[%c0_64, %c0_65, %c0_66] : memref<1x1x1xf32, #tpu.memory_space<vmem>>, vector<1x1x1xf32>
    %222 = vector.shape_cast %221 : vector<1x1x1xf32> to vector<1x1xf32>
    %223 = vector.shape_cast %220 : vector<1x1xf32> to vector<1x1x1xf32>
    tpu.vector_store %arg9[%c0_64, %c0_65, %c0_66], %223 {strides = array<i32>} : memref<1x1x1xf32, #tpu.memory_space<vmem>>, vector<1x1x1xf32>,
    %c0_67 = arith.constant 0 : index
    %c0_68 = arith.constant 0 : index
    %224 = memref.load %arg5[%c0_67, %c0_68] : memref<8x3xf32, #tpu.memory_space<smem>>
    %225 = vector.broadcast %224 : f32 to vector<9x25xf32>
    %226 = arith.mulf %225, %125 : vector<9x25xf32>
    %c0_69 = arith.constant 0 : index
    %c1 = arith.constant 1 : index
    %227 = memref.load %arg5[%c0_69, %c1] : memref<8x3xf32, #tpu.memory_space<smem>>
    %228 = vector.broadcast %227 : f32 to vector<9x25xf32>
    %229 = arith.mulf %228, %169 : vector<9x25xf32>
    %230 = arith.addf %226, %229 : vector<9x25xf32>
    %c0_70 = arith.constant 0 : index
    %c2 = arith.constant 2 : index
    %231 = memref.load %arg5[%c0_70, %c2] : memref<8x3xf32, #tpu.memory_space<smem>>
    %232 = vector.broadcast %231 : f32 to vector<9x25xf32>
    %233 = arith.mulf %232, %213 : vector<9x25xf32>
    %234 = arith.addf %230, %233 : vector<9x25xf32>
    %c0_71 = arith.constant 0 : index
    %c0_72 = arith.constant 0 : index
    %235 = memref.load %arg6[%c0_71, %c0_72] : memref<1x8xf32, #tpu.memory_space<smem>>
    %236 = vector.broadcast %235 : f32 to vector<9x25xf32>
    %237 = arith.addf %234, %236 : vector<9x25xf32>
    %c0_73 = arith.constant 0 : index
    %c0_74 = arith.constant 0 : index
    %c0_75 = arith.constant 0 : index
    %c0_76 = arith.constant 0 : index
    %238 = vector.load %arg8[%c0_73, %c0_74, %c0_75, %c0_76] : memref<1x8x9x25xf32, #tpu.memory_space<vmem>>, vector<1x1x9x25xf32>
    %239 = vector.shape_cast %238 : vector<1x1x9x25xf32> to vector<9x25xf32>
    %240 = vector.shape_cast %237 : vector<9x25xf32> to vector<1x1x9x25xf32>
    tpu.vector_store %arg8[%c0_73, %c0_74, %c0_75, %c0_76], %240 {strides = array<i32>} : memref<1x8x9x25xf32, #tpu.memory_space<vmem>>, vector<1x1x9x25xf32>,
    %c1_77 = arith.constant 1 : index
    %c0_78 = arith.constant 0 : index
    %241 = memref.load %arg5[%c1_77, %c0_78] : memref<8x3xf32, #tpu.memory_space<smem>>
    %242 = vector.broadcast %241 : f32 to vector<9x25xf32>
    %243 = arith.mulf %242, %125 : vector<9x25xf32>
    %c1_79 = arith.constant 1 : index
    %c1_80 = arith.constant 1 : index
    %244 = memref.load %arg5[%c1_79, %c1_80] : memref<8x3xf32, #tpu.memory_space<smem>>
    %245 = vector.broadcast %244 : f32 to vector<9x25xf32>
    %246 = arith.mulf %245, %169 : vector<9x25xf32>
    %247 = arith.addf %243, %246 : vector<9x25xf32>
    %c1_81 = arith.constant 1 : index
    %c2_82 = arith.constant 2 : index
    %248 = memref.load %arg5[%c1_81, %c2_82] : memref<8x3xf32, #tpu.memory_space<smem>>
    %249 = vector.broadcast %248 : f32 to vector<9x25xf32>
    %250 = arith.mulf %249, %213 : vector<9x25xf32>
    %251 = arith.addf %247, %250 : vector<9x25xf32>
    %c0_83 = arith.constant 0 : index
    %c1_84 = arith.constant 1 : index
    %252 = memref.load %arg6[%c0_83, %c1_84] : memref<1x8xf32, #tpu.memory_space<smem>>
    %253 = vector.broadcast %252 : f32 to vector<9x25xf32>
    %254 = arith.addf %251, %253 : vector<9x25xf32>
    %c0_85 = arith.constant 0 : index
    %c1_86 = arith.constant 1 : index
    %c0_87 = arith.constant 0 : index
    %c0_88 = arith.constant 0 : index
    %255 = vector.load %arg8[%c0_85, %c1_86, %c0_87, %c0_88] : memref<1x8x9x25xf32, #tpu.memory_space<vmem>>, vector<1x1x9x25xf32>
    %256 = vector.shape_cast %255 : vector<1x1x9x25xf32> to vector<9x25xf32>
    %257 = vector.shape_cast %254 : vector<9x25xf32> to vector<1x1x9x25xf32>
    tpu.vector_store %arg8[%c0_85, %c1_86, %c0_87, %c0_88], %257 {strides = array<i32>} : memref<1x8x9x25xf32, #tpu.memory_space<vmem>>, vector<1x1x9x25xf32>,
    %c2_89 = arith.constant 2 : index
    %c0_90 = arith.constant 0 : index
    %258 = memref.load %arg5[%c2_89, %c0_90] : memref<8x3xf32, #tpu.memory_space<smem>>
    %259 = vector.broadcast %258 : f32 to vector<9x25xf32>
    %260 = arith.mulf %259, %125 : vector<9x25xf32>
    %c2_91 = arith.constant 2 : index
    %c1_92 = arith.constant 1 : index
    %261 = memref.load %arg5[%c2_91, %c1_92] : memref<8x3xf32, #tpu.memory_space<smem>>
    %262 = vector.broadcast %261 : f32 to vector<9x25xf32>
    %263 = arith.mulf %262, %169 : vector<9x25xf32>
    %264 = arith.addf %260, %263 : vector<9x25xf32>
    %c2_93 = arith.constant 2 : index
    %c2_94 = arith.constant 2 : index
    %265 = memref.load %arg5[%c2_93, %c2_94] : memref<8x3xf32, #tpu.memory_space<smem>>
    %266 = vector.broadcast %265 : f32 to vector<9x25xf32>
    %267 = arith.mulf %266, %213 : vector<9x25xf32>
    %268 = arith.addf %264, %267 : vector<9x25xf32>
    %c0_95 = arith.constant 0 : index
    %c2_96 = arith.constant 2 : index
    %269 = memref.load %arg6[%c0_95, %c2_96] : memref<1x8xf32, #tpu.memory_space<smem>>
    %270 = vector.broadcast %269 : f32 to vector<9x25xf32>
    %271 = arith.addf %268, %270 : vector<9x25xf32>
    %c0_97 = arith.constant 0 : index
    %c2_98 = arith.constant 2 : index
    %c0_99 = arith.constant 0 : index
    %c0_100 = arith.constant 0 : index
    %272 = vector.load %arg8[%c0_97, %c2_98, %c0_99, %c0_100] : memref<1x8x9x25xf32, #tpu.memory_space<vmem>>, vector<1x1x9x25xf32>
    %273 = vector.shape_cast %272 : vector<1x1x9x25xf32> to vector<9x25xf32>
    %274 = vector.shape_cast %271 : vector<9x25xf32> to vector<1x1x9x25xf32>
    tpu.vector_store %arg8[%c0_97, %c2_98, %c0_99, %c0_100], %274 {strides = array<i32>} : memref<1x8x9x25xf32, #tpu.memory_space<vmem>>, vector<1x1x9x25xf32>,
    %c3 = arith.constant 3 : index
    %c0_101 = arith.constant 0 : index
    %275 = memref.load %arg5[%c3, %c0_101] : memref<8x3xf32, #tpu.memory_space<smem>>
    %276 = vector.broadcast %275 : f32 to vector<9x25xf32>
    %277 = arith.mulf %276, %125 : vector<9x25xf32>
    %c3_102 = arith.constant 3 : index
    %c1_103 = arith.constant 1 : index
    %278 = memref.load %arg5[%c3_102, %c1_103] : memref<8x3xf32, #tpu.memory_space<smem>>
    %279 = vector.broadcast %278 : f32 to vector<9x25xf32>
    %280 = arith.mulf %279, %169 : vector<9x25xf32>
    %281 = arith.addf %277, %280 : vector<9x25xf32>
    %c3_104 = arith.constant 3 : index
    %c2_105 = arith.constant 2 : index
    %282 = memref.load %arg5[%c3_104, %c2_105] : memref<8x3xf32, #tpu.memory_space<smem>>
    %283 = vector.broadcast %282 : f32 to vector<9x25xf32>
    %284 = arith.mulf %283, %213 : vector<9x25xf32>
    %285 = arith.addf %281, %284 : vector<9x25xf32>
    %c0_106 = arith.constant 0 : index
    %c3_107 = arith.constant 3 : index
    %286 = memref.load %arg6[%c0_106, %c3_107] : memref<1x8xf32, #tpu.memory_space<smem>>
    %287 = vector.broadcast %286 : f32 to vector<9x25xf32>
    %288 = arith.addf %285, %287 : vector<9x25xf32>
    %c0_108 = arith.constant 0 : index
    %c3_109 = arith.constant 3 : index
    %c0_110 = arith.constant 0 : index
    %c0_111 = arith.constant 0 : index
    %289 = vector.load %arg8[%c0_108, %c3_109, %c0_110, %c0_111] : memref<1x8x9x25xf32, #tpu.memory_space<vmem>>, vector<1x1x9x25xf32>
    %290 = vector.shape_cast %289 : vector<1x1x9x25xf32> to vector<9x25xf32>
    %291 = vector.shape_cast %288 : vector<9x25xf32> to vector<1x1x9x25xf32>
    tpu.vector_store %arg8[%c0_108, %c3_109, %c0_110, %c0_111], %291 {strides = array<i32>} : memref<1x8x9x25xf32, #tpu.memory_space<vmem>>, vector<1x1x9x25xf32>,
    %c4 = arith.constant 4 : index
    %c0_112 = arith.constant 0 : index
    %292 = memref.load %arg5[%c4, %c0_112] : memref<8x3xf32, #tpu.memory_space<smem>>
    %293 = vector.broadcast %292 : f32 to vector<9x25xf32>
    %294 = arith.mulf %293, %125 : vector<9x25xf32>
    %c4_113 = arith.constant 4 : index
    %c1_114 = arith.constant 1 : index
    %295 = memref.load %arg5[%c4_113, %c1_114] : memref<8x3xf32, #tpu.memory_space<smem>>
    %296 = vector.broadcast %295 : f32 to vector<9x25xf32>
    %297 = arith.mulf %296, %169 : vector<9x25xf32>
    %298 = arith.addf %294, %297 : vector<9x25xf32>
    %c4_115 = arith.constant 4 : index
    %c2_116 = arith.constant 2 : index
    %299 = memref.load %arg5[%c4_115, %c2_116] : memref<8x3xf32, #tpu.memory_space<smem>>
    %300 = vector.broadcast %299 : f32 to vector<9x25xf32>
    %301 = arith.mulf %300, %213 : vector<9x25xf32>
    %302 = arith.addf %298, %301 : vector<9x25xf32>
    %c0_117 = arith.constant 0 : index
    %c4_118 = arith.constant 4 : index
    %303 = memref.load %arg6[%c0_117, %c4_118] : memref<1x8xf32, #tpu.memory_space<smem>>
    %304 = vector.broadcast %303 : f32 to vector<9x25xf32>
    %305 = arith.addf %302, %304 : vector<9x25xf32>
    %c0_119 = arith.constant 0 : index
    %c4_120 = arith.constant 4 : index
    %c0_121 = arith.constant 0 : index
    %c0_122 = arith.constant 0 : index
    %306 = vector.load %arg8[%c0_119, %c4_120, %c0_121, %c0_122] : memref<1x8x9x25xf32, #tpu.memory_space<vmem>>, vector<1x1x9x25xf32>
    %307 = vector.shape_cast %306 : vector<1x1x9x25xf32> to vector<9x25xf32>
    %308 = vector.shape_cast %305 : vector<9x25xf32> to vector<1x1x9x25xf32>
    tpu.vector_store %arg8[%c0_119, %c4_120, %c0_121, %c0_122], %308 {strides = array<i32>} : memref<1x8x9x25xf32, #tpu.memory_space<vmem>>, vector<1x1x9x25xf32>,
    %c5 = arith.constant 5 : index
    %c0_123 = arith.constant 0 : index
    %309 = memref.load %arg5[%c5, %c0_123] : memref<8x3xf32, #tpu.memory_space<smem>>
    %310 = vector.broadcast %309 : f32 to vector<9x25xf32>
    %311 = arith.mulf %310, %125 : vector<9x25xf32>
    %c5_124 = arith.constant 5 : index
    %c1_125 = arith.constant 1 : index
    %312 = memref.load %arg5[%c5_124, %c1_125] : memref<8x3xf32, #tpu.memory_space<smem>>
    %313 = vector.broadcast %312 : f32 to vector<9x25xf32>
    %314 = arith.mulf %313, %169 : vector<9x25xf32>
    %315 = arith.addf %311, %314 : vector<9x25xf32>
    %c5_126 = arith.constant 5 : index
    %c2_127 = arith.constant 2 : index
    %316 = memref.load %arg5[%c5_126, %c2_127] : memref<8x3xf32, #tpu.memory_space<smem>>
    %317 = vector.broadcast %316 : f32 to vector<9x25xf32>
    %318 = arith.mulf %317, %213 : vector<9x25xf32>
    %319 = arith.addf %315, %318 : vector<9x25xf32>
    %c0_128 = arith.constant 0 : index
    %c5_129 = arith.constant 5 : index
    %320 = memref.load %arg6[%c0_128, %c5_129] : memref<1x8xf32, #tpu.memory_space<smem>>
    %321 = vector.broadcast %320 : f32 to vector<9x25xf32>
    %322 = arith.addf %319, %321 : vector<9x25xf32>
    %c0_130 = arith.constant 0 : index
    %c5_131 = arith.constant 5 : index
    %c0_132 = arith.constant 0 : index
    %c0_133 = arith.constant 0 : index
    %323 = vector.load %arg8[%c0_130, %c5_131, %c0_132, %c0_133] : memref<1x8x9x25xf32, #tpu.memory_space<vmem>>, vector<1x1x9x25xf32>
    %324 = vector.shape_cast %323 : vector<1x1x9x25xf32> to vector<9x25xf32>
    %325 = vector.shape_cast %322 : vector<9x25xf32> to vector<1x1x9x25xf32>
    tpu.vector_store %arg8[%c0_130, %c5_131, %c0_132, %c0_133], %325 {strides = array<i32>} : memref<1x8x9x25xf32, #tpu.memory_space<vmem>>, vector<1x1x9x25xf32>,
    %c6 = arith.constant 6 : index
    %c0_134 = arith.constant 0 : index
    %326 = memref.load %arg5[%c6, %c0_134] : memref<8x3xf32, #tpu.memory_space<smem>>
    %327 = vector.broadcast %326 : f32 to vector<9x25xf32>
    %328 = arith.mulf %327, %125 : vector<9x25xf32>
    %c6_135 = arith.constant 6 : index
    %c1_136 = arith.constant 1 : index
    %329 = memref.load %arg5[%c6_135, %c1_136] : memref<8x3xf32, #tpu.memory_space<smem>>
    %330 = vector.broadcast %329 : f32 to vector<9x25xf32>
    %331 = arith.mulf %330, %169 : vector<9x25xf32>
    %332 = arith.addf %328, %331 : vector<9x25xf32>
    %c6_137 = arith.constant 6 : index
    %c2_138 = arith.constant 2 : index
    %333 = memref.load %arg5[%c6_137, %c2_138] : memref<8x3xf32, #tpu.memory_space<smem>>
    %334 = vector.broadcast %333 : f32 to vector<9x25xf32>
    %335 = arith.mulf %334, %213 : vector<9x25xf32>
    %336 = arith.addf %332, %335 : vector<9x25xf32>
    %c0_139 = arith.constant 0 : index
    %c6_140 = arith.constant 6 : index
    %337 = memref.load %arg6[%c0_139, %c6_140] : memref<1x8xf32, #tpu.memory_space<smem>>
    %338 = vector.broadcast %337 : f32 to vector<9x25xf32>
    %339 = arith.addf %336, %338 : vector<9x25xf32>
    %c0_141 = arith.constant 0 : index
    %c6_142 = arith.constant 6 : index
    %c0_143 = arith.constant 0 : index
    %c0_144 = arith.constant 0 : index
    %340 = vector.load %arg8[%c0_141, %c6_142, %c0_143, %c0_144] : memref<1x8x9x25xf32, #tpu.memory_space<vmem>>, vector<1x1x9x25xf32>
    %341 = vector.shape_cast %340 : vector<1x1x9x25xf32> to vector<9x25xf32>
    %342 = vector.shape_cast %339 : vector<9x25xf32> to vector<1x1x9x25xf32>
    tpu.vector_store %arg8[%c0_141, %c6_142, %c0_143, %c0_144], %342 {strides = array<i32>} : memref<1x8x9x25xf32, #tpu.memory_space<vmem>>, vector<1x1x9x25xf32>,
    %c7 = arith.constant 7 : index
    %c0_145 = arith.constant 0 : index
    %343 = memref.load %arg5[%c7, %c0_145] : memref<8x3xf32, #tpu.memory_space<smem>>
    %344 = vector.broadcast %343 : f32 to vector<9x25xf32>
    %345 = arith.mulf %344, %125 : vector<9x25xf32>
    %c7_146 = arith.constant 7 : index
    %c1_147 = arith.constant 1 : index
    %346 = memref.load %arg5[%c7_146, %c1_147] : memref<8x3xf32, #tpu.memory_space<smem>>
    %347 = vector.broadcast %346 : f32 to vector<9x25xf32>
    %348 = arith.mulf %347, %169 : vector<9x25xf32>
    %349 = arith.addf %345, %348 : vector<9x25xf32>
    %c7_148 = arith.constant 7 : index
    %c2_149 = arith.constant 2 : index
    %350 = memref.load %arg5[%c7_148, %c2_149] : memref<8x3xf32, #tpu.memory_space<smem>>
    %351 = vector.broadcast %350 : f32 to vector<9x25xf32>
    %352 = arith.mulf %351, %213 : vector<9x25xf32>
    %353 = arith.addf %349, %352 : vector<9x25xf32>
    %c0_150 = arith.constant 0 : index
    %c7_151 = arith.constant 7 : index
    %354 = memref.load %arg6[%c0_150, %c7_151] : memref<1x8xf32, #tpu.memory_space<smem>>
    %355 = vector.broadcast %354 : f32 to vector<9x25xf32>
    %356 = arith.addf %353, %355 : vector<9x25xf32>
    %c0_152 = arith.constant 0 : index
    %c7_153 = arith.constant 7 : index
    %c0_154 = arith.constant 0 : index
    %c0_155 = arith.constant 0 : index
    %357 = vector.load %arg8[%c0_152, %c7_153, %c0_154, %c0_155] : memref<1x8x9x25xf32, #tpu.memory_space<vmem>>, vector<1x1x9x25xf32>
    %358 = vector.shape_cast %357 : vector<1x1x9x25xf32> to vector<9x25xf32>
    %359 = vector.shape_cast %356 : vector<9x25xf32> to vector<1x1x9x25xf32>
    tpu.vector_store %arg8[%c0_152, %c7_153, %c0_154, %c0_155], %359 {strides = array<i32>} : memref<1x8x9x25xf32, #tpu.memory_space<vmem>>, vector<1x1x9x25xf32>,
    return
  }
  func.func @transform_0(%arg0: i32) -> (i32, i32, i32) {
    %c0_i32 = arith.constant 0 : i32
    %c0_i32_0 = arith.constant 0 : i32
    %c0_i32_1 = arith.constant 0 : i32
    return %arg0, %c0_i32, %c0_i32_0 : i32, i32, i32
  }
  func.func @transform_1(%arg0: i32) -> (i32, i32, i32, i32) {
    %c0_i32 = arith.constant 0 : i32
    %c0_i32_0 = arith.constant 0 : i32
    %c0_i32_1 = arith.constant 0 : i32
    %c0_i32_2 = arith.constant 0 : i32
    return %arg0, %c0_i32, %c0_i32_0, %c0_i32_1 : i32, i32, i32, i32
  }
  func.func @transform_2(%arg0: i32) -> (i32, i32) {
    %c0_i32 = arith.constant 0 : i32
    %c0_i32_0 = arith.constant 0 : i32
    %c0_i32_1 = arith.constant 0 : i32
    return %c0_i32, %c0_i32_0 : i32, i32
  }
  func.func @transform_3(%arg0: i32) -> (i32, i32) {
    %c0_i32 = arith.constant 0 : i32
    %c0_i32_0 = arith.constant 0 : i32
    %c0_i32_1 = arith.constant 0 : i32
    return %c0_i32, %c0_i32_0 : i32, i32
  }
  func.func @transform_4(%arg0: i32) -> (i32, i32) {
    %c0_i32 = arith.constant 0 : i32
    %c0_i32_0 = arith.constant 0 : i32
    %c0_i32_1 = arith.constant 0 : i32
    return %c0_i32, %c0_i32_0 : i32, i32
  }
  func.func @transform_5(%arg0: i32) -> (i32, i32) {
    %c0_i32 = arith.constant 0 : i32
    %c0_i32_0 = arith.constant 0 : i32
    %c0_i32_1 = arith.constant 0 : i32
    return %c0_i32, %c0_i32_0 : i32, i32
  }
  func.func @transform_6(%arg0: i32) -> (i32, i32) {
    %c0_i32 = arith.constant 0 : i32
    %c0_i32_0 = arith.constant 0 : i32
    %c0_i32_1 = arith.constant 0 : i32
    return %c0_i32, %c0_i32_0 : i32, i32
  }
  func.func @transform_7(%arg0: i32) -> (i32, i32, i32, i32) {
    %c0_i32 = arith.constant 0 : i32
    %c0_i32_0 = arith.constant 0 : i32
    %c0_i32_1 = arith.constant 0 : i32
    %c0_i32_2 = arith.constant 0 : i32
    return %arg0, %c0_i32, %c0_i32_0, %c0_i32_1 : i32, i32, i32, i32
  }
  func.func @transform_8(%arg0: i32) -> (i32, i32, i32) {
    %c0_i32 = arith.constant 0 : i32
    %c0_i32_0 = arith.constant 0 : i32
    %c0_i32_1 = arith.constant 0 : i32
    return %arg0, %c0_i32, %c0_i32_0 : i32, i32, i32
  }
  func.func @transform_9(%arg0: i32) -> (i32, i32, i32) {
    %c0_i32 = arith.constant 0 : i32
    %c0_i32_0 = arith.constant 0 : i32
    %c0_i32_1 = arith.constant 0 : i32
    return %arg0, %c0_i32, %c0_i32_0 : i32, i32, i32
  }
}

</mosaic_0001>

<bundles_post_ra>
// kernel: gcgc_t_forward.1
= control target key start
LH: loop header
LB: loop body
LE: loop exit
PB: predicated region body
PF: predicated region fallthrough
CT: control target
= control target key end

     0   :  { %s6783_s0 = inlined_call_operand.vmem [shape: f32[2,51,33], index: 0, kind: input, shape index: {}]   ;;  %s6784_s1 = inlined_call_operand.vmem [shape: f32[2,3,17,25], index: 1, kind: input, shape index: {}]   ;;  %s6785_s2 = inlined_call_operand.vmem [shape: f32[25,25], index: 2, kind: input, shape index: {}]   ;;  %s6786_s3 = inlined_call_operand.vmem [shape: f32[160,51], index: 3, kind: input, shape index: {}]   ;;  %s6787_s4 = inlined_call_operand.vmem [shape: f32[8,3], index: 4, kind: input, shape index: {}]   ;;  %s6788_s5 = inlined_call_operand.vmem [shape: f32[1,8], index: 5, kind: input, shape index: {}]   ;;  %s6789_s6 = inlined_call_operand.<no memory space> [shape: f32[1,1], index: 6, kind: input, shape index: {}]   ;;  %s6790_s7 = inlined_call_operand.vmem [shape: f32[2,8,9,25], index: 7, kind: output, shape index: {0}]   ;;  %s6791_s8 = inlined_call_operand.vmem [shape: f32[2,1,1], index: 8, kind: output, shape index: {1}]   ;;  %s6792_s9 = inlined_call_operand.vmem [shape: f32[2,1,1], index: 9, kind: output, shape index: {2}]  }
   0x1   :  { %6822 = sst [smem:[#allocation29_spill]] %s6783_s0 }
   0x2   :  { %6823 = sst [smem:[#allocation30_spill]] %s6784_s1 }
   0x3   :  { %6824 = sst [smem:[#allocation31_spill]] %s6785_s2 }
   0x4   :  { %6825 = sst [smem:[#allocation32_spill]] %s6786_s3 }
   0x5   :  { %6826 = sst [smem:[#allocation33_spill]] %s6787_s4 }
   0x6   :  { %6827 = sst [smem:[#allocation34_spill]] %s6788_s5 }
   0x7   :  { %6828 = sst [smem:[#allocation35_spill]] %s6790_s7 }
   0x8   :  { %6829 = sst [smem:[#allocation36_spill]] %s6791_s8 }
   0x9   :  { %6830 = sst [smem:[#allocation37_spill]] %s6792_s9 }
   0xa   :  { %15 = sst [smem:[#allocation2]] %s6789_s6 }
   0xb   :  { %16 = vsyncpa [#allocation4], 0 }
   0xc   :  { %17 = vsyncpa [#allocation6], 0  ;;  %s5113_s11 = smov 0  }
   0xd LB: > { %6831 = sst [smem:[#allocation9_spill]] %s5047_s11  ;;  %s5119_s12 = sadd.s32 4294967295, %s5047_s11   ;;  %s5047_s11 = sphi %s5113_s11, %s23_s11  }
   0xe   : > { %p4199_p0 = scmp.ge.s32.totalorder %s5047_s11, 1  ;;  %p263_p1 = scmp.lt.s32.totalorder %s5047_s11, 3 }
   0xf   : > { %s6832_s4 = sld [smem:[#allocation33_spill]]  ;;  %p6793_p3 = scmp.eq.s32.totalorder %s5119_s12, 0 }
  0x10   : > { %p5126_p2 = pnand %p4199_p0, %p263_p1  ;;  %s6834_s5 = sld [smem:[#allocation34_spill]] }
  0x12   : > { %s6833_s15 = scalar_select %p5126_p2, 1, 0 }
  0x13   : > { %p4899_p4 = pneg %p5126_p2 }
  0x15   : > { %s282_s14 = sshll.u32 %s6832_s4, 4  ;;  %p5138_p5 = pnand %p6793_p3, %p4899_p4  ;;  %s283_s14 = int_to_ptr.vmem [resolvable:$true] %s282_s14 }
  0x16   : > { %s293_s18 = sshll.u32 %s6834_s5, 4  ;;  %s5003_s20 = scalar_lea.vmem %s283_s14, 128  ;;  %s294_s18 = int_to_ptr.vmem [resolvable:$true] %s293_s18 }
  0x17   : > { %p5004_p6 = scmp.ne.s32.totalorder %s283_s14, %s5003_s20  ;;  %p5005_p7 = pneg %p5138_p5 }
  0x18   : > { %p5011_p10 = scmp.lt.s32.totalorder %s283_s14, %s283_s14  ;;  %p5012_p11 = scmp.lt.s32.totalorder %s5003_s20, %s5003_s20 }
  0x19   : > { %p5006_p8 = pnand %p5005_p7, %p5004_p6 }
  0x1a   : > { %p5013_p12 = por %p5012_p11, %p5011_p10 }
  0x1b   : > { %p5007_p9 = pneg %p5006_p8 }
  0x1d   : > { %p5014_p13 = pnand %p5013_p12, %p5007_p9 }
  0x1f   : > { %5017 = shalt.err (!%p5014_p13)
}
  0x20   : > { %s5049_s21 = smov [#allocation3]   ;;  %s5018_s22 = scalar_lea.vmem %s294_s18, 16 }
  0x21   : > { %4902 = dma.vmem_to_smem (!%p5138_p5), %s283_s14, 128, %s5049_s21, [#allocation4]  }
  0x22   : > { %p5019_p0 = scmp.ne.s32.totalorder %s294_s18, %s5018_s22  ;;  %p5026_p3 = scmp.lt.s32.totalorder %s294_s18, %s294_s18 }
  0x23   : > { %p5027_p2 = scmp.lt.s32.totalorder %s5018_s22, %s5018_s22 }
  0x24   : > { %p5021_p1 = pnand %p5019_p0, %p5005_p7 }
  0x25   : > { %p5028_p6 = por %p5027_p2, %p5026_p3 }
  0x26   : > { %p5022_p4 = pneg %p5021_p1 }
  0x28   : > { %p5029_p8 = pnand %p5028_p6, %p5022_p4 }
  0x2a   : > { %5032 = shalt.err (!%p5029_p8)
}
  0x2b   : > { %s5050_s23 = smov [#allocation5]   ;;  %p6836_p9 = scmp.ne.s32.totalorder %s6833_s15, 0 }
  0x2c   : > { %4905 = dma.vmem_to_smem (!%p5138_p5), %s294_s18, 16, %s5050_s23, [#allocation6]  }
  0x2d   : > { %325 = sbr.rel (%p6836_p9) target bundleno = 1006 (0x3ee), region = 48 }
  0x32   : > { %p6837_p10 = scmp.eq.s32.totalorder %s5119_s12, 0 }
  0x34   : > { %5038 = dma.done.wait (%p6837_p10), [#allocation4], 128   ;;  %p6838_p11 = pmov %p6837_p10 }
  0x35   : > { %p6839_p7 = pmov %p6837_p10 }
  0x36   : > { %5040 = vsyncadd (%p6838_p11), [#allocation4], 4294967168 }
  0x37   : > { %5042 = dma.done.wait (%p6839_p7), [#allocation6], 16   ;;  %p6840_p2 = pmov %p6839_p7 }
  0x39   : > { %5044 = vsyncadd (%p6840_p2), [#allocation6], 4294967280 }
  0x3a   : > { %335 = sfence }
  0x3b   : > { %p377_p3 = scmp.lt.s32.totalorder %s5119_s12, 1  ;;  %s6841_s3 = sld [smem:[#allocation32_spill]]  ;;  %vm438_vm0 = vcmask 416768   ;;  %vm499_vm1 = vcmask 1042432   ;;  %v6795_v27 = vlaneseq  ;;  %vm1546_vm2 = vcmask 1046528  }
  0x3c   : > { %s6843_s0 = sld [smem:[#allocation29_spill]]  ;;  %s5052_s30 = smov 125   ;;  %vm1150_vm3 = vcmask 203776   ;;  %vm2065_vm4 = vcmask 1041408   ;;  %vm1497_vm5 = vcmask 1040384   ;;  %vm1714_vm6 = vcmask 1045504  }
  0x3d   : > { %s6920_s12 = smov (!%p377_p3, %s5119_s12), 1  ;;  %s668_s28 = sld [smem:[#allocation2]]  ;;  %v5249_v29 = vshrl.u32 %v6795_v27, 7  ;;  %vm1802_vm7 = vcmask 1044480   ;;  %vm1890_vm8 = vcmask 1043456   ;;  %vm1160_vm9 = vcmask 196608  }
  0x3e   : > { %6842 = sst [smem:[#allocation10_spill]] %s6920_s12  ;;  %s4889_s26 = smul.u32 56, %s6920_s12  ;;  %vm1307_vm10 = vcmask 130112   ;;  %vm1314_vm11 = vcmask 195712   ;;  %vm1321_vm12 = vcmask 261312   ;;  %vm1475_vm13 = vcmask 1041409  }
  0x3f   : > { %6844 = vst [vmem:[#allocation11_spill] sm:$0xff] %v5249_v29  ;;  %v774_v32 = vsub.s32 1, %v5249_v29  ;;  %v5262_v40 = vsub.s32 0, %v5249_v29  ;;  %v794_v45 = vsub.s32 2, %v5249_v29  ;;  %s5053_s10 = smov 126   ;;  %s5054_s13 = smov 124  }
  0x40   : > { %s5055_s6 = smov 123   ;;  %s5056_s14 = smov 122   ;;  %v814_v58 = vsub.s32 3, %v5249_v29  ;;  %v834_v60 = vsub.s32 4, %v5249_v29  ;;  %v854_v62 = vsub.s32 5, %v5249_v29  ;;  %vm1477_vm14 = vcmask 1042434  }
  0x41   : > { %v418_v0 = vld [vmem:[%s6841_s3] sm:$0xff]  ;;  %v419_v8 = vld [vmem:[%s6841_s3 + $0x8] sm:$0xff]  ;;  %v420_v9 = vld [vmem:[%s6841_s3 + $0x10] sm:$0xff]  ;;  %s5057_s15 = smov 121   ;;  %s5058_s16 = smov 120   ;;  %vm1479_vm15 = vcmask 1043459  }
  0x42   : > { %4562 = vmatprep.mubr.msk.f32.mxu0 %vm438_vm0, %v418_v0  ;;  %s381_s29 = scalar_lea.vmem %s6843_s0, %s4889_s26  ;;  %v421_v10 = vld [vmem:[%s6841_s3 + $0x18] sm:$0xff]  ;;  %v422_v11 = vld [vmem:[%s6841_s3 + $0x20] sm:$0xff]  ;;  %v423_v12 = vld [vmem:[%s6841_s3 + $0x28] sm:$0xff]  ;;  %s4890_s17 = smul.u32 72, %s6920_s12 }
  0x43   : > { %v404_v1 = vld [vmem:[%s381_s29 + $0x30] sm:$0x7]  ;;  %v403_v2 = vld [vmem:[%s381_s29 + $0x28] sm:$0xff]  ;;  %v402_v3 = vld [vmem:[%s381_s29 + $0x20] sm:$0xff]  ;;  %v669_v28 = vstv %s668_s28  ;;  %s6845_s1 = sld [smem:[#allocation30_spill]] }
  0x44   : > { %4548 = vmatprep.subr.msk.mxu0 %vm499_vm1, %v404_v1  ;;  %v401_v4 = vld [vmem:[%s381_s29 + $0x18] sm:$0xff]  ;;  %v400_v5 = vld [vmem:[%s381_s29 + $0x10] sm:$0xff]  ;;  %v399_v6 = vld [vmem:[%s381_s29 + $0x8] sm:$0xff]  ;;  %s6847_s2 = sld [smem:[#allocation31_spill]] }
  0x45   : > { %4549 = vmatpush3.msk.msra.mxu0 %vm499_vm1, %v404_v1  ;;  %v398_v7 = vld [vmem:[%s381_s29] sm:$0xff]  ;;  %v424_v13 = vld [vmem:[%s6841_s3 + $0x30] sm:$0xff]  ;;  %v425_v14 = vld [vmem:[%s6841_s3 + $0x38] sm:$0xff]  ;;  %s5051_s29 = smov 127   ;;  %s6285_s18 = sld [smem:[#allocation3 + $0x81]] }
  0x46   : > { %4550 = vmatprep.subr.mxu0 %v403_v2  ;;  %v426_v15 = vld [vmem:[%s6841_s3 + $0x40] sm:$0xff]  ;;  %v427_v16 = vld [vmem:[%s6841_s3 + $0x48] sm:$0xff]  ;;  %v428_v17 = vld [vmem:[%s6841_s3 + $0x50] sm:$0xff]  ;;  %s6287_s19 = sld [smem:[#allocation3 + $0x101]] }
  0x47   : > { %4551 = vmatpush3.msra.mxu0 %v403_v2  ;;  %v429_v18 = vld [vmem:[%s6841_s3 + $0x58] sm:$0xff]  ;;  %v430_v19 = vld [vmem:[%s6841_s3 + $0x60] sm:$0xff]  ;;  %v431_v20 = vld [vmem:[%s6841_s3 + $0x68] sm:$0xff]  ;;  %s6291_s21 = sld [smem:[#allocation3 + $0x181]] }
  0x48   : > { %4552 = vmatprep.subr.mxu0 %v402_v3  ;;  %v432_v21 = vld [vmem:[%s6841_s3 + $0x70] sm:$0xff]  ;;  %v433_v22 = vld [vmem:[%s6841_s3 + $0x78] sm:$0xff]  ;;  %v434_v23 = vld [vmem:[%s6841_s3 + $0x80] sm:$0xff]  ;;  %s6295_s22 = sld [smem:[#allocation3 + $0x201]] }
  0x49   : > { %4553 = vmatpush3.msra.mxu0 %v402_v3  ;;  %v435_v24 = vld [vmem:[%s6841_s3 + $0x88] sm:$0xff]  ;;  %v436_v25 = vld [vmem:[%s6841_s3 + $0x90] sm:$0xff]  ;;  %v437_v26 = vld [vmem:[%s6841_s3 + $0x98] sm:$0xff]  ;;  %s5282_s20 = scalar_lea.vmem %s6845_s1, %s4890_s17  ;;  %s6283_s17 = sld [smem:[#allocation3 + $0x1]] }
  0x4a   : > { %4554 = vmatprep.subr.mxu0 %v401_v4  ;;  %6846 = sst [smem:[#allocation12_spill]] %s5282_s20  ;;  %v5287_v0 = vld [vmem:[%s5282_s20] sm:$0xff]  ;;  %v5290_v1 = vld [vmem:[%s5282_s20 + $0x8] sm:$0xff] }
  0x4b   : > { %4555 = vmatpush3.msra.mxu0 %v401_v4  ;;  %v1547_v2 = vrot.slane %v5287_v0, 1  ;;  %v1548_v3 = vrot.slane %v5290_v1, 1  ;;  %s6299_s23 = sld [smem:[#allocation3 + $0x281]] }
  0x4c   : > { %4556 = vmatprep.subr.mxu0 %v400_v5  ;;  %s6301_s24 = sld [smem:[#allocation3 + $0x301]] }
  0x4d   : > { %4557 = vmatpush3.msra.mxu0 %v400_v5  ;;  %v1549_v4 = vsel %vm1546_vm2, %v1547_v2, %v1548_v3  ;;  %v874_v5 = vsub.s32 6, %v5249_v29  ;;  %s6303_s25 = sld [smem:[#allocation3 + $0x381]] }
  0x4e   : > { %4558 = vmatprep.subr.mxu0 %v399_v6  ;;  %4600 = vmatprep.mubr.msk.f32.mxu1 %vm1150_vm3, %v1549_v4  ;;  %s6309_s26 = sld [smem:[#allocation3 + $0x2]] }
  0x4f   : > { %4559 = vmatpush3.msra.mxu0 %v399_v6  ;;  %s6313_s27 = sld [smem:[#allocation3 + $0x82]] }
  0x50   : > { %4560 = vmatprep.subr.mxu0 %v398_v7  ;;  %s6315_s28 = sld [smem:[#allocation3 + $0x102]] }
  0x51   : > { %4561 = vmatpush3.msra.mxu0 %v398_v7  ;;  %v894_v7 = vsub.s32 7, %v5249_v29  ;;  %6882 = sst [smem:[#allocation28_spill]] %s6299_s23 }
  0x52   : > { %4563 = vmatmul.mubr.msk.f32.vlgmr.msra.gmra.mxu0 %vm438_vm0, %v419_v8  ;;  %s6320_s0 = sld [smem:[#allocation3 + $0x182]] }
  0x53   : > { %4565 = vmatprep.mubr.msk.f32.mxu0 %vm438_vm0, %v420_v9  ;;  %s6324_s1 = sld [smem:[#allocation5]] }
  0x54   : > { %s6329_s3 = sld [smem:[#allocation5 + $0x2]] }
  0x55   : > { %s6338_s4 = sld [smem:[#allocation5 + $0x3]] }
  0x56   : > { %4566 = vmatmul.mubr.msk.f32.gmra.mxu0 %vm438_vm0, %v421_v10  ;;  %v2066_v10 = vrot.slane %v5287_v0, 6  ;;  %s6344_s5 = sld [smem:[#allocation3 + $0x202]] }
  0x57   : > { %4568 = vmatprep.mubr.msk.f32.mxu0 %vm438_vm0, %v422_v11  ;;  %v6796_v11 = vrot.slane %v5290_v1, 6  ;;  %s6353_s11 = sld [smem:[#allocation5 + $0x4]] }
  0x58   : > { %s6361_s9 = sld [smem:[#allocation3 + $0x282]] }
  0x59   : > { %s6369_s8 = sld [smem:[#allocation5 + $0x5]] }
  0x5a   : > { %4569 = vmatmul.mubr.msk.f32.gmra.mxu0 %vm438_vm0, %v423_v12  ;;  %v2068_v12 = vsel %vm2065_vm4, %v2066_v10, %v6796_v11  ;;  %s6387_s7 = sld [smem:[#allocation5 + $0x6]] }
  0x5b   : > { %4571 = vmatprep.mubr.msk.f32.mxu0 %vm438_vm0, %v424_v13  ;;  %s6393_s12 = sld [smem:[#allocation3 + $0x382]] }
  0x5e   : > { %4572 = vmatmul.mubr.msk.f32.gmra.mxu0 %vm438_vm0, %v425_v14 }
  0x5f   : > { %4574 = vmatprep.mubr.msk.f32.mxu0 %vm438_vm0, %v426_v15 }
  0x62   : > { %4575 = vmatmul.mubr.msk.f32.gmra.mxu0 %vm438_vm0, %v427_v16 }
  0x63   : > { %4577 = vmatprep.mubr.msk.f32.mxu0 %vm438_vm0, %v428_v17 }
  0x66   : > { %4578 = vmatmul.mubr.msk.f32.gmra.mxu0 %vm438_vm0, %v429_v18 }
  0x67   : > { %4580 = vmatprep.mubr.msk.f32.mxu0 %vm438_vm0, %v430_v19 }
  0x6a   : > { %4581 = vmatmul.mubr.msk.f32.gmra.mxu0 %vm438_vm0, %v431_v20 }
  0x6b   : > { %4583 = vmatprep.mubr.msk.f32.mxu0 %vm438_vm0, %v432_v21 }
  0x6e   : > { %4584 = vmatmul.mubr.msk.f32.gmra.mxu0 %vm438_vm0, %v433_v22 }
  0x6f   : > { %4586 = vmatprep.mubr.msk.f32.mxu0 %vm438_vm0, %v434_v23 }
  0x72   : > { %4587 = vmatmul.mubr.msk.f32.gmra.mxu0 %vm438_vm0, %v435_v24 }
  0x73   : > { %4589 = vmatprep.mubr.msk.f32.mxu0 %vm438_vm0, %v436_v25 }
  0x76   : > { %4590 = vmatmul.mubr.msk.f32.gmra.mxu0 %vm438_vm0, %v437_v26  ;;  %vm1481_vm0 = vcmask 1044484  }
  0x77   : > { %4666 = vmatprep.mubr.msk.f32.mxu0 %vm1150_vm3, %v2068_v12 }
 0x112   : > { %v4564_v30 = vpop.f32.mrf.mxu0 }
 0x113   : > { %v5251_v31 = vadd.f32 %v4564_v30, %v669_v28 }
 0x114   : > { %v569_v33 = vpop.f32.mrf.mxu0 }
 0x115   : > { %v5254_v34 = vadd.f32 %v669_v28, %v569_v33  ;;  %v915_v9 = vrot.slane %v5251_v31, %v5262_v40 }
 0x116   : > { %v5256_v35 = vpop.f32.mrf.mxu0 }
 0x117   : > { %v775_v36 = vrot.slane %v5254_v34, %v774_v32  ;;  %v755_v42 = vrot.slane %v5254_v34, %v5262_v40  ;;  %v795_v48 = vrot.slane %v5254_v34, %v794_v45  ;;  %v815_v59 = vrot.slane %v5254_v34, %v814_v58 }
 0x118   : > { %v5259_v37 = vpop.f32.mrf.mxu0  ;;  %v835_v61 = vrot.slane %v5254_v34, %v834_v60  ;;  %v855_v63 = vrot.slane %v5254_v34, %v854_v62  ;;  %v875_v6 = vrot.slane %v5254_v34, %v874_v5  ;;  %v895_v8 = vrot.slane %v5254_v34, %v894_v7 }
 0x119   : > { %786 = vbcast.lane.b32.xlu1 %v775_v36, 276  ;;  %790 = vbcast.lane.b32.xlu0 %v775_v36, 284  ;;  %v5059_v32 = vmov 1966171168  }
 0x11a   : > { %v4570_v38 = vpop.f32.mrf.mxu0  ;;  %v936_v33 = vunpack.c.l.s4 %v5059_v32 }
 0x11c   : > { %v589_v39 = vpop.f32.mrf.mxu0 }
 0x11d   : > { %778 = vbcast.lane.b32.xlu1 %v775_v36, 260  ;;  %782 = vbcast.lane.b32.xlu0 %v775_v36, 268 }
 0x11e   : > { %v4573_v41 = vpop.f32.mrf.mxu0 }
 0x120   : > { %v599_v43 = vpop.f32.mrf.mxu0 }
 0x121   : > { %766 = vbcast.lane.b32.xlu1 %v755_v42, 276  ;;  %770 = vbcast.lane.b32.xlu0 %v755_v42, 284 }
 0x122   : > { %v4576_v44 = vpop.f32.mrf.mxu0 }
 0x124   : > { %v609_v46 = vpop.f32.mrf.mxu0 }
 0x125   : > { %758 = vbcast.lane.b32.xlu1 %v755_v42, 260  ;;  %762 = vbcast.lane.b32.xlu0 %v755_v42, 268 }
 0x126   : > { %v4579_v47 = vpop.f32.mrf.mxu0 }
 0x128   : > { %v619_v49 = vpop.f32.mrf.mxu0 }
 0x129   : > { %806 = vbcast.lane.b32.xlu1 %v795_v48, 276  ;;  %810 = vbcast.lane.b32.xlu0 %v795_v48, 284 }
 0x12a   : > { %v4582_v50 = vpop.f32.mrf.mxu0 }
 0x12c   : > { %v629_v51 = vpop.f32.mrf.mxu0 }
 0x12d   : > { %674 = vrot.lane.b32.xlu0 %v589_v39, %s5051_s29  ;;  %694 = vrot.lane.b32.xlu1 %v609_v46, %s5052_s30 }
 0x12e   : > { %v4585_v52 = vpop.f32.mrf.mxu0 }
 0x130   : > { %v639_v53 = vpop.f32.mrf.mxu0 }
 0x131   : > { %684 = vrot.lane.b32.xlu0 %v599_v43, %s5053_s10  ;;  %704 = vrot.lane.b32.xlu1 %v619_v49, %s5054_s13 }
 0x132   : > { %v4588_v54 = vpop.f32.mrf.mxu0 }
 0x134   : > { %v649_v55 = vpop.f32.mrf.mxu0 }
 0x135   : > { %714 = vrot.lane.b32.xlu0 %v629_v51, %s5055_s6  ;;  %724 = vrot.lane.b32.xlu1 %v639_v53, %s5056_s14 }
 0x136   : > { %v4591_v56 = vpop.f32.mrf.mxu0 }
 0x138   : > { %v659_v57 = vpop.f32.mrf.mxu0 }
 0x139   : > { %734 = vrot.lane.b32.xlu0 %v649_v55, %s5057_s15  ;;  %744 = vrot.lane.b32.xlu1 %v659_v57, %s5058_s16 }
 0x13d   : > { %802 = vbcast.lane.b32.xlu0 %v795_v48, 268  ;;  %798 = vbcast.lane.b32.xlu1 %v795_v48, 260 }
 0x141   : > { %830 = vbcast.lane.b32.xlu0 %v815_v59, 284  ;;  %826 = vbcast.lane.b32.xlu1 %v815_v59, 276 }
 0x145   : > { %676 = vrot.lane.b32.xlu0 %v4570_v38, %s5051_s29  ;;  %822 = vbcast.lane.b32.xlu1 %v815_v59, 268  ;;  %s6263_s29 = sld [smem:[#allocation3]] }
 0x149   : > { %686 = vrot.lane.b32.xlu0 %v4573_v41, %s5053_s10  ;;  %818 = vbcast.lane.b32.xlu1 %v815_v59, 260  ;;  %v937_v41 = vunpack.c.0.s8 %v936_v33  ;;  %v5370_v33 = vld [vmem:[%s6847_s2 + $0x18] sm:$0x1]  ;;  %s6267_s10 = sld [smem:[#allocation3 + $0x100]] }
 0x14b   : > { %v5324_v46 = vsub.s32 %v937_v41, %v5249_v29 }
 0x14d   : > { %696 = vrot.lane.b32.xlu0 %v4576_v44, %s5052_s30  ;;  %850 = vbcast.lane.b32.xlu1 %v835_v61, 284  ;;  %s6265_s30 = sld [smem:[#allocation3 + $0x80]] }
 0x151   : > { %706 = vrot.lane.b32.xlu0 %v4579_v47, %s5054_s13  ;;  %846 = vbcast.lane.b32.xlu1 %v835_v61, 276  ;;  %s6269_s13 = sld [smem:[#allocation3 + $0x180]] }
 0x155   : > { %716 = vrot.lane.b32.xlu0 %v4582_v50, %s5055_s6  ;;  %842 = vbcast.lane.b32.xlu1 %v835_v61, 268  ;;  %s6271_s6 = sld [smem:[#allocation3 + $0x200]] }
 0x159   : > { %726 = vrot.lane.b32.xlu0 %v4585_v52, %s5056_s14  ;;  %838 = vbcast.lane.b32.xlu1 %v835_v61, 260  ;;  %s6275_s14 = sld [smem:[#allocation3 + $0x280]] }
 0x15d   : > { %736 = vrot.lane.b32.xlu0 %v4588_v54, %s5057_s15  ;;  %870 = vbcast.lane.b32.xlu1 %v855_v63, 284  ;;  %s6279_s15 = sld [smem:[#allocation3 + $0x300]] }
 0x161   : > { %746 = vrot.lane.b32.xlu0 %v4591_v56, %s5058_s16  ;;  %866 = vbcast.lane.b32.xlu1 %v855_v63, 276  ;;  %s6281_s16 = sld [smem:[#allocation3 + $0x380]] }
 0x165   : > { %890 = vbcast.lane.b32.xlu0 %v875_v6, 284  ;;  %862 = vbcast.lane.b32.xlu1 %v855_v63, 268 }
 0x169   : > { %886 = vbcast.lane.b32.xlu0 %v875_v6, 276  ;;  %858 = vbcast.lane.b32.xlu1 %v855_v63, 260 }
 0x16d   : > { %882 = vbcast.lane.b32.xlu0 %v875_v6, 268  ;;  %878 = vbcast.lane.b32.xlu1 %v875_v6, 260 }
 0x171   : > { %910 = vbcast.lane.b32.xlu0 %v895_v8, 284  ;;  %906 = vbcast.lane.b32.xlu1 %v895_v8, 276 }
 0x175   : > { %930 = vbcast.lane.b32.xlu0 %v915_v9, 284  ;;  %902 = vbcast.lane.b32.xlu1 %v895_v8, 268 }
 0x179   : > { %926 = vbcast.lane.b32.xlu0 %v915_v9, 276  ;;  %898 = vbcast.lane.b32.xlu1 %v895_v8, 260 }
 0x17d   : > { %922 = vbcast.lane.b32.xlu0 %v915_v9, 268  ;;  %918 = vbcast.lane.b32.xlu1 %v915_v9, 260 }
 0x18b   : > { %v787_v13 = vpop.permute.xlu1 %786  ;;  %v791_v14 = vpop.permute.xlu0 %790 }
 0x18f   : > { %v779_v15 = vpop.permute.xlu1 %778  ;;  %v783_v16 = vpop.permute.xlu0 %782 }
 0x193   : > { %v5312_v17 = vpop.permute.xlu1 %766  ;;  %v771_v18 = vpop.permute.xlu0 %770 }
 0x197   : > { %v5314_v19 = vpop.permute.xlu1 %758  ;;  %v5316_v20 = vpop.permute.xlu0 %762 }
 0x19b   : > { %v5318_v21 = vpop.permute.xlu1 %806  ;;  %v5320_v22 = vpop.permute.xlu0 %810 }
 0x19f   : > { %v675_v23 = vpop.permute.xlu0 %674  ;;  %v695_v24 = vpop.permute.xlu1 %694 }
 0x1a0   : > { %v680_v25 = vadd.f32 %v675_v23, %v5259_v37 }
 0x1a3   : > { %v685_v26 = vpop.permute.xlu0 %684  ;;  %v705_v28 = vpop.permute.xlu1 %704 }
 0x1a4   : > { %v690_v30 = vadd.f32 %v685_v26, %v680_v25 }
 0x1a6   : > { %v700_v31 = vadd.f32 %v695_v24, %v690_v30 }
 0x1a7   : > { %v715_v34 = vpop.permute.xlu0 %714  ;;  %v725_v36 = vpop.permute.xlu1 %724 }
 0x1a8   : > { %v710_v38 = vadd.f32 %v705_v28, %v700_v31 }
 0x1aa   : > { %v720_v39 = vadd.f32 %v715_v34, %v710_v38 }
 0x1ab   : > { %v735_v42 = vpop.permute.xlu0 %734  ;;  %v745_v43 = vpop.permute.xlu1 %744 }
 0x1ac   : > { %v730_v44 = vadd.f32 %v725_v36, %v720_v39 }
 0x1ae   : > { %v740_v45 = vadd.f32 %v735_v42, %v730_v44  ;;  %v5387_v42 = vld [vmem:[%s6847_s2 + $0x10] sm:$0xff] }
 0x1af   : > { %v5326_v47 = vpop.permute.xlu0 %802  ;;  %v5328_v37 = vpop.permute.xlu1 %798 }
 0x1b0   : > { %v750_v48 = vadd.f32 %v745_v43, %v740_v45 }
 0x1b2   : > { %v941_v49 = vrot.slane %v750_v48, %v5324_v46  ;;  %v934_v10 = vcombine.high %v750_v48, %v750_v48  ;;  %v5401_v48 = vld [vmem:[%s6847_s2 + $0x8] sm:$0xff] }
 0x1b3   : > { %v5331_v50 = vpop.permute.xlu0 %830  ;;  %v5333_v51 = vpop.permute.xlu1 %826 }
 0x1b4   : > { %v949_v52 = vcombine.high %v941_v49, %v941_v49  ;;  %v957_v59 = vrot.slane %v941_v49, %v5324_v46 }
 0x1b6   : > { %v971_v53 = vrot.slane %v949_v52, %v5324_v46  ;;  %v1000_v2 = vrot.slane %v957_v59, %v5262_v40  ;;  %v979_v8 = vcombine.high %v957_v59, %v957_v59 }
 0x1b7   : > { %v677_v54 = vpop.permute.xlu0 %676  ;;  %v5336_v55 = vpop.permute.xlu1 %822 }
 0x1b8   : > { %v1004_v56 = vrot.slane %v971_v53, %v5262_v40  ;;  %v1045_v9 = vsub.f32 %v771_v18, %v1000_v2  ;;  %v1044_v12 = vsub.f32 %v5312_v17, %v1000_v2  ;;  %v1043_v23 = vsub.f32 %v5316_v20, %v1000_v2 }
 0x1b9   : > { %v1042_v24 = vsub.f32 %v5314_v19, %v1000_v2  ;;  %v981_v18 = vcombine.high %v971_v53, %v971_v53  ;;  %v681_v28 = vadd.f32 %v5256_v35, %v677_v54 }
 0x1ba   : > { %v1048_v60 = vsub.f32 %v787_v13, %v1004_v56  ;;  %v1049_v61 = vsub.f32 %v791_v14, %v1004_v56  ;;  %v1047_v4 = vsub.f32 %v783_v16, %v1004_v56  ;;  %v1046_v5 = vsub.f32 %v779_v15, %v1004_v56 }
 0x1bb   : > { %v687_v57 = vpop.permute.xlu0 %686  ;;  %v5339_v58 = vpop.permute.xlu1 %818  ;;  %v1008_v16 = vrot.slane %v979_v8, %v5262_v40  ;;  %v5353_v15 = vrot.slane %v934_v10, %v5324_v46 }
 0x1bc   : > { %4929 = vtanh.f32 %v1048_v60  ;;  %v691_v32 = vadd.f32 %v687_v57, %v681_v28  ;;  %v5419_v57 = vld [vmem:[%s6847_s2] sm:$0xff]  ;;  %s6326_s2 = sld [smem:[#allocation5 + $0x1]] }
 0x1bd   : > { %4931 = vtanh.f32 %v1049_v61  ;;  %v1053_v17 = vsub.f32 %v5320_v22, %v1008_v16  ;;  %v964_v20 = vrot.slane %v5353_v15, %v5324_v46  ;;  %v1052_v31 = vsub.f32 %v5318_v21, %v1008_v16 }
 0x1be   : > { %4933 = vtanh.f32 %v1047_v4  ;;  %v5373_v22 = vrot.slane %v981_v18, %v5262_v40  ;;  %v1051_v36 = vsub.f32 %v5326_v47, %v1008_v16  ;;  %v1050_v43 = vsub.f32 %v5328_v37, %v1008_v16 }
 0x1bf   : > { %v697_v62 = vpop.permute.xlu0 %696  ;;  %v5342_v63 = vpop.permute.xlu1 %850  ;;  %4935 = vtanh.f32 %v1046_v5  ;;  %v980_v41 = vcombine.high %v964_v20, %v964_v20 }
 0x1c0   : > { %4937 = vtanh.f32 %v1045_v9  ;;  %v701_v38 = vadd.f32 %v697_v62, %v691_v32  ;;  %v1057_v52 = vsub.f32 %v5331_v50, %v5373_v22  ;;  %v1056_v59 = vsub.f32 %v5333_v51, %v5373_v22 }
 0x1c1   : > { %4939 = vtanh.f32 %v1044_v12  ;;  %v5430_v61 = vrot.slane %v980_v41, %v5262_v40  ;;  %v1055_v2 = vsub.f32 %v5336_v55, %v5373_v22  ;;  %v950_v55 = vcombine.high %v5353_v15, %v5353_v15 }
 0x1c2   : > { %4941 = vtanh.f32 %v1043_v23  ;;  %v1054_v10 = vsub.f32 %v5339_v58, %v5373_v22  ;;  %v5452_v12 = vrot.slane %v964_v20, %v5262_v40 }
 0x1c3   : > { %v707_v6 = vpop.permute.xlu0 %706  ;;  %v5345_v7 = vpop.permute.xlu1 %846  ;;  %4943 = vtanh.f32 %v1042_v24  ;;  %v5485_v28 = vrot.slane %v950_v55, %v5324_v46  ;;  %v6797_v55 = vrot.slane %v5290_v1, 3 }
 0x1c4   : > { %4945 = vtanh.f32 %v1053_v17  ;;  %v711_v44 = vadd.f32 %v707_v6, %v701_v38  ;;  %v1061_v58 = vsub.f32 %v5342_v63, %v5452_v12  ;;  %v1060_v20 = vsub.f32 %v5345_v7, %v5452_v12 }
 0x1c5   : > { %4947 = vtanh.f32 %v1052_v31 }
 0x1c6   : > { %4949 = vtanh.f32 %v1051_v36 }
 0x1c7   : > { %v717_v13 = vpop.permute.xlu0 %716  ;;  %v5348_v14 = vpop.permute.xlu1 %842  ;;  %4951 = vtanh.f32 %v1050_v43 }
 0x1c8   : > { %v721_v53 = vadd.f32 %v717_v13, %v711_v44  ;;  %4953 = vtanh.f32 %v1057_v52 }
 0x1c9   : > { %v5362_v30 = vpop.eup %4929  ;;  %4955 = vtanh.f32 %v1056_v59 }
 0x1ca   : > { %v5365_v19 = vpop.eup %4931  ;;  %v5394_v45 = vadd.f32 %v5362_v30, %v5387_v42 }
 0x1cb   : > { %v727_v25 = vpop.permute.xlu0 %726  ;;  %v5356_v26 = vpop.permute.xlu1 %838  ;;  %v5380_v21 = vadd.f32 %v5365_v19, %v5370_v33 }
 0x1cc   : > { %v5382_v39 = vpop.eup %4933  ;;  %v731_v50 = vadd.f32 %v727_v25, %v721_v53  ;;  %v1716_v25 = vrot.slane %v5290_v1, 2  ;;  %v1058_v52 = vsub.f32 %v5356_v26, %v5452_v12 }
 0x1cd   : > { %4592 = vmatprep.subr.msk.mxu1 %vm1497_vm5, %v5380_v21  ;;  %v5396_v47 = vpop.eup %4935  ;;  %v5412_v54 = vadd.f32 %v5382_v39, %v5401_v48 }
 0x1ce   : > { %4593 = vmatpush3.msk.msra.mxu1 %vm1497_vm5, %v5380_v21  ;;  %v5414_v56 = vpop.eup %4937  ;;  %v5427_v60 = vadd.f32 %v5396_v47, %v5419_v57 }
 0x1cf   : > { %v737_v35 = vpop.permute.xlu0 %736  ;;  %v5375_v34 = vpop.permute.xlu1 %870  ;;  %4594 = vmatprep.subr.mxu1 %v5394_v45  ;;  %v5442_v6 = vadd.f32 %v5414_v56, %v5370_v33 }
 0x1d0   : > { %4595 = vmatpush3.msra.mxu1 %v5394_v45  ;;  %v5432_v62 = vpop.eup %4939  ;;  %v741_v5 = vadd.f32 %v737_v35, %v731_v50  ;;  %v1059_v35 = vsub.f32 %v5348_v14, %v5452_v12  ;;  %v5515_v14 = vrot.slane %v5485_v28, %v5262_v40 }
 0x1d1   : > { %4596 = vmatprep.subr.mxu1 %v5412_v54  ;;  %v5445_v9 = vpop.eup %4941  ;;  %v5462_v23 = vadd.f32 %v5432_v62, %v5387_v42 }
 0x1d2   : > { %4597 = vmatpush3.msra.mxu1 %v5412_v54  ;;  %v5464_v16 = vpop.eup %4943  ;;  %v5478_v18 = vadd.f32 %v5445_v9, %v5401_v48 }
 0x1d3   : > { %v747_v49 = vpop.permute.xlu0 %746  ;;  %v5405_v37 = vpop.permute.xlu1 %866  ;;  %4598 = vmatprep.subr.mxu1 %v5427_v60  ;;  %v5494_v32 = vadd.f32 %v5464_v16, %v5419_v57 }
 0x1d4   : > { %4599 = vmatpush3.msra.mxu1 %v5427_v60  ;;  %v751_v13 = vadd.f32 %v747_v49, %v741_v5  ;;  %v5482_v17 = vpop.eup %4945  ;;  %v982_v5 = vcombine.high %v5485_v28, %v5485_v28 }
 0x1d5   : > { %4603 = vmatprep.subr.msk.mxu1 %vm1497_vm5, %v5442_v6  ;;  %4601 = vmatmul.mubr.msk.f32.vlgmr.msra.gmra.mxu1 %vm1150_vm3, %v1548_v3  ;;  %v1715_v3 = vrot.slane %v5287_v0, 2  ;;  %v5496_v22 = vpop.eup %4947  ;;  %v5504_v38 = vadd.f32 %v5482_v17, %v5370_v33 }
 0x1d6   : > { %4604 = vmatpush3.msk.msra.mxu1 %vm1497_vm5, %v5442_v6  ;;  %4611 = vmatprep.mubr.msk.f32.mxu1 %vm1150_vm3, %v5287_v0  ;;  %v989_v31 = vrot.slane %v751_v13, %v5324_v46  ;;  %v5511_v49 = vpop.eup %4949  ;;  %v5527_v59 = vadd.f32 %v5496_v22, %v5387_v42 }
 0x1d7   : > { %v891_v51 = vpop.permute.xlu0 %890  ;;  %v5437_v4 = vpop.permute.xlu1 %862  ;;  %4605 = vmatprep.subr.mxu1 %v5462_v23  ;;  %v1717_v44 = vsel %vm1714_vm6, %v1715_v3, %v1716_v25 }
 0x1d8   : > { %v1069_v8 = vsub.f32 %v891_v51, %v5430_v61  ;;  %4606 = vmatpush3.msra.mxu1 %v5462_v23  ;;  %v996_v53 = vrot.slane %v989_v31, %v5324_v46  ;;  %v5529_v50 = vpop.eup %4951  ;;  %v1063_v28 = vsub.f32 %v5437_v4, %v5515_v14 }
 0x1d9   : > { %4607 = vmatprep.subr.mxu1 %v5478_v18  ;;  %v5545_v51 = vpop.eup %4953  ;;  %v5558_v12 = vadd.f32 %v5529_v50, %v5419_v57 }
 0x1da   : > { %4957 = vtanh.f32 %v1069_v8  ;;  %4608 = vmatpush3.msra.mxu1 %v5478_v18  ;;  %6848 = vst [vmem:[#allocation13_spill] sm:$0xff] %v5545_v51  ;;  %v1803_v8 = vrot.slane %v5287_v0, 3  ;;  %v5561_v13 = vrot.slane %v996_v53, %v5262_v40  ;;  %v5571_v3 = vadd.f32 %v5545_v51, %v5370_v33 }
 0x1db   : > { %v887_v15 = vpop.permute.xlu0 %886  ;;  %v5470_v24 = vpop.permute.xlu1 %858  ;;  %4959 = vtanh.f32 %v1055_v2  ;;  %4609 = vmatprep.subr.mxu1 %v5494_v32  ;;  %v5542_v2 = vadd.f32 %v5511_v49, %v5401_v48 }
 0x1dc   : > { %v1068_v63 = vsub.f32 %v887_v15, %v5430_v61  ;;  %4961 = vtanh.f32 %v1054_v10  ;;  %4610 = vmatpush3.msra.mxu1 %v5494_v32  ;;  %v5554_v10 = vpop.eup %4955 }
 0x1dd   : > { %4614 = vmatprep.subr.msk.mxu1 %vm1497_vm5, %v5504_v38  ;;  %4612 = vmatmul.mubr.msk.f32.vlgmr.msra.gmra.mxu1 %vm1150_vm3, %v5290_v1 }
 0x1de   : > { %4963 = vtanh.f32 %v1068_v63  ;;  %4615 = vmatpush3.msk.msra.mxu1 %vm1497_vm5, %v5504_v38  ;;  %4622 = vmatprep.mubr.msk.f32.mxu1 %vm1150_vm3, %v1717_v44 }
 0x1df   : > { %4965 = vtanh.f32 %v1061_v58  ;;  %v883_v7 = vpop.permute.xlu0 %882  ;;  %v879_v36 = vpop.permute.xlu1 %878  ;;  %4616 = vmatprep.subr.mxu1 %v5527_v59 }
 0x1e0   : > { %v1067_v41 = vsub.f32 %v883_v7, %v5430_v61  ;;  %v1066_v43 = vsub.f32 %v879_v36, %v5430_v61  ;;  %4967 = vtanh.f32 %v1060_v20  ;;  %v1065_v61 = vsub.f32 %v5375_v34, %v5515_v14  ;;  %4617 = vmatpush3.msra.mxu1 %v5527_v59 }
 0x1e1   : > { %v1064_v34 = vsub.f32 %v5405_v37, %v5515_v14  ;;  %4618 = vmatprep.subr.mxu1 %v5542_v2  ;;  %v5586_v7 = vrot.slane %v982_v5, %v5262_v40  ;;  %v1805_v36 = vsel %vm1802_vm7, %v1803_v8, %v6797_v55 }
 0x1e2   : > { %4969 = vtanh.f32 %v1067_v41  ;;  %4619 = vmatpush3.msra.mxu1 %v5542_v2  ;;  %v5596_v41 = vadd.f32 %v5554_v10, %v5387_v42 }
 0x1e3   : > { %4971 = vtanh.f32 %v1059_v35  ;;  %v5535_v46 = vpop.permute.xlu0 %910  ;;  %v5537_v26 = vpop.permute.xlu1 %906  ;;  %4620 = vmatprep.subr.mxu1 %v5558_v12  ;;  %v1062_v35 = vsub.f32 %v5470_v24, %v5515_v14 }
 0x1e4   : > { %4973 = vtanh.f32 %v1066_v43  ;;  %4621 = vmatpush3.msra.mxu1 %v5558_v12  ;;  %v1073_v24 = vsub.f32 %v5535_v46, %v5586_v7  ;;  %v1891_v46 = vrot.slane %v5287_v0, 4 }
 0x1e5   : > { %4975 = vtanh.f32 %v1058_v52  ;;  %4625 = vmatprep.subr.msk.mxu1 %vm1497_vm5, %v5571_v3  ;;  %4623 = vmatmul.mubr.msk.f32.vlgmr.msra.gmra.mxu1 %vm1150_vm3, %v1716_v25 }
 0x1e6   : > { %4977 = vtanh.f32 %v1065_v61  ;;  %4626 = vmatpush3.msk.msra.mxu1 %vm1497_vm5, %v5571_v3  ;;  %4633 = vmatprep.mubr.msk.f32.mxu1 %vm1150_vm3, %v1805_v36  ;;  %v1072_v61 = vsub.f32 %v5537_v26, %v5586_v7 }
 0x1e7   : > { %v5564_v37 = vpop.eup %4957  ;;  %v931_v58 = vpop.permute.xlu0 %930  ;;  %4979 = vtanh.f32 %v1064_v34  ;;  %4627 = vmatprep.subr.mxu1 %v5596_v41  ;;  %v1892_v34 = vrot.slane %v5290_v1, 4 }
 0x1e8   : > { %6849 = vst [vmem:[#allocation14_spill] sm:$0xff] %v5564_v37  ;;  %v5567_v15 = vpop.permute.xlu1 %902  ;;  %v5575_v63 = vadd.f32 %v5564_v37, %v5370_v33  ;;  %v1077_v20 = vsub.f32 %v931_v58, %v5561_v13  ;;  %v5581_v31 = vpop.eup %4959  ;;  %4628 = vmatpush3.msra.mxu1 %v5596_v41 }
 0x1e9   : > { %v5592_v4 = vpop.eup %4961  ;;  %v5615_v52 = vadd.f32 %v5581_v31, %v5401_v48  ;;  %v1893_v11 = vsel %vm1890_vm8, %v1891_v46, %v1892_v34  ;;  %v1978_v46 = vrot.slane %v5287_v0, 5 }
 0x1ea   : > { %6850 = vst [vmem:[#allocation15_spill] sm:$0xff] %v5592_v4  ;;  %4981 = vtanh.f32 %v1077_v20  ;;  %4658 = vmatprep.subr.msk.mxu0 %vm1497_vm5, %v5575_v63  ;;  %v5635_v8 = vadd.f32 %v5592_v4, %v5419_v57  ;;  %v2154_v4 = vrot.slane %v5290_v1, 7 }
 0x1eb   : > { %v5603_v40 = vpop.eup %4963  ;;  %v927_v43 = vpop.permute.xlu0 %926  ;;  %4983 = vtanh.f32 %v1063_v28  ;;  %4659 = vmatpush3.msk.msra.mxu0 %vm1497_vm5, %v5575_v63  ;;  %4629 = vmatprep.subr.mxu1 %v5615_v52 }
 0x1ec   : > { %6851 = vst [vmem:[#allocation16_spill] sm:$0xff] %v5603_v40  ;;  %v899_v44 = vpop.permute.xlu1 %898  ;;  %v5611_v14 = vpop.eup %4965  ;;  %v5619_v25 = vadd.f32 %v5603_v40, %v5387_v42  ;;  %v1076_v53 = vsub.f32 %v927_v43, %v5561_v13  ;;  %4985 = vtanh.f32 %v1062_v35  ;;  %4630 = vmatpush3.msra.mxu1 %v5615_v52  ;;  %v1071_v43 = vsub.f32 %v5567_v15, %v5586_v7 }
 0x1ed   : > { %6852 = vst [vmem:[#allocation17_spill] sm:$0xff] %v5611_v14  ;;  %v5631_v5 = vpop.eup %4967  ;;  %v5643_v58 = vadd.f32 %v5611_v14, %v5370_v33  ;;  %4631 = vmatprep.subr.mxu1 %v5635_v8  ;;  %v1070_v29 = vsub.f32 %v899_v44, %v5586_v7  ;;  %v6855_v15 = vrot.slane %v5290_v1, 3 }
 0x1ee   : > { %4987 = vtanh.f32 %v1076_v53  ;;  %4660 = vmatprep.subr.mxu0 %v5619_v25  ;;  %4632 = vmatpush3.msra.mxu1 %v5635_v8  ;;  %v5664_v55 = vadd.f32 %v5631_v5, %v5387_v42 }
 0x1ef   : > { %v5639_v26 = vpop.eup %4969  ;;  %4989 = vtanh.f32 %v1073_v24  ;;  %v923_v28 = vpop.permute.xlu0 %922  ;;  %4661 = vmatpush3.msra.mxu0 %v5619_v25  ;;  %4634 = vmatmul.mubr.msk.f32.vlgmr.msra.gmra.mxu1 %vm1150_vm3, %v6855_v15 }
 0x1f0   : > { %6853 = vst [vmem:[#allocation18_spill] sm:$0xff] %v5639_v26  ;;  %v919_v20 = vpop.permute.xlu1 %918  ;;  %v5647_v35 = vpop.eup %4971  ;;  %v5651_v36 = vadd.f32 %v5639_v26, %v5401_v48  ;;  %v1075_v53 = vsub.f32 %v923_v28, %v5561_v13  ;;  %4991 = vtanh.f32 %v1072_v61  ;;  %4636 = vmatprep.subr.msk.mxu1 %vm1497_vm5, %v5643_v58  ;;  %4644 = vmatprep.mubr.msk.f32.mxu1 %vm1150_vm3, %v1893_v11  ;;  %v1979_v28 = vrot.slane %v5290_v1, 5 }
 0x1f1   : > { %v1074_v24 = vsub.f32 %v919_v20, %v5561_v13  ;;  %v5658_v27 = vpop.eup %4973  ;;  %4637 = vmatpush3.msk.msra.mxu1 %vm1497_vm5, %v5643_v58  ;;  %v5681_v7 = vadd.f32 %v5647_v35, %v5401_v48  ;;  %v2153_v26 = vrot.slane %v5287_v0, 7 }
 0x1f2   : > { %6854 = vst [vmem:[#allocation19_spill] sm:$0xff] %v5658_v27  ;;  %4993 = vtanh.f32 %v1075_v53  ;;  %v5672_v13 = vpop.eup %4975  ;;  %4662 = vmatprep.subr.mxu0 %v5651_v36  ;;  %v5685_v44 = vadd.f32 %v5658_v27, %v5419_v57  ;;  %4638 = vmatprep.subr.mxu1 %v5664_v55  ;;  %v1980_v37 = vsel %vm499_vm1, %v1978_v46, %v1979_v28 }
 0x1f3   : > { %6856 = vst [vmem:[#allocation20_spill] sm:$0xff] %v5672_v13  ;;  %4995 = vtanh.f32 %v1074_v24  ;;  %v5677_v61 = vpop.eup %4977  ;;  %4639 = vmatpush3.msra.mxu1 %v5664_v55  ;;  %4663 = vmatpush3.msra.mxu0 %v5651_v36  ;;  %v5697_v53 = vadd.f32 %v5672_v13, %v5419_v57 }
 0x1f4   : > { %6857 = vst [vmem:[#allocation21_spill] sm:$0xff] %v5677_v61  ;;  %4997 = vtanh.f32 %v1071_v43  ;;  %v5693_v20 = vpop.eup %4979  ;;  %4640 = vmatprep.subr.mxu1 %v5681_v7  ;;  %4664 = vmatprep.subr.mxu0 %v5685_v44  ;;  %v5707_v43 = vadd.f32 %v5677_v61, %v5370_v33 }
 0x1f5   : > { %6858 = vst [vmem:[#allocation22_spill] sm:$0xff] %v5693_v20  ;;  %4999 = vtanh.f32 %v1070_v29  ;;  %4641 = vmatpush3.msra.mxu1 %v5681_v7  ;;  %4665 = vmatpush3.msra.mxu0 %v5685_v44  ;;  %v6860_v29 = vrot.slane %v5290_v1, 6 }
 0x1f6   : > { %4642 = vmatprep.subr.mxu1 %v5697_v53 }
 0x1f7   : > { %v5701_v11 = vpop.eup %4981  ;;  %4667 = vmatmul.mubr.msk.f32.vlgmr.msra.gmra.mxu0 %vm1150_vm3, %v6860_v29  ;;  %4643 = vmatpush3.msra.mxu1 %v5697_v53 }
 0x1f8   : > { %6859 = vst [vmem:[#allocation23_spill] sm:$0xff] %v5701_v11  ;;  %v5711_v24 = vadd.f32 %v5701_v11, %v5370_v33  ;;  %v5717_v15 = vpop.eup %4983  ;;  %4688 = vmatprep.mubr.msk.f32.mxu0 %vm1150_vm3, %v5290_v1  ;;  %v5727_v11 = vadd.f32 %v5693_v20, %v5387_v42  ;;  %4645 = vmatmul.mubr.msk.f32.vlgmr.msra.gmra.mxu1 %vm1150_vm3, %v1892_v34 }
 0x1f9   : > { %6861 = vst [vmem:[#allocation24_spill] sm:$0xff] %v5717_v15  ;;  %v5723_v61 = vpop.eup %4985  ;;  %4647 = vmatprep.subr.msk.mxu1 %vm1497_vm5, %v5707_v43  ;;  %v5740_v27 = vadd.f32 %v5717_v15, %v5401_v48  ;;  %4655 = vmatprep.mubr.msk.f32.mxu1 %vm1150_vm3, %v1980_v37 }
 0x1fa   : > { %6862 = vst [vmem:[#allocation25_spill] sm:$0xff] %v5723_v61  ;;  %4648 = vmatpush3.msk.msra.mxu1 %vm1497_vm5, %v5707_v43  ;;  %4680 = vmatprep.subr.msk.mxu0 %vm1497_vm5, %v5711_v24  ;;  %v5754_v51 = vadd.f32 %v5723_v61, %v5419_v57 }
 0x1fb   : > { %v4988_v29 = vpop.eup %4987  ;;  %4649 = vmatprep.subr.mxu1 %v5727_v11  ;;  %4681 = vmatpush3.msk.msra.mxu0 %vm1497_vm5, %v5711_v24 }
 0x1fc   : > { %v5736_v46 = vpop.eup %4989  ;;  %v5743_v40 = vadd.f32 %v4988_v29, %v5387_v42  ;;  %4650 = vmatpush3.msra.mxu1 %v5727_v11 }
 0x1fd   : > { %6863 = vst [vmem:[#allocation26_spill] sm:$0xff] %v5736_v46  ;;  %v5750_v34 = vpop.eup %4991  ;;  %4651 = vmatprep.subr.mxu1 %v5740_v27  ;;  %v5764_v14 = vadd.f32 %v5736_v46, %v5370_v33  ;;  %v2155_v46 = vsel %vm1497_vm5, %v2153_v26, %v2154_v4 }
 0x1fe   : > { %6864 = vst [vmem:[#allocation27_spill] sm:$0xff] %v5743_v40  ;;  %4682 = vmatprep.subr.mxu0 %v5743_v40  ;;  %4652 = vmatpush3.msra.mxu1 %v5740_v27  ;;  %v5775_v1 = vadd.f32 %v5750_v34, %v5387_v42 }
 0x1ff   : > { %v4994_v37 = vpop.eup %4993  ;;  %4683 = vmatpush3.msra.mxu0 %v5743_v40  ;;  %4653 = vmatprep.subr.mxu1 %v5754_v51 }
 0x200   : > { %v4996_v20 = vpop.eup %4995  ;;  %v5767_v61 = vadd.f32 %v4994_v37, %v5401_v48  ;;  %v1147_v15 = vmul.f32 %v4994_v37, %v4994_v37  ;;  %4654 = vmatpush3.msra.mxu1 %v5754_v51  ;;  %v5821_v37 = vld [vmem:[%s5282_s20 + $0x20] sm:$0xff] }
 0x201   : > { %v5770_v13 = vpop.eup %4997  ;;  %v1146_v0 = vmul.f32 %v4996_v20, %v4996_v20  ;;  %4656 = vmatmul.mubr.msk.f32.vlgmr.msra.gmra.mxu1 %vm1150_vm3, %v1979_v28  ;;  %4669 = vmatprep.subr.msk.mxu1 %vm1497_vm5, %v5764_v14 }
 0x202   : > { %v1251_v33 = vsel %vm1150_vm3, %v1147_v15, 0.0  ;;  %v5782_v40 = vpop.eup %4999  ;;  %4670 = vmatpush3.msk.msra.mxu1 %vm1497_vm5, %v5764_v14  ;;  %4684 = vmatprep.subr.mxu0 %v5767_v61  ;;  %v5789_v42 = vadd.f32 %v5770_v13, %v5401_v48  ;;  %v5800_v15 = vadd.f32 %v4996_v20, %v5419_v57  ;;  %v5808_v48 = vld [vmem:[%s5282_s20 + $0x10] sm:$0x1]  ;;  %v5818_v20 = vld [vmem:[%s5282_s20 + $0x18] sm:$0xff] }
 0x203   : > { %4671 = vmatprep.subr.mxu1 %v5775_v1  ;;  %1252 = vadd.xlane.f32.xlu1 %v1251_v33  ;;  %v1248_v28 = vsel %vm1150_vm3, %v1146_v0, 0.0  ;;  %v5797_v26 = vadd.f32 %v5782_v40, %v5419_v57  ;;  %v1148_v57 = vmul.f32 %v4988_v29, %v4988_v29  ;;  %v1116_v29 = vmul.f32 %v5432_v62, %v5432_v62 }
 0x204   : > { %4672 = vmatpush3.msra.mxu1 %v5775_v1  ;;  %4677 = vmatprep.mubr.msk.f32.mxu1 %vm1150_vm3, %v2155_v46  ;;  %v1115_v46 = vmul.f32 %v5445_v9, %v5445_v9  ;;  %v2344_v0 = vrot.slane %v5818_v20, 1  ;;  %v2345_v33 = vrot.slane %v5821_v37, 1 }
 0x205   : > { %4673 = vmatprep.subr.mxu1 %v5789_v42  ;;  %4685 = vmatpush3.msra.mxu0 %v5767_v61  ;;  %v1157_v62 = vsel %vm1150_vm3, %v1116_v29, 0.0  ;;  %v2505_v29 = vrot.slane %v5818_v20, 2 }
 0x206   : > { %4674 = vmatpush3.msra.mxu1 %v5789_v42  ;;  %1249 = vadd.xlane.f32.xlu0 %v1248_v28  ;;  %v1154_v9 = vsel %vm1150_vm3, %v1115_v46, 0.0  ;;  %v1114_v28 = vmul.f32 %v5464_v16, %v5464_v16  ;;  %v2346_v46 = vsel %vm1546_vm2, %v2344_v0, %v2345_v33  ;;  %v2506_v0 = vrot.slane %v5821_v37, 2 }
 0x207   : > { %4675 = vmatprep.subr.mxu1 %v5797_v26  ;;  %4686 = vmatprep.subr.mxu0 %v5800_v15 }
 0x208   : > { %4676 = vmatpush3.msra.mxu1 %v5797_v26  ;;  %4687 = vmatpush3.msra.mxu0 %v5800_v15  ;;  %v1151_v16 = vsel %vm1150_vm3, %v1114_v28, 0.0  ;;  %v2590_v28 = vrot.slane %v5821_v37, 3 }
 0x209   : > { %4678 = vmatmul.mubr.msk.f32.vlgmr.msra.gmra.mxu1 %vm1150_vm3, %v2154_v4  ;;  %4691 = vmatprep.subr.msk.mxu1 %vm1497_vm5, %v5380_v21  ;;  %v1254_v4 = vsel %vm1150_vm3, %v1148_v57, 0.0  ;;  %v1117_v57 = vmul.f32 %v5414_v56, %v5414_v56 }
 0x20a   : > { %4692 = vmatpush3.msk.msra.mxu1 %vm1497_vm5, %v5380_v21  ;;  %4689 = vmatmul.mubr.msk.f32.vlgmr.msra.gmra.mxu0 %vm1150_vm3, %v5808_v48 }
 0x20b   : > { %4693 = vmatprep.subr.mxu1 %v5394_v45  ;;  %4702 = vmatprep.subr.msk.mxu0 %vm1497_vm5, %v5442_v6  ;;  %v1161_v56 = vsel %vm1160_vm9, %v1117_v57, 0.0 }
 0x20c   : > { %1155 = vadd.xlane.f32.xlu1 %v1154_v9  ;;  %4694 = vmatpush3.msra.mxu1 %v5394_v45  ;;  %v1118_v9 = vmul.f32 %v5396_v47, %v5396_v47 }
 0x20d   : > { %4703 = vmatpush3.msk.msra.mxu0 %vm1497_vm5, %v5442_v6  ;;  %1255 = vadd.xlane.f32.xlu0 %v1254_v4  ;;  %v1122_v4 = vmul.f32 %v5529_v50, %v5529_v50  ;;  %v2589_v50 = vrot.slane %v5818_v20, 3 }
 0x20e   : > { %4695 = vmatprep.subr.mxu1 %v5412_v54  ;;  %4704 = vmatprep.subr.mxu0 %v5462_v23  ;;  %v1164_v47 = vsel %vm1150_vm3, %v1118_v9, 0.0  ;;  %v1120_v9 = vmul.f32 %v5362_v30, %v5362_v30 }
 0x20f   : > { %4696 = vmatpush3.msra.mxu1 %v5412_v54  ;;  %4705 = vmatpush3.msra.mxu0 %v5462_v23  ;;  %v2591_v57 = vsel %vm1802_vm7, %v2589_v50, %v2590_v28 }
 0x210   : > { %4697 = vmatprep.subr.mxu1 %v5427_v60  ;;  %4706 = vmatprep.subr.mxu0 %v5478_v18  ;;  %v1170_v30 = vsel %vm1150_vm3, %v1120_v9, 0.0  ;;  %v1125_v9 = vmul.f32 %v5482_v17, %v5482_v17 }
 0x211   : > { %1158 = vadd.xlane.f32.xlu1 %v1157_v62  ;;  %4698 = vmatpush3.msra.mxu1 %v5427_v60  ;;  %v1176_v62 = vsel %vm1150_vm3, %v1122_v4, 0.0  ;;  %v2674_v4 = vrot.slane %v5821_v37, 4 }
 0x212   : > { %4707 = vmatpush3.msra.mxu0 %v5478_v18  ;;  %1152 = vadd.xlane.f32.xlu0 %v1151_v16  ;;  %v1124_v16 = vmul.f32 %v5496_v22, %v5496_v22 }
 0x213   : > { %4699 = vmatprep.mubr.msk.f32.mxu1 %vm1150_vm3, %v2346_v46  ;;  %4708 = vmatprep.subr.mxu0 %v5494_v32 }
 0x214   : > { %4713 = vmatprep.subr.msk.mxu1 %vm1497_vm5, %v5504_v38  ;;  %4700 = vmatmul.mubr.msk.f32.vlgmr.msra.gmra.mxu1 %vm1150_vm3, %v2345_v33  ;;  %v1119_v33 = vmul.f32 %v5382_v39, %v5382_v39  ;;  %v2507_v39 = vsel %vm1714_vm6, %v2505_v29, %v2506_v0  ;;  %v1182_v22 = vsel %vm1150_vm3, %v1124_v16, 0.0  ;;  %v1123_v29 = vmul.f32 %v5511_v49, %v5511_v49 }
 0x215   : > { %4709 = vmatpush3.msra.mxu0 %v5494_v32  ;;  %4714 = vmatpush3.msk.msra.mxu1 %vm1497_vm5, %v5504_v38  ;;  %v2841_v16 = vrot.slane %v5818_v20, 6 }
 0x216   : > { %4710 = vmatprep.mubr.msk.f32.mxu0 %vm1150_vm3, %v5818_v20  ;;  %4715 = vmatprep.subr.mxu1 %v5527_v59  ;;  %v1167_v46 = vsel %vm1150_vm3, %v1119_v33, 0.0  ;;  %v1179_v50 = vsel %vm1150_vm3, %v1123_v29, 0.0 }
 0x217   : > { %4724 = vmatprep.subr.msk.mxu0 %vm1497_vm5, %v5571_v3  ;;  %1162 = vadd.xlane.f32.xlu1 %v1161_v56  ;;  %v1131_v56 = vmul.f32 %v5647_v35, %v5647_v35  ;;  %v2757_v35 = vrot.slane %v5818_v20, 5 }
 0x218   : > { %4711 = vmatmul.mubr.msk.f32.vlgmr.msra.gmra.mxu0 %vm1150_vm3, %v5821_v37  ;;  %4716 = vmatpush3.msra.mxu1 %v5527_v59 }
 0x219   : > { %4725 = vmatpush3.msk.msra.mxu0 %vm1497_vm5, %v5571_v3  ;;  %1165 = vadd.xlane.f32.xlu0 %v1164_v47  ;;  %v2673_v47 = vrot.slane %v5818_v20, 4  ;;  %v1203_v33 = vsel %vm1150_vm3, %v1131_v56, 0.0  ;;  %v1185_v56 = vsel %vm1160_vm9, %v1125_v9, 0.0 }
 0x21a   : > { %4717 = vmatprep.subr.mxu1 %v5542_v2  ;;  %4726 = vmatprep.subr.mxu0 %v5596_v41 }
 0x21b   : > { %4718 = vmatpush3.msra.mxu1 %v5542_v2  ;;  %4727 = vmatpush3.msra.mxu0 %v5596_v41  ;;  %v2675_v49 = vsel %vm1890_vm8, %v2673_v47, %v2674_v4 }
 0x21c   : > { %4719 = vmatprep.subr.mxu1 %v5558_v12  ;;  %4728 = vmatprep.subr.mxu0 %v5615_v52 }
 0x21d   : > { %1177 = vadd.xlane.f32.xlu1 %v1176_v62  ;;  %4720 = vmatpush3.msra.mxu1 %v5558_v12 }
 0x21e   : > { %4729 = vmatpush3.msra.mxu0 %v5615_v52  ;;  %1168 = vadd.xlane.f32.xlu0 %v1167_v46  ;;  %v1127_v46 = vmul.f32 %v5581_v31, %v5581_v31  ;;  %v2925_v31 = vrot.slane %v5818_v20, 7  ;;  %v1128_v20 = vmul.f32 %v5554_v10, %v5554_v10  ;;  %v6866_v10 = vld [vmem:[#allocation27_spill] sm:$0xff] }
 0x21f   : > { %4721 = vmatprep.mubr.msk.f32.mxu1 %vm1150_vm3, %v2507_v39  ;;  %4730 = vmatprep.subr.mxu0 %v5635_v8  ;;  %v1121_v39 = vmul.f32 %v5365_v19, %v5365_v19 }
 0x220   : > { %4735 = vmatprep.subr.msk.mxu1 %vm1497_vm5, %v5643_v58  ;;  %4722 = vmatmul.mubr.msk.f32.vlgmr.msra.gmra.mxu1 %vm1150_vm3, %v2506_v0  ;;  %v2758_v0 = vrot.slane %v5821_v37, 5 }
 0x221   : > { %4731 = vmatpush3.msra.mxu0 %v5635_v8  ;;  %4736 = vmatpush3.msk.msra.mxu1 %vm1497_vm5, %v5643_v58  ;;  %v1173_v19 = vsel %vm1160_vm9, %v1121_v39, 0.0 }
 0x222   : > { %4732 = vmatprep.mubr.msk.f32.mxu0 %vm1150_vm3, %v2591_v57  ;;  %4737 = vmatprep.subr.mxu1 %v5664_v55  ;;  %v2759_v62 = vsel %vm499_vm1, %v2757_v35, %v2758_v0  ;;  %v2842_v57 = vrot.slane %v5821_v37, 6  ;;  %v1194_v35 = vsel %vm1150_vm3, %v1128_v20, 0.0 }
 0x223   : > { %4746 = vmatprep.subr.msk.mxu0 %vm1497_vm5, %v5707_v43  ;;  %1183 = vadd.xlane.f32.xlu1 %v1182_v22  ;;  %v2926_v22 = vrot.slane %v5821_v37, 7 }
 0x224   : > { %4733 = vmatmul.mubr.msk.f32.vlgmr.msra.gmra.mxu0 %vm1150_vm3, %v2590_v28  ;;  %4738 = vmatpush3.msra.mxu1 %v5664_v55  ;;  %v1132_v28 = vmul.f32 %v5631_v5, %v5631_v5  ;;  %v2843_v17 = vsel %vm2065_vm4, %v2841_v16, %v2842_v57  ;;  %v6869_v16 = vld [vmem:[#allocation22_spill] sm:$0xff] }
 0x225   : > { %4747 = vmatpush3.msk.msra.mxu0 %vm1497_vm5, %v5707_v43  ;;  %1171 = vadd.xlane.f32.xlu0 %v1170_v30  ;;  %v1191_v30 = vsel %vm1150_vm3, %v1127_v46, 0.0  ;;  %v2927_v47 = vsel %vm1497_vm5, %v2925_v31, %v2926_v22  ;;  %v6022_v46 = vld [vmem:[%s5282_s20 + $0x28] sm:$0x1]  ;;  %v6870_v31 = vld [vmem:[#allocation15_spill] sm:$0xff] }
 0x226   : > { %4739 = vmatprep.subr.mxu1 %v5681_v7  ;;  %4748 = vmatprep.subr.mxu0 %v5727_v11  ;;  %v1206_v5 = vsel %vm1150_vm3, %v1132_v28, 0.0  ;;  %v6006_v28 = vld [vmem:[%s5282_s20 + $0x38] sm:$0xff] }
 0x227   : > { %4740 = vmatpush3.msra.mxu1 %v5681_v7  ;;  %4749 = vmatpush3.msra.mxu0 %v5727_v11  ;;  %v3272_v20 = vrot.slane %v6006_v28, 2 }
 0x228   : > { %4741 = vmatprep.subr.mxu1 %v5697_v53  ;;  %4750 = vmatprep.subr.mxu0 %v5740_v27 }
 0x229   : > { %1204 = vadd.xlane.f32.xlu1 %v1203_v33  ;;  %4742 = vmatpush3.msra.mxu1 %v5697_v53  ;;  %v6867_v33 = vld [vmem:[#allocation24_spill] sm:$0xff] }
 0x22a   : > { %4751 = vmatpush3.msra.mxu0 %v5740_v27  ;;  %1180 = vadd.xlane.f32.xlu0 %v1179_v50  ;;  %v6003_v50 = vld [vmem:[%s5282_s20 + $0x30] sm:$0xff] }
 0x22b   : > { %4743 = vmatprep.mubr.msk.f32.mxu1 %vm1150_vm3, %v2675_v49  ;;  %4752 = vmatprep.subr.mxu0 %v5754_v51  ;;  %v1135_v49 = vmul.f32 %v6867_v33, %v6867_v33  ;;  %v6875_v33 = vld [vmem:[#allocation19_spill] sm:$0xff] }
 0x22c   : > { %4757 = vmatprep.subr.msk.mxu1 %vm1497_vm5, %v5575_v63  ;;  %4744 = vmatmul.mubr.msk.f32.vlgmr.msra.gmra.mxu1 %vm1150_vm3, %v2674_v4  ;;  %v6865_v4 = vld [vmem:[#allocation20_spill] sm:$0xff] }
 0x22d   : > { %4753 = vmatpush3.msra.mxu0 %v5754_v51  ;;  %4758 = vmatpush3.msk.msra.mxu1 %vm1497_vm5, %v5575_v63  ;;  %v1130_v29 = vmul.f32 %v6865_v4, %v6865_v4 }
 0x22e   : > { %4754 = vmatprep.mubr.msk.f32.mxu0 %vm1150_vm3, %v2759_v62  ;;  %4759 = vmatprep.subr.mxu1 %v5619_v25  ;;  %v6868_v62 = vld [vmem:[#allocation17_spill] sm:$0xff] }
 0x22f   : > { %4768 = vmatprep.subr.msk.mxu0 %vm1497_vm5, %v5764_v14  ;;  %1207 = vadd.xlane.f32.xlu1 %v1206_v5  ;;  %v1133_v39 = vmul.f32 %v6868_v62, %v6868_v62  ;;  %v3110_v5 = vrot.slane %v6003_v50, 1 }
 0x230   : > { %4755 = vmatmul.mubr.msk.f32.vlgmr.msra.gmra.mxu0 %vm1150_vm3, %v2758_v0  ;;  %4760 = vmatpush3.msra.mxu1 %v5619_v25  ;;  %v1200_v0 = vsel %vm1150_vm3, %v1130_v29, 0.0 }
 0x231   : > { %4769 = vmatpush3.msk.msra.mxu0 %vm1497_vm5, %v5764_v14  ;;  %1174 = vadd.xlane.f32.xlu0 %v1173_v19  ;;  %v3111_v19 = vrot.slane %v6006_v28, 1 }
 0x232   : > { %4761 = vmatprep.subr.mxu1 %v5651_v36  ;;  %4770 = vmatprep.subr.mxu0 %v5775_v1 }
 0x233   : > { %4762 = vmatpush3.msra.mxu1 %v5651_v36  ;;  %4771 = vmatpush3.msra.mxu0 %v5775_v1  ;;  %v3112_v9 = vsel %vm1546_vm2, %v3110_v5, %v3111_v19  ;;  %vm1485_vm2 = vcmask 1046534  }
 0x234   : > { %4763 = vmatprep.subr.mxu1 %v5685_v44  ;;  %4772 = vmatprep.subr.mxu0 %v5789_v42 }
 0x235   : > { %1192 = vadd.xlane.f32.xlu1 %v1191_v30  ;;  %4764 = vmatpush3.msra.mxu1 %v5685_v44 }
 0x236   : > { %4773 = vmatpush3.msra.mxu0 %v5789_v42  ;;  %1186 = vadd.xlane.f32.xlu0 %v1185_v56 }
 0x237   : > { %4765 = vmatprep.mubr.msk.f32.mxu1 %vm1150_vm3, %v2843_v17  ;;  %4774 = vmatprep.subr.mxu0 %v5797_v26 }
 0x238   : > { %4779 = vmatprep.subr.msk.mxu1 %vm1497_vm5, %v5711_v24  ;;  %4766 = vmatmul.mubr.msk.f32.vlgmr.msra.gmra.mxu1 %vm1150_vm3, %v2842_v57  ;;  %v1136_v57 = vmul.f32 %v6869_v16, %v6869_v16 }
 0x239   : > { %4775 = vmatpush3.msra.mxu0 %v5797_v26  ;;  %4780 = vmatpush3.msk.msra.mxu1 %vm1497_vm5, %v5711_v24 }
 0x23a   : > { %4776 = vmatprep.mubr.msk.f32.mxu0 %vm1150_vm3, %v2927_v47  ;;  %4781 = vmatprep.subr.mxu1 %v6866_v10 }
 0x23b   : > { %4790 = vmatprep.subr.msk.mxu0 %vm1497_vm5, %v5380_v21  ;;  %1195 = vadd.xlane.f32.xlu1 %v1194_v35 }
 0x23c   : > { %4777 = vmatmul.mubr.msk.f32.vlgmr.msra.gmra.mxu0 %vm1150_vm3, %v2926_v22  ;;  %4782 = vmatpush3.msra.mxu1 %v6866_v10  ;;  %v1126_v22 = vmul.f32 %v6870_v31, %v6870_v31 }
 0x23d   : > { %4791 = vmatpush3.msk.msra.mxu0 %vm1497_vm5, %v5380_v21  ;;  %1201 = vadd.xlane.f32.xlu0 %v1200_v0  ;;  %v1215_v21 = vsel %vm1150_vm3, %v1135_v49, 0.0  ;;  %v3356_v0 = vrot.slane %v6006_v28, 3  ;;  %v1138_v49 = vmul.f32 %v6875_v33, %v6875_v33 }
 0x23e   : > { %4783 = vmatprep.subr.mxu1 %v5767_v61  ;;  %4792 = vmatprep.subr.mxu0 %v5394_v45  ;;  %v1188_v30 = vsel %vm1150_vm3, %v1126_v22, 0.0  ;;  %v6881_v22 = vld [vmem:[#allocation11_spill] sm:$0xff] }
 0x23f   : > { %4784 = vmatpush3.msra.mxu1 %v5767_v61  ;;  %4793 = vmatpush3.msra.mxu0 %v5394_v45  ;;  %v1209_v45 = vsel %vm1160_vm9, %v1133_v39, 0.0  ;;  %v1224_v39 = vsel %vm1150_vm3, %v1138_v49, 0.0 }
 0x240   : > { %4785 = vmatprep.subr.mxu1 %v5800_v15  ;;  %4794 = vmatprep.subr.mxu0 %v5412_v54 }
 0x241   : > { %1216 = vadd.xlane.f32.xlu1 %v1215_v21  ;;  %4786 = vmatpush3.msra.mxu1 %v5800_v15  ;;  %v3524_v21 = vrot.slane %v6006_v28, 5 }
 0x242   : > { %4787 = vmatprep.mubr.msk.f32.mxu1 %vm1150_vm3, %v5821_v37  ;;  %4795 = vmatpush3.msra.mxu0 %v5412_v54  ;;  %v1218_v54 = vsel %vm1150_vm3, %v1136_v57, 0.0  ;;  %v3608_v57 = vrot.slane %v6006_v28, 6 }
 0x243   : > { %1210 = vadd.xlane.f32.xlu0 %v1209_v45  ;;  %4788 = vmatmul.mubr.msk.f32.vlgmr.msra.gmra.mxu1 %vm1150_vm3, %v6022_v46  ;;  %v6878_v45 = vld [vmem:[#allocation14_spill] sm:$0xff] }
 0x244   : > { %4796 = vmatprep.subr.mxu0 %v5427_v60  ;;  %4801 = vmatprep.subr.msk.mxu1 %vm1497_vm5, %v5442_v6  ;;  %v1141_v16 = vmul.f32 %v6878_v45, %v6878_v45 }
 0x245   : > { %4797 = vmatpush3.msra.mxu0 %v5427_v60  ;;  %4802 = vmatpush3.msk.msra.mxu1 %vm1497_vm5, %v5442_v6  ;;  %v6871_v60 = vld [vmem:[#allocation18_spill] sm:$0xff]  ;;  %v6872_v6 = vld [vmem:[#allocation13_spill] sm:$0xff] }
 0x246   : > { %4798 = vmatprep.mubr.msk.f32.mxu0 %vm1150_vm3, %v3112_v9  ;;  %4803 = vmatprep.subr.mxu1 %v5462_v23  ;;  %v1139_v17 = vmul.f32 %v6871_v60, %v6871_v60  ;;  %v1129_v56 = vmul.f32 %v6872_v6, %v6872_v6  ;;  %v1233_v31 = vsel %vm1160_vm9, %v1141_v16, 0.0 }
 0x247   : > { %4812 = vmatprep.subr.msk.mxu0 %vm1497_vm5, %v5504_v38  ;;  %1219 = vadd.xlane.f32.xlu1 %v1218_v54 }
 0x248   : > { %4799 = vmatmul.mubr.msk.f32.vlgmr.msra.gmra.mxu0 %vm1150_vm3, %v3111_v19  ;;  %4804 = vmatpush3.msra.mxu1 %v5462_v23  ;;  %v3271_v23 = vrot.slane %v6003_v50, 2  ;;  %v1197_v47 = vsel %vm1160_vm9, %v1129_v56, 0.0 }
 0x249   : > { %4813 = vmatpush3.msk.msra.mxu0 %vm1497_vm5, %v5504_v38  ;;  %1189 = vadd.xlane.f32.xlu0 %v1188_v30  ;;  %v1227_v38 = vsel %vm1150_vm3, %v1139_v17, 0.0 }
 0x24a   : > { %4805 = vmatprep.subr.mxu1 %v5478_v18  ;;  %4814 = vmatprep.subr.mxu0 %v5527_v59  ;;  %v3273_v4 = vsel %vm1714_vm6, %v3271_v23, %v3272_v20 }
 0x24b   : > { %4806 = vmatpush3.msra.mxu1 %v5478_v18  ;;  %4815 = vmatpush3.msra.mxu0 %v5527_v59  ;;  %v6873_v18 = vld [vmem:[#allocation16_spill] sm:$0xff] }
 0x24c   : > { %4807 = vmatprep.subr.mxu1 %v5494_v32  ;;  %4816 = vmatprep.subr.mxu0 %v5542_v2  ;;  %v1140_v59 = vmul.f32 %v6873_v18, %v6873_v18 }
 0x24d   : > { %1228 = vadd.xlane.f32.xlu1 %v1227_v38  ;;  %4808 = vmatpush3.msra.mxu1 %v5494_v32  ;;  %v6874_v32 = vld [vmem:[#allocation25_spill] sm:$0xff] }
 0x24e   : > { %4817 = vmatpush3.msra.mxu0 %v5542_v2  ;;  %1198 = vadd.xlane.f32.xlu0 %v1197_v47  ;;  %v1134_v2 = vmul.f32 %v6874_v32, %v6874_v32  ;;  %v1230_v29 = vsel %vm1150_vm3, %v1140_v59, 0.0 }
 0x24f   : > { %4809 = vmatprep.mubr.msk.f32.mxu1 %vm1150_vm3, %v6003_v50  ;;  %4818 = vmatprep.subr.mxu0 %v5558_v12 }
 0x250   : > { %4823 = vmatprep.subr.msk.mxu1 %vm1497_vm5, %v5571_v3  ;;  %4810 = vmatmul.mubr.msk.f32.vlgmr.msra.gmra.mxu1 %vm1150_vm3, %v6006_v28  ;;  %v1212_v35 = vsel %vm1150_vm3, %v1134_v2, 0.0 }
 0x251   : > { %4819 = vmatpush3.msra.mxu0 %v5558_v12  ;;  %4824 = vmatpush3.msk.msra.mxu1 %vm1497_vm5, %v5571_v3  ;;  %v1143_v12 = vmul.f32 %v5770_v13, %v5770_v13  ;;  %v3355_v3 = vrot.slane %v6003_v50, 3  ;;  %v3440_v13 = vrot.slane %v6006_v28, 4 }
 0x252   : > { %4820 = vmatprep.mubr.msk.f32.mxu0 %vm1150_vm3, %v3273_v4  ;;  %4825 = vmatprep.subr.mxu1 %v5596_v41 }
 0x253   : > { %4834 = vmatprep.subr.msk.mxu0 %vm1497_vm5, %v5643_v58  ;;  %1231 = vadd.xlane.f32.xlu1 %v1230_v29  ;;  %v3357_v62 = vsel %vm1802_vm7, %v3355_v3, %v3356_v0 }
 0x254   : > { %4821 = vmatmul.mubr.msk.f32.vlgmr.msra.gmra.mxu0 %vm1150_vm3, %v3272_v20  ;;  %4826 = vmatpush3.msra.mxu1 %v5596_v41  ;;  %v3439_v41 = vrot.slane %v6003_v50, 4 }
 0x255   : > { %4835 = vmatpush3.msk.msra.mxu0 %vm1497_vm5, %v5643_v58  ;;  %1213 = vadd.xlane.f32.xlu0 %v1212_v35  ;;  %v1239_v58 = vsel %vm1150_vm3, %v1143_v12, 0.0 }
 0x256   : > { %4827 = vmatprep.subr.mxu1 %v5615_v52  ;;  %4836 = vmatprep.subr.mxu0 %v5664_v55 }
 0x257   : > { %4828 = vmatpush3.msra.mxu1 %v5615_v52  ;;  %4837 = vmatpush3.msra.mxu0 %v5664_v55  ;;  %v1144_v55 = vmul.f32 %v5750_v34, %v5750_v34  ;;  %v3441_v52 = vsel %vm1890_vm8, %v3439_v41, %v3440_v13 }
 0x258   : > { %4829 = vmatprep.subr.mxu1 %v5635_v8  ;;  %4838 = vmatprep.subr.mxu0 %v5681_v7 }
 0x259   : > { %1240 = vadd.xlane.f32.xlu1 %v1239_v58  ;;  %4830 = vmatpush3.msra.mxu1 %v5635_v8  ;;  %v6876_v8 = vld [vmem:[#allocation21_spill] sm:$0xff] }
 0x25a   : > { %4839 = vmatpush3.msra.mxu0 %v5681_v7  ;;  %1225 = vadd.xlane.f32.xlu0 %v1224_v39  ;;  %v1137_v5 = vmul.f32 %v6876_v8, %v6876_v8  ;;  %v1242_v7 = vsel %vm1150_vm3, %v1144_v55, 0.0 }
 0x25b   : > { %4831 = vmatprep.mubr.msk.f32.mxu1 %vm1150_vm3, %v3357_v62  ;;  %4840 = vmatprep.subr.mxu0 %v5697_v53 }
 0x25c   : > { %4845 = vmatprep.subr.msk.mxu1 %vm1497_vm5, %v5707_v43  ;;  %4832 = vmatmul.mubr.msk.f32.vlgmr.msra.gmra.mxu1 %vm1150_vm3, %v3356_v0  ;;  %v1221_v34 = vsel %vm1160_vm9, %v1137_v5, 0.0 }
 0x25d   : > { %4841 = vmatpush3.msra.mxu0 %v5697_v53  ;;  %4846 = vmatpush3.msk.msra.mxu1 %vm1497_vm5, %v5707_v43  ;;  %v6877_v53 = vld [vmem:[#allocation26_spill] sm:$0xff]  ;;  %v3523_v43 = vrot.slane %v6003_v50, 5 }
 0x25e   : > { %4842 = vmatprep.mubr.msk.f32.mxu0 %vm1150_vm3, %v3441_v52  ;;  %4847 = vmatprep.subr.mxu1 %v5727_v11  ;;  %v1145_v19 = vmul.f32 %v6877_v53, %v6877_v53 }
 0x25f   : > { %4856 = vmatprep.subr.msk.mxu0 %vm1497_vm5, %v5575_v63  ;;  %1243 = vadd.xlane.f32.xlu1 %v1242_v7  ;;  %v3525_v9 = vsel %vm499_vm1, %v3523_v43, %v3524_v21  ;;  %vm1483_vm1 = vcmask 1045509  }
 0x260   : > { %4843 = vmatmul.mubr.msk.f32.vlgmr.msra.gmra.mxu0 %vm1150_vm3, %v3440_v13  ;;  %4848 = vmatpush3.msra.mxu1 %v5727_v11  ;;  %v3607_v11 = vrot.slane %v6003_v50, 6 }
 0x261   : > { %4857 = vmatpush3.msk.msra.mxu0 %vm1497_vm5, %v5575_v63  ;;  %1222 = vadd.xlane.f32.xlu0 %v1221_v34  ;;  %v1245_v63 = vsel %vm1160_vm9, %v1145_v19, 0.0 }
 0x262   : > { %4849 = vmatprep.subr.mxu1 %v5740_v27  ;;  %4858 = vmatprep.subr.mxu0 %v5619_v25 }
 0x263   : > { %4850 = vmatpush3.msra.mxu1 %v5740_v27  ;;  %4859 = vmatpush3.msra.mxu0 %v5619_v25  ;;  %v3609_v27 = vsel %vm2065_vm4, %v3607_v11, %v3608_v57  ;;  %v1142_v25 = vmul.f32 %v5782_v40, %v5782_v40  ;;  %vm1487_vm4 = vcmask 1047559  }
 0x264   : > { %4851 = vmatprep.subr.mxu1 %v5754_v51  ;;  %4860 = vmatprep.subr.mxu0 %v5651_v36 }
 0x265   : > { %1246 = vadd.xlane.f32.xlu1 %v1245_v63  ;;  %4852 = vmatpush3.msra.mxu1 %v5754_v51  ;;  %v3691_v51 = vrot.slane %v6003_v50, 7  ;;  %v1236_v40 = vsel %vm1150_vm3, %v1142_v25, 0.0 }
 0x266   : > { %4861 = vmatpush3.msra.mxu0 %v5651_v36  ;;  %1234 = vadd.xlane.f32.xlu0 %v1233_v31  ;;  %v3692_v36 = vrot.slane %v6006_v28, 7 }
 0x267   : > { %4853 = vmatprep.mubr.msk.f32.mxu1 %vm1150_vm3, %v3525_v9  ;;  %4862 = vmatprep.subr.mxu0 %v5685_v44 }
 0x268   : > { %4867 = vmatprep.subr.msk.mxu1 %vm1497_vm5, %v5764_v14  ;;  %4854 = vmatmul.mubr.msk.f32.vlgmr.msra.gmra.mxu1 %vm1150_vm3, %v3524_v21  ;;  %v3693_v50 = vsel %vm1497_vm5, %v3691_v51, %v3692_v36 }
 0x269   : > { %4863 = vmatpush3.msra.mxu0 %v5685_v44  ;;  %4868 = vmatpush3.msk.msra.mxu1 %vm1497_vm5, %v5764_v14  ;;  %v6879_v14 = vld [vmem:[#allocation23_spill] sm:$0xff] }
 0x26a   : > { %4864 = vmatprep.mubr.msk.f32.mxu0 %vm1150_vm3, %v3609_v27  ;;  %4869 = vmatprep.subr.mxu1 %v5775_v1  ;;  %v1149_v44 = vmul.f32 %v6879_v14, %v6879_v14 }
 0x26b   : > { %4878 = vmatprep.subr.msk.mxu0 %vm1497_vm5, %v5711_v24  ;;  %4865 = vmatmul.mubr.msk.f32.vlgmr.msra.gmra.mxu0 %vm1150_vm3, %v3608_v57 }
 0x26c   : > { %4870 = vmatpush3.msra.mxu1 %v5775_v1  ;;  %4879 = vmatpush3.msk.msra.mxu0 %vm1497_vm5, %v5711_v24  ;;  %v1257_v24 = vsel %vm1160_vm9, %v1149_v44, 0.0  ;;  %v6191_v1 = vld [vmem:[%s5282_s20 + $0x40] sm:$0x1] }
 0x26d   : > { %1237 = vadd.xlane.f32.xlu0 %v1236_v40  ;;  %4871 = vmatprep.subr.mxu1 %v5789_v42 }
 0x26e   : > { %4880 = vmatprep.subr.mxu0 %v6866_v10  ;;  %4872 = vmatpush3.msra.mxu1 %v5789_v42  ;;  %v6880_v42 = vlaneseq }
 0x26f   : > { %4881 = vmatpush3.msra.mxu0 %v6866_v10  ;;  %4873 = vmatprep.subr.mxu1 %v5797_v26 }
 0x270   : > { %4882 = vmatprep.subr.mxu0 %v5767_v61  ;;  %4874 = vmatpush3.msra.mxu1 %v5797_v26  ;;  %v6200_v26 = vand.u32 127, %v6880_v42 }
 0x271   : > { %4875 = vmatprep.mubr.msk.f32.mxu1 %vm1150_vm3, %v3693_v50  ;;  %4883 = vmatpush3.msra.mxu0 %v5767_v61 }
 0x272   : > { %1258 = vadd.xlane.f32.xlu0 %v1257_v24  ;;  %4876 = vmatmul.mubr.msk.f32.vlgmr.msra.gmra.mxu1 %vm1150_vm3, %v3692_v36  ;;  %v1302_v61 = vadd.s32 4294967288, %v6200_v26  ;;  %v1309_v10 = vadd.s32 4294967280, %v6200_v26  ;;  %v6206_v54 = vsub.s32 %v6200_v26, %v6881_v22  ;;  %v5001_v36 = vld [vmem:[%s5282_s20 + $0x8] sm:$0xff]  ;;  %s6379_s20 = sld [smem:[#allocation3 + $0x302]] }
 0x273   : > { %4884 = vmatprep.subr.mxu0 %v5800_v15  ;;  %4886 = vmatprep.mubr.msk.f32.mxu0 %vm1150_vm3, %v6006_v28 }
 0x274   : > { %4885 = vmatpush3.msra.mxu0 %v5800_v15  ;;  %v6209_v60 = vsub.s32 %v1302_v61, %v6881_v22  ;;  %v6212_v15 = vsub.s32 %v1309_v10, %v6881_v22 }
 0x275   : > { %4887 = vmatmul.mubr.msk.f32.vlgmr.msra.gmra.mxu0 %vm1150_vm3, %v6191_v1 }
 0x28c   : > { %v1253_v28 = vpop.xlane.xlu1 %1252 }
 0x28d   : > { %v1463_v6 = vrot.slane %v1253_v28, %v6209_v60 }
 0x28f   : > { %v1250_v30 = vpop.xlane.xlu0 %1249 }
 0x290   : > { %v1459_v17 = vrot.slane %v1250_v30, %v6206_v54 }
 0x292   : > { %v1464_v20 = vsel %vm1307_vm10, %v1463_v6, %v1459_v17 }
 0x295   : > { %v4602_v47 = vpop.f32.mrf.mxu1  ;;  %v6234_v50 = vpop.xlane.xlu1 %1155 }
 0x296   : > { %v1256_v56 = vpop.xlane.xlu0 %1255 }
 0x297   : > { %v1468_v23 = vrot.slane %v1256_v56, %v6212_v15  ;;  %v1623_v18 = vpop.f32.mrf.mxu1 }
 0x299   : > { %v6219_v38 = vsel %vm1314_vm11, %v1468_v23, %v1464_v20 }
 0x29a   : > { %v6239_v61 = vpop.xlane.xlu1 %1158 }
 0x29b   : > { %v6221_v11 = vpop.xlane.xlu0 %1152 }
 0x29d   : > { %v4613_v59 = vpop.f32.mrf.mxu1 }
 0x29e   : > { %v1711_v3 = vadd.f32 %v4613_v59, %v4602_v47 }
 0x29f   : > { %v1705_v4 = vpop.f32.mrf.mxu1 }
 0x2a0   : > { %v1706_v0 = vadd.f32 %v1705_v4, %v1623_v18  ;;  %v6243_v10 = vpop.xlane.xlu1 %1162 }
 0x2a2   : > { %v6229_v25 = vpop.xlane.xlu0 %1165 }
 0x2a5   : > { %v4624_v32 = vpop.f32.mrf.mxu1 }
 0x2a6   : > { %v1801_v33 = vadd.f32 %v4624_v32, %v1711_v3  ;;  %v6247_v28 = vpop.xlane.xlu1 %1177 }
 0x2a7   : > { %v1791_v2 = vpop.f32.mrf.mxu1  ;;  %v6236_v24 = vpop.xlane.xlu0 %1168 }
 0x2a8   : > { %v1800_v41 = vadd.f32 %v1791_v2, %v1706_v0 }
 0x2ac   : > { %v6251_v56 = vpop.xlane.xlu1 %1183 }
 0x2af   : > { %v4635_v29 = vpop.f32.mrf.mxu1 }
 0x2b0   : > { %v1889_v13 = vadd.f32 %v4635_v29, %v1801_v33 }
 0x2b1   : > { %v1879_v35 = vpop.f32.mrf.mxu1 }
 0x2b2   : > { %v1888_v62 = vadd.f32 %v1879_v35, %v1800_v41  ;;  %v6255_v4 = vpop.xlane.xlu1 %1204 }
 0x2b7   : > { %v4668_v52 = vpop.f32.mrf.mxu0 }
 0x2b8   : > { %v4646_v12 = vpop.f32.mrf.mxu1  ;;  %v6259_v41 = vpop.xlane.xlu1 %1207 }
 0x2b9   : > { %v1977_v39 = vadd.f32 %v4646_v12, %v1889_v13  ;;  %v2142_v34 = vpop.f32.mrf.mxu0 }
 0x2ba   : > { %v1967_v49 = vpop.f32.mrf.mxu1 }
 0x2bb   : > { %v1976_v8 = vadd.f32 %v1967_v49, %v1888_v62 }
 0x2c1   : > { %v4657_v58 = vpop.f32.mrf.mxu1 }
 0x2c2   : > { %v2064_v5 = vadd.f32 %v4657_v58, %v1977_v39 }
 0x2c3   : > { %v2054_v55 = vpop.f32.mrf.mxu1 }
 0x2c4   : > { %v2063_v7 = vadd.f32 %v2054_v55, %v1976_v8  ;;  %v2152_v53 = vadd.f32 %v4668_v52, %v2064_v5 }
 0x2c6   : > { %v2151_v43 = vadd.f32 %v2142_v34, %v2063_v7  ;;  %v6273_v34 = vpop.xlane.xlu1 %1192 }
 0x2c9   : > { %v4679_v19 = vpop.f32.mrf.mxu1 }
 0x2ca   : > { %v2239_v21 = vadd.f32 %v4679_v19, %v2152_v53  ;;  %v4690_v45 = vpop.f32.mrf.mxu0 }
 0x2cb   : > { %v2229_v16 = vpop.f32.mrf.mxu1 }
 0x2cc   : > { %v2238_v57 = vadd.f32 %v2229_v16, %v2151_v43  ;;  %v6223_v63 = vadd.f32 %v4690_v45, %v2239_v21  ;;  %v2312_v9 = vpop.f32.mrf.mxu0 }
 0x2ce   : > { %v6225_v31 = vadd.f32 %v2312_v9, %v2238_v57  ;;  %v2324_v27 = vsub.f32 %v6223_v63, %v5808_v48  ;;  %v6241_v48 = vpop.xlane.xlu0 %1171 }
 0x2d0   : > { %v2326_v51 = vmul.f32 %v2324_v27, %v2324_v27  ;;  %v2323_v40 = vsub.f32 %v6225_v31, %v5001_v36 }
 0x2d2   : > { %v2330_v14 = vsel %vm1160_vm9, %v2326_v51, 0.0  ;;  %v2325_v44 = vmul.f32 %v2323_v40, %v2323_v40  ;;  %v6245_v30 = vpop.xlane.xlu0 %1180  ;;  %v6289_v51 = vpop.xlane.xlu1 %1195 }
 0x2d3   : > { %2331 = vadd.xlane.f32.xlu1 %v2330_v14 }
 0x2d4   : > { %v2327_v42 = vsel %vm1150_vm3, %v2325_v44, 0.0  ;;  %v4701_v6 = vpop.f32.mrf.mxu1 }
 0x2d6   : > { %v6249_v17 = vpop.xlane.xlu0 %1174  ;;  %v2417_v20 = vpop.f32.mrf.mxu1 }
 0x2d7   : > { %2328 = vadd.xlane.f32.xlu1 %v2327_v42 }
 0x2d8   : > { %v4712_v47 = vpop.f32.mrf.mxu0 }
 0x2d9   : > { %v2502_v59 = vadd.f32 %v4712_v47, %v4701_v6  ;;  %v6311_v47 = vpop.xlane.xlu1 %1216 }
 0x2da   : > { %v6253_v23 = vpop.xlane.xlu0 %1186  ;;  %v2496_v32 = vpop.f32.mrf.mxu0 }
 0x2db   : > { %v2497_v3 = vadd.f32 %v2496_v32, %v2417_v20 }
 0x2de   : > { %v6257_v2 = vpop.xlane.xlu0 %1201 }
 0x2e0   : > { %v4723_v18 = vpop.f32.mrf.mxu1 }
 0x2e1   : > { %v2588_v29 = vadd.f32 %v4723_v18, %v2502_v59  ;;  %v1316_v18 = vadd.s32 4294967272, %v6200_v26  ;;  %v1301_v26 = vrot.slane %v6221_v11, %v6206_v54  ;;  %v1306_v11 = vrot.slane %v6234_v50, %v6209_v60 }
 0x2e2   : > { %v2578_v35 = vpop.f32.mrf.mxu1  ;;  %v6261_v58 = vpop.xlane.xlu0 %1210 }
 0x2e3   : > { %v2587_v33 = vadd.f32 %v2578_v35, %v2497_v3  ;;  %v3876_v3 = vstv %s6263_s29  ;;  %v1308_v50 = vsel %vm1307_vm10, %v1306_v11, %v1301_v26  ;;  %v3886_v26 = vstv %s6309_s26 }
 0x2e4   : > { %v4734_v12 = vpop.f32.mrf.mxu0  ;;  %v3908_v11 = vstv %s6313_s27 }
 0x2e5   : > { %v2672_v49 = vadd.f32 %v4734_v12, %v2588_v29  ;;  %v6334_v12 = vsub.s32 %v1316_v18, %v6881_v22 }
 0x2e6   : > { %v2662_v13 = vpop.f32.mrf.mxu0  ;;  %v6277_v19 = vpop.xlane.xlu0 %1189 }
 0x2e7   : > { %v2671_v52 = vadd.f32 %v2662_v13, %v2587_v33  ;;  %v3921_v33 = vstv %s6267_s10  ;;  %v3967_v13 = vstv %s6271_s6 }
 0x2ea   : > { %v6297_v14 = vpop.xlane.xlu0 %1198 }
 0x2ec   : > { %v4745_v0 = vpop.f32.mrf.mxu1 }
 0x2ed   : > { %v2756_v62 = vadd.f32 %v4745_v0, %v2672_v49  ;;  %v3898_v0 = vstv %s6265_s30  ;;  %v3944_v49 = vstv %s6269_s13  ;;  %s6884_s30 = sld [smem:[#allocation10_spill]] }
 0x2ee   : > { %v2746_v39 = vpop.f32.mrf.mxu1  ;;  %v6318_v59 = vpop.xlane.xlu0 %1213 }
 0x2ef   : > { %v2755_v5 = vadd.f32 %v2746_v39, %v2671_v52  ;;  %v4013_v39 = vstv %s6279_s15  ;;  %v1349_v52 = vrot.slane %v6245_v30, %v6209_v60  ;;  %v1326_v30 = vrot.slane %v6229_v25, %v6206_v54 }
 0x2f0   : > { %v4756_v55 = vpop.f32.mrf.mxu0 }
 0x2f1   : > { %v2840_v7 = vadd.f32 %v4756_v55, %v2756_v62  ;;  %v3990_v62 = vstv %s6275_s14  ;;  %v1330_v55 = vrot.slane %v6236_v24, %v6209_v60  ;;  %v1335_v24 = vrot.slane %v6241_v48, %v6212_v15  ;;  %s6891_s14 = sld [smem:[#allocation35_spill]] }
 0x2f2   : > { %v2830_v53 = vpop.f32.mrf.mxu0  ;;  %v6348_v22 = vpop.xlane.xlu0 %1225 }
 0x2f3   : > { %v2839_v16 = vadd.f32 %v2830_v53, %v2755_v5  ;;  %v3880_v53 = vstv %s6283_s17  ;;  %v1331_v25 = vsel %vm1307_vm10, %v1330_v55, %v1326_v30  ;;  %v1392_v55 = vrot.slane %v6259_v41, %v6212_v15  ;;  %s4358_s10 = sshll.u32 %s6884_s30, 7 }
 0x2f4   : > { %v1378_v30 = vrot.slane %v6297_v14, %v6334_v12  ;;  %v6492_v14 = vmul.f32 %v4013_v39, %v6223_v63 }
 0x2f7   : > { %s6648_s15 = scalar_lea.vmem %s6891_s14, %s4358_s10 }
 0x2f8   : > { %v4767_v8 = vpop.f32.mrf.mxu1 }
 0x2f9   : > { %v2924_v43 = vadd.f32 %v4767_v8, %v2840_v7  ;;  %v4036_v8 = vstv %s6281_s16  ;;  %v1313_v7 = vrot.slane %v6239_v61, %v6212_v15  ;;  %v1340_v61 = vrot.slane %v6249_v17, %v6334_v12 }
 0x2fa   : > { %v2914_v21 = vpop.f32.mrf.mxu1 }
 0x2fb   : > { %v2923_v9 = vadd.f32 %v2914_v21, %v2839_v16  ;;  %v1345_v21 = vrot.slane %v6247_v28, %v6206_v54  ;;  %v3925_v16 = vstv %s6287_s19  ;;  %v4017_v28 = vstv %s6301_s24 }
 0x2fc   : > { %v4778_v45 = vpop.f32.mrf.mxu0  ;;  %v1315_v17 = vsel %vm1314_vm11, %v1313_v7, %v1308_v50 }
 0x2fd   : > { %v3008_v27 = vadd.f32 %v4778_v45, %v2924_v43  ;;  %v1320_v43 = vrot.slane %v6243_v10, %v6334_v12  ;;  %v3902_v45 = vstv %s6285_s18  ;;  %v1350_v10 = vsel %vm1307_vm10, %v1349_v52, %v1345_v21 }
 0x2fe   : > { %v2998_v36 = vpop.f32.mrf.mxu0  ;;  %v1368_v21 = vrot.slane %v6273_v34, %v6209_v60  ;;  %v1364_v34 = vrot.slane %v6277_v19, %v6206_v54  ;;  %v1406_v19 = vrot.slane %v6311_v47, %v6209_v60  ;;  %v6470_v47 = vmul.f32 %v3944_v49, %v6223_v63 }
 0x2ff   : > { %v3007_v42 = vadd.f32 %v2998_v36, %v2923_v9  ;;  %v3971_v9 = vstv %s6295_s22  ;;  %v1336_v36 = vsel %vm1314_vm11, %v1335_v24, %v1331_v25  ;;  %v1322_v18 = vsel %vm1321_vm12, %v1320_v43, %v1315_v17 }
 0x300   : > { %v1369_v43 = vsel %vm1307_vm10, %v1368_v21, %v1364_v34  ;;  %v4038_v34 = vmul.f32 %v4036_v8, %v6223_v63 }
 0x303   : > { %v4789_v57 = vpop.f32.mrf.mxu1 }
 0x304   : > { %v6293_v40 = vadd.f32 %v4789_v57, %v3008_v27  ;;  %v3948_v57 = vstv %s6291_s21  ;;  %v3994_v27 = vstv %s6299_s23  ;;  %s6403_s23 = sld [smem:[#allocation5 + $0x7]] }
 0x305   : > { %v3078_v44 = vpop.f32.mrf.mxu1 }
 0x306   : > { %v6305_v6 = vadd.f32 %v3078_v44, %v3007_v42  ;;  %v3090_v20 = vsub.f32 %v6293_v40, %v6022_v46  ;;  %v1354_v44 = vrot.slane %v6251_v56, %v6212_v15  ;;  %v1359_v42 = vrot.slane %v6253_v23, %v6334_v12 }
 0x308   : > { %v3092_v32 = vmul.f32 %v3090_v20, %v3090_v20  ;;  %v3089_v46 = vsub.f32 %v6305_v6, %v5821_v37  ;;  %v6336_v37 = vpop.xlane.xlu1 %1219  ;;  %v6401_v20 = vpop.xlane.xlu0 %1222  ;;  %v1355_v23 = vsel %vm1314_vm11, %v1354_v44, %v1350_v10  ;;  %v6465_v44 = vmul.f32 %v3921_v33, %v6223_v63 }
 0x309   : > { %v4800_v56 = vpop.f32.mrf.mxu0 }
 0x30a   : > { %v3096_v29 = vsel %vm1160_vm9, %v3092_v32, 0.0  ;;  %v3091_v35 = vmul.f32 %v3089_v46, %v3089_v46  ;;  %v1341_v32 = vsel %vm1321_vm12, %v1340_v61, %v1336_v36  ;;  %v1383_v46 = vrot.slane %v6257_v2, %v6206_v54 }
 0x30b   : > { %3097 = vadd.xlane.f32.xlu0 %v3096_v29  ;;  %v4040_v29 = vstv %s6303_s25  ;;  %v1476_v7 = vsel %vm1475_vm13, %v1341_v32, %v1322_v18  ;;  %v3183_v61 = vpop.f32.mrf.mxu0  ;;  %v6480_v18 = vmul.f32 %v3967_v13, %v6223_v63 }
 0x30c   : > { %v3093_v5 = vsel %vm1150_vm3, %v3091_v35, 0.0  ;;  %v6381_v48 = vpop.xlane.xlu1 %1228  ;;  %v1387_v35 = vrot.slane %v6255_v4, %v6209_v60  ;;  %v1360_v4 = vsel %vm1321_vm12, %v1359_v42, %v1355_v23  ;;  %v6431_v17 = vpop.xlane.xlu0 %1234  ;;  %v1421_v42 = vrot.slane %v6348_v22, %v6206_v54 }
 0x30d   : > { %v1478_v32 = vsel %vm1477_vm14, %v1360_v4, %v1476_v7  ;;  %v6455_v4 = vmul.f32 %v3876_v3, %v6223_v63  ;;  %v6502_v22 = vmul.f32 %v3876_v3, %v6225_v31 }
 0x30e   : > { %v1388_v41 = vsel %vm1307_vm10, %v1387_v35, %v1383_v46 }
 0x30f   : > { %3094 = vadd.xlane.f32.xlu0 %v3093_v5  ;;  %v1402_v5 = vrot.slane %v6318_v59, %v6206_v54 }
 0x310   : > { %v4811_v52 = vpop.f32.mrf.mxu1  ;;  %v6422_v24 = vpop.xlane.xlu1 %1231 }
 0x311   : > { %v3268_v36 = vadd.f32 %v4811_v52, %v4800_v56  ;;  %v1373_v56 = vrot.slane %v6289_v51, %v6212_v15  ;;  %v6444_v52 = vsel %vm1314_vm11, %v1392_v55, %v1388_v41  ;;  %v6460_v51 = vmul.f32 %v3898_v0, %v6223_v63  ;;  %v1238_v59 = vpop.xlane.xlu0 %1237 }
 0x312   : > { %v3262_v46 = vpop.f32.mrf.mxu1 }
 0x313   : > { %v3263_v7 = vadd.f32 %v3262_v46, %v3183_v61  ;;  %v6487_v61 = vmul.f32 %v3990_v62, %v6223_v63  ;;  %v6507_v46 = vmul.f32 %v3898_v0, %v6225_v31  ;;  %v1374_v50 = vsel %vm1314_vm11, %v1373_v56, %v1369_v43 }
 0x314   : > { %v4822_v35 = vpop.f32.mrf.mxu0  ;;  %v1241_v41 = vpop.xlane.xlu1 %1240  ;;  %v6515_v63 = vmul.f32 %v3921_v33, %v6225_v31  ;;  %v1407_v0 = vsel %vm1307_vm10, %v1406_v19, %v1402_v5  ;;  %v6527_v43 = vmul.f32 %v3967_v13, %v6225_v31  ;;  %v1440_v33 = vrot.slane %v1238_v59, %v6206_v54 }
 0x315   : > { %v3354_v25 = vadd.f32 %v4822_v35, %v3268_v36  ;;  %v1411_v36 = vrot.slane %v6336_v37, %v6212_v15  ;;  %v1425_v37 = vrot.slane %v6381_v48, %v6209_v60  ;;  %v1430_v5 = vrot.slane %v6422_v24, %v6212_v15  ;;  %v6568_v59 = vpop.xlane.xlu0 %1258 }
 0x316   : > { %v3344_v23 = vpop.f32.mrf.mxu0  ;;  %v6541_v13 = vmul.f32 %v4013_v39, %v6225_v31  ;;  %v1444_v24 = vrot.slane %v1241_v41, %v6209_v60  ;;  %v1416_v19 = vrot.slane %v6401_v20, %v6334_v12 }
 0x317   : > { %v3353_v3 = vadd.f32 %v3344_v23, %v3263_v7  ;;  %v1426_v48 = vsel %vm1307_vm10, %v1425_v37, %v1421_v42  ;;  %v4019_v37 = vmul.f32 %v4017_v28, %v6293_v40 }
 0x318   : > { %v1244_v2 = vpop.xlane.xlu1 %1243  ;;  %v1445_v41 = vsel %vm1307_vm10, %v1444_v24, %v1440_v33  ;;  %v3881_v24 = vmul.f32 %v3880_v53, %v6305_v6 }
 0x31c   : > { %v4833_v55 = vpop.f32.mrf.mxu1 }
 0x31d   : > { %v3438_v21 = vadd.f32 %v4833_v55, %v3354_v25  ;;  %v1379_v25 = vsel %vm1321_vm12, %v1378_v30, %v1374_v50  ;;  %v6522_v55 = vmul.f32 %v3944_v49, %v6225_v31  ;;  %v6536_v49 = vmul.f32 %v3990_v62, %v6225_v31 }
 0x31e   : > { %v3428_v35 = vpop.f32.mrf.mxu1  ;;  %v6546_v30 = vmul.f32 %v4036_v8, %v6225_v31  ;;  %v6549_v54 = vsel %vm1479_vm15, %v1379_v25, %v1478_v32  ;;  %v6553_v62 = vsel %vm1314_vm11, %v1411_v36, %v1407_v0  ;;  %v6557_v31 = vsel %vm1314_vm11, %v1430_v5, %v1426_v48 }
 0x31f   : > { %v3437_v23 = vadd.f32 %v3428_v35, %v3353_v3  ;;  %v3882_v8 = vmul.f32 %v3880_v53, %v6293_v40  ;;  %v3904_v32 = vmul.f32 %v3902_v45, %v6293_v40  ;;  %v3973_v36 = vmul.f32 %v3971_v9, %v6293_v40 }
 0x320   : > { %v4844_v10 = vpop.f32.mrf.mxu0  ;;  %v3996_v35 = vmul.f32 %v3994_v27, %v6293_v40  ;;  %v1435_v3 = vrot.slane %v6431_v17, %v6334_v12  ;;  %v4042_v25 = vmul.f32 %v4040_v29, %v6293_v40  ;;  %v1473_v48 = vrot.slane %v6568_v59, %v6334_v12 }
 0x321   : > { %v3522_v50 = vadd.f32 %v4844_v10, %v3438_v21  ;;  %v1449_v10 = vrot.slane %v1244_v2, %v6212_v15  ;;  %v3927_v15 = vmul.f32 %v3925_v16, %v6293_v40  ;;  %v3950_v21 = vmul.f32 %v3948_v57, %v6293_v40 }
 0x322   : > { %v3512_v42 = vpop.f32.mrf.mxu0  ;;  %v3884_v33 = vadd.f32 %v3882_v8, %v6455_v4  ;;  %v3926_v53 = vmul.f32 %v3925_v16, %v6305_v6 }
 0x323   : > { %v3521_v2 = vadd.f32 %v3512_v42, %v3437_v23  ;;  %v3906_v23 = vadd.f32 %v3904_v32, %v6460_v51  ;;  %v6595_v42 = vsel %vm1314_vm11, %v1449_v10, %v1445_v41  ;;  %v3929_v40 = vadd.f32 %v3927_v15, %v6465_v44 }
 0x324   : > { %v3952_v8 = vadd.f32 %v3950_v21, %v6470_v47  ;;  %v3975_v51 = vadd.f32 %v3973_v36, %v6480_v18  ;;  %v3998_v32 = vadd.f32 %v3996_v35, %v6487_v61  ;;  %v4021_v10 = vadd.f32 %v4019_v37, %v6492_v14 }
 0x325   : > { %v3972_v61 = vmul.f32 %v3971_v9, %v6305_v6  ;;  %v3995_v14 = vmul.f32 %v3994_v27, %v6305_v6  ;;  %v4041_v41 = vmul.f32 %v4040_v29, %v6305_v6  ;;  %v6885_v21 = vstv %s6315_s28 }
 0x326   : > { %v6886_v27 = vstv %s6320_s0  ;;  %v6890_v29 = vstv %s6393_s12 }
 0x328   : > { %v4855_v56 = vpop.f32.mrf.mxu1 }
 0x329   : > { %v3606_v39 = vadd.f32 %v4855_v56, %v3522_v50 }
 0x32a   : > { %v3596_v7 = vpop.f32.mrf.mxu1 }
 0x32b   : > { %v4866_v60 = vpop.f32.mrf.mxu0  ;;  %v3605_v0 = vadd.f32 %v3596_v7, %v3521_v2  ;;  %v4044_v7 = vadd.f32 %v4042_v25, %v4038_v34  ;;  %v4018_v34 = vmul.f32 %v4017_v28, %v6305_v6  ;;  %v6887_v28 = vstv %s6344_s5 }
 0x32c   : > { %v3690_v56 = vadd.f32 %v4866_v60, %v3606_v39  ;;  %v3903_v39 = vmul.f32 %v3902_v45, %v6305_v6  ;;  %v3949_v45 = vmul.f32 %v3948_v57, %v6305_v6  ;;  %v3883_v60 = vadd.f32 %v3881_v24, %v6502_v22 }
 0x32d   : > { %v3680_v50 = vpop.f32.mrf.mxu0  ;;  %v6888_v22 = vstv %s6361_s9  ;;  %v6889_v25 = vstv %s6379_s20 }
 0x32e   : > { %v3689_v47 = vadd.f32 %v3680_v50, %v3605_v0  ;;  %v3905_v57 = vadd.f32 %v3903_v39, %v6507_v46 }
 0x332   : > { %v4877_v5 = vpop.f32.mrf.mxu1 }
 0x333   : > { %v3774_v4 = vadd.f32 %v4877_v5, %v3690_v56 }
 0x334   : > { %v3764_v44 = vpop.f32.mrf.mxu1 }
 0x335   : > { %v4888_v18 = vpop.f32.mrf.mxu0  ;;  %v3773_v15 = vadd.f32 %v3764_v44, %v3689_v47 }
 0x336   : > { %v3854_v16 = vadd.f32 %v4888_v18, %v3774_v4 }
 0x337   : > { %v3844_v18 = vpop.f32.mrf.mxu0 }
 0x338   : > { %v3888_v2 = vmul.f32 %v3886_v26, %v3854_v16  ;;  %v3910_v9 = vmul.f32 %v3908_v11, %v3854_v16  ;;  %v3933_v36 = vmul.f32 %v6885_v21, %v3854_v16  ;;  %v3956_v35 = vmul.f32 %v6886_v27, %v3854_v16 }
 0x339   : > { %v3979_v37 = vmul.f32 %v6887_v28, %v3854_v16  ;;  %v4002_v46 = vmul.f32 %v6888_v22, %v3854_v16  ;;  %v4025_v6 = vmul.f32 %v6889_v25, %v3854_v16  ;;  %v4048_v0 = vmul.f32 %v6890_v29, %v3854_v16 }
 0x33a   : > { %v3890_v56 = vadd.f32 %v3888_v2, %v3884_v33  ;;  %v3912_v50 = vadd.f32 %v3910_v9, %v3906_v23  ;;  %v3935_v5 = vadd.f32 %v3933_v36, %v3929_v40  ;;  %v3958_v24 = vadd.f32 %v3956_v35, %v3952_v8 }
 0x33b   : > { %v3981_v39 = vadd.f32 %v3979_v37, %v3975_v51  ;;  %v4004_v4 = vadd.f32 %v4002_v46, %v3998_v32  ;;  %v4027_v44 = vadd.f32 %v4025_v6, %v4021_v10  ;;  %v4050_v47 = vadd.f32 %v4048_v0, %v4044_v7 }
 0x33c   : > { %v6892_v21 = vstv %s6324_s1  ;;  %v6893_v23 = vstv %s6326_s2  ;;  %v6894_v40 = vstv %s6329_s3  ;;  %v6895_v9 = vstv %s6338_s4  ;;  %s6916_s3 = sld [smem:[#allocation36_spill]] }
 0x33d   : > { %v3894_v33 = vadd.f32 %v6892_v21, %v3890_v56  ;;  %v3916_v2 = vadd.f32 %v6893_v23, %v3912_v50  ;;  %v3939_v8 = vadd.f32 %v6894_v40, %v3935_v5  ;;  %v3962_v36 = vadd.f32 %v6895_v9, %v3958_v24  ;;  %v1247_v24 = vpop.xlane.xlu1 %1246 }
 0x33e   : > { %v6896_v27 = vstv %s6353_s11  ;;  %v6897_v28 = vstv %s6369_s8  ;;  %v6898_v32 = vstv %s6387_s7  ;;  %v6899_v37 = vstv %s6403_s23  ;;  %s6917_s8 = sld [smem:[#allocation37_spill]] }
 0x33f   : > { %v3985_v35 = vadd.f32 %v6896_v27, %v3981_v39  ;;  %v4008_v51 = vadd.f32 %v6897_v28, %v4004_v4  ;;  %v4031_v10 = vadd.f32 %v6898_v32, %v4027_v44  ;;  %v4054_v7 = vadd.f32 %v6899_v37, %v4050_v47  ;;  %3896 = vst.msk [vmem:[%s6648_s15 + $0x8] sm:$0x1] %vm1160_vm9, %v3894_v33 }
 0x340   : > { %v3928_v22 = vadd.f32 %v3926_v53, %v6515_v63  ;;  %v3951_v46 = vadd.f32 %v3949_v45, %v6522_v55  ;;  %v3974_v25 = vadd.f32 %v3972_v61, %v6527_v43  ;;  %4319 = vst.msk [vmem:[%s6648_s15 + $0x18] sm:$0x1] %vm1160_vm9, %v3916_v2  ;;  %4325 = vst.msk [vmem:[%s6648_s15 + $0x28] sm:$0x1] %vm1160_vm9, %v3939_v8  ;;  %v6904_v0 = vstv %s6379_s20 }
 0x341   : > { %4331 = vst.msk [vmem:[%s6648_s15 + $0x38] sm:$0x1] %vm1160_vm9, %v3962_v36  ;;  %v3853_v6 = vadd.f32 %v3844_v18, %v3773_v15  ;;  %v3997_v63 = vadd.f32 %v3995_v14, %v6536_v49  ;;  %v4020_v55 = vadd.f32 %v4018_v34, %v6541_v13  ;;  %v4043_v43 = vadd.f32 %v4041_v41, %v6546_v30 }
 0x342   : > { %4337 = vst.msk [vmem:[%s6648_s15 + $0x48] sm:$0x1] %vm1160_vm9, %v3985_v35  ;;  %4343 = vst.msk [vmem:[%s6648_s15 + $0x58] sm:$0x1] %vm1160_vm9, %v4008_v51  ;;  %v3856_v53 = vsub.f32 %v3854_v16, %v6191_v1  ;;  %v6900_v15 = vstv %s6315_s28  ;;  %v6901_v13 = vstv %s6320_s0  ;;  %v6906_v18 = vmov %v6892_v21  ;;  %s6907_s0 = sld [smem:[#allocation12_spill]]  ;;  %s394_s4 = scalar_lea.vmem %s6916_s3, %s6884_s30 }
 0x343   : > { %4349 = vst.msk [vmem:[%s6648_s15 + $0x68] sm:$0x1] %vm1160_vm9, %v4031_v10  ;;  %4355 = vst.msk [vmem:[%s6648_s15 + $0x78] sm:$0x1] %vm1160_vm9, %v4054_v7  ;;  %v3887_v45 = vmul.f32 %v3886_v26, %v3853_v6  ;;  %v3909_v61 = vmul.f32 %v3908_v11, %v3853_v6  ;;  %v3932_v49 = vmul.f32 %v6900_v15, %v3853_v6  ;;  %v6902_v14 = vstv %s6344_s5 }
 0x344   : > { %v3955_v30 = vmul.f32 %v6901_v13, %v3853_v6  ;;  %v3978_v34 = vmul.f32 %v6902_v14, %v3853_v6  ;;  %v6903_v41 = vstv %s6361_s9  ;;  %v4024_v56 = vmul.f32 %v6904_v0, %v3853_v6  ;;  %s397_s9 = scalar_lea.vmem %s6917_s8, %s6884_s30 }
 0x345   : > { %v4001_v29 = vmul.f32 %v6903_v41, %v3853_v6  ;;  %v6905_v1 = vstv %s6393_s12  ;;  %v3889_v11 = vadd.f32 %v3887_v45, %v3883_v60  ;;  %v3911_v16 = vadd.f32 %v3909_v61, %v3905_v57 }
 0x346   : > { %v4047_v26 = vmul.f32 %v6905_v1, %v3853_v6  ;;  %v3934_v50 = vadd.f32 %v3932_v49, %v3928_v22  ;;  %v3957_v5 = vadd.f32 %v3955_v30, %v3951_v46  ;;  %v3980_v39 = vadd.f32 %v3978_v34, %v3974_v25 }
 0x347   : > { %v4003_v4 = vadd.f32 %v4001_v29, %v3997_v63  ;;  %v4026_v44 = vadd.f32 %v4024_v56, %v4020_v55  ;;  %v3893_v21 = vadd.f32 %v6906_v18, %v3889_v11  ;;  %v6908_v33 = vmov %v6893_v23 }
 0x348   : > { %v4049_v47 = vadd.f32 %v4047_v26, %v4043_v43  ;;  %v3915_v23 = vadd.f32 %v6908_v33, %v3911_v16  ;;  %v6909_v2 = vmov %v6894_v40  ;;  %v6910_v40 = vmov %v6895_v9  ;;  %v5002_v22 = vld [vmem:[%s6907_s0 + $0x38] sm:$0xff] }
 0x349   : > { %v3938_v60 = vadd.f32 %v6909_v2, %v3934_v50  ;;  %v3961_v57 = vadd.f32 %v6910_v40, %v3957_v5  ;;  %v6911_v8 = vmov %v6896_v27  ;;  %v6912_v36 = vmov %v6897_v28  ;;  %3895 = vst.msk [vmem:[%s6648_s15] sm:$0xff] %vm1150_vm3, %v3893_v21 }
 0x34a   : > { %v3984_v9 = vadd.f32 %v6911_v8, %v3980_v39  ;;  %v4007_v27 = vadd.f32 %v6912_v36, %v4003_v4  ;;  %v6913_v35 = vmov %v6898_v32  ;;  %v6914_v51 = vmov %v6899_v37  ;;  %4318 = vst.msk [vmem:[%s6648_s15 + $0x10] sm:$0xff] %vm1150_vm3, %v3915_v23 }
 0x34b   : > { %v4030_v28 = vadd.f32 %v6913_v35, %v4026_v44  ;;  %v4053_v32 = vadd.f32 %v6914_v51, %v4049_v47  ;;  %v1417_v10 = vsel %vm1321_vm12, %v1416_v19, %v6553_v62  ;;  %v1454_v37 = vrot.slane %v1247_v24, %v6334_v12  ;;  %4324 = vst.msk [vmem:[%s6648_s15 + $0x20] sm:$0xff] %vm1150_vm3, %v3938_v60 }
 0x34c   : > { %4330 = vst.msk [vmem:[%s6648_s15 + $0x30] sm:$0xff] %vm1150_vm3, %v3961_v57  ;;  %v3858_v7 = vmul.f32 %v3856_v53, %v3856_v53  ;;  %v3855_v46 = vsub.f32 %v3853_v6, %v5002_v22  ;;  %v6915_v25 = vrot.slane %v6261_v58, %v6334_v12  ;;  %v1436_v62 = vsel %vm1321_vm12, %v1435_v3, %v6557_v31 }
 0x34d   : > { %4336 = vst.msk [vmem:[%s6648_s15 + $0x40] sm:$0xff] %vm1150_vm3, %v3984_v9  ;;  %4342 = vst.msk [vmem:[%s6648_s15 + $0x50] sm:$0xff] %vm1150_vm3, %v4007_v27  ;;  %v1474_v31 = vsel %vm1321_vm12, %v1473_v48, %v6219_v38 }
 0x34e   : > { %v1398_v20 = vsel %vm1321_vm12, %v6915_v25, %v6444_v52  ;;  %4348 = vst.msk [vmem:[%s6648_s15 + $0x60] sm:$0xff] %vm1150_vm3, %v4030_v28  ;;  %4354 = vst.msk [vmem:[%s6648_s15 + $0x70] sm:$0xff] %vm1150_vm3, %v4053_v32  ;;  %v3862_v58 = vsel %vm1160_vm9, %v3858_v7, 0.0  ;;  %v3857_v19 = vmul.f32 %v3855_v46, %v3855_v46  ;;  %v1455_v52 = vsel %vm1321_vm12, %v1454_v37, %v6595_v42 }
 0x34f   : > { %v1482_v17 = vsel %vm1481_vm0, %v1398_v20, %v6549_v54  ;;  %3863 = vadd.xlane.f32.xlu1 %v3862_v58  ;;  %v1494_v43 = vsel %vm1160_vm9, %v1474_v31, 0.0 }
 0x350   : > { %v1484_v3 = vsel %vm1483_vm1, %v1417_v10, %v1482_v17  ;;  %v3859_v6 = vsel %vm1150_vm3, %v3857_v19, 0.0 }
 0x351   : > { %v1486_v63 = vsel %vm1485_vm2, %v1436_v62, %v1484_v3  ;;  %3860 = vadd.xlane.f32.xlu0 %v3859_v6 }
 0x352   : > { %v1488_v55 = vsel %vm1487_vm4, %v1455_v52, %v1486_v63 }
 0x353   : > { %1495 = vadd.xlane.f32.xlu1 %v1494_v43  ;;  %v1491_v42 = vsel %vm1150_vm3, %v1488_v55, 0.0  ;;  %vm1506_vm3 = vcmask 0  }
 0x355   : > { %1492 = vadd.xlane.f32.xlu0 %v1491_v42 }
 0x35c   : > { %v2332_v53 = vpop.xlane.xlu1 %2331 }
 0x35d   : > { %v2333_v59 = vsel %vm1497_vm5, %v2332_v53, 0.0 }
 0x360   : > { %v2329_v61 = vpop.xlane.xlu1 %2328 }
 0x361   : > { %v2334_v48 = vadd.f32 %v2333_v59, %v2329_v61 }
 0x363   : > { %v2335_v49 = vrot.slane %v2334_v48, 4 }
 0x365   : > { %v2336_v30 = vadd.f32 %v2335_v49, %v2334_v48 }
 0x367   : > { %v2337_v41 = vrot.slane %v2336_v30, 2 }
 0x369   : > { %v2338_v11 = vadd.f32 %v2337_v41, %v2336_v30 }
 0x36b   : > { %v2339_v44 = vrot.slane %v2338_v11, 1 }
 0x36d   : > { %v2340_v2 = vadd.f32 %v2339_v44, %v2338_v11 }
 0x394   : > { %v3098_v54 = vpop.xlane.xlu0 %3097 }
 0x395   : > { %v3099_v12 = vsel %vm1497_vm5, %v3098_v54, 0.0 }
 0x398   : > { %v3095_v45 = vpop.xlane.xlu0 %3094 }
 0x399   : > { %v3100_v38 = vadd.f32 %v3099_v12, %v3095_v45 }
 0x39b   : > { %v3101_v15 = vrot.slane %v3100_v38, 4 }
 0x39d   : > { %v3102_v13 = vadd.f32 %v3101_v15, %v3100_v38 }
 0x39f   : > { %v3103_v14 = vrot.slane %v3102_v13, 2 }
 0x3a1   : > { %v3104_v56 = vadd.f32 %v3103_v14, %v3102_v13 }
 0x3a3   : > { %v3105_v24 = vrot.slane %v3104_v56, 1 }
 0x3a5   : > { %v3106_v21 = vadd.f32 %v3105_v24, %v3104_v56 }
 0x3a7   : > { %v3107_v57 = vadd.f32 %v3106_v21, %v2340_v2 }
 0x3d8   : > { %v3864_v34 = vpop.xlane.xlu1 %3863 }
 0x3d9   : > { %v3865_v29 = vsel %vm1497_vm5, %v3864_v34, 0.0 }
 0x3da   : > { %v3861_v0 = vpop.xlane.xlu0 %3860 }
 0x3db   : > { %v3866_v1 = vadd.f32 %v3865_v29, %v3861_v0 }
 0x3dc   : > { %v1496_v26 = vpop.xlane.xlu1 %1495 }
 0x3dd   : > { %v3867_v16 = vrot.slane %v3866_v1, 4  ;;  %v1498_v50 = vsel %vm1497_vm5, %v1496_v26, 0.0 }
 0x3de   : > { %v1493_v5 = vpop.xlane.xlu0 %1492 }
 0x3df   : > { %v3868_v39 = vadd.f32 %v3867_v16, %v3866_v1  ;;  %v1499_v4 = vadd.f32 %v1498_v50, %v1493_v5 }
 0x3e1   : > { %v3869_v47 = vrot.slane %v3868_v39, 2  ;;  %v1500_v18 = vrot.slane %v1499_v4, 4 }
 0x3e3   : > { %v3870_v33 = vadd.f32 %v3869_v47, %v3868_v39  ;;  %v1501_v23 = vadd.f32 %v1500_v18, %v1499_v4 }
 0x3e5   : > { %v3871_v60 = vrot.slane %v3870_v33, 1  ;;  %v1502_v40 = vrot.slane %v1501_v23, 2 }
 0x3e7   : > { %v3872_v8 = vadd.f32 %v3871_v60, %v3870_v33  ;;  %v1503_v9 = vadd.f32 %v1502_v40, %v1501_v23 }
 0x3e9   : > { %v3873_v36 = vadd.f32 %v3872_v8, %v3107_v57  ;;  %v1504_v27 = vrot.slane %v1503_v9, 1 }
 0x3eb   : > { %3874 = vst.msk [vmem:[%s394_s4] sm:$0x1] %vm1506_vm3, %v3873_v36  ;;  %v1505_v35 = vadd.f32 %v1504_v27, %v1503_v9 }
 0x3ed   : > { %1507 = vst.msk [vmem:[%s397_s9] sm:$0x1] %vm1506_vm3, %v1505_v35 }
 0x3ee PF: > { %s6918_s11 = sld [smem:[#allocation9_spill]] }
 0x3f4   : > { %s23_s11 = sadd.s32 1, %s6918_s11  }
 0x3f5   : > { %p20_p5 = scmp.ge.s32.totalorder %s23_s11, 4  }
 0x3f7   :  { %22 = sbr.rel (!%p20_p5) target bundleno = 13 (0xd), region = 121 }
 0x3fc   :  { %4103 = vsyncpa [#allocation4], 1 }
 0x3fd   :  { %4105 = vsyncpa [#allocation4 + $0x1], 1 }
 0x3fe   :  { %4106 = vsyncpa [#allocation6], 1 }

</bundles_post_ra>
